<compile_context>
chip_gen: v5e
topology: v5e:2x2
jax: 0.10.0
libtpu: 0.0.40
codegen_flags: <defaults>
</compile_context>

<pallas_src>
import jax
import jax.numpy as jnp
from jax.experimental import pallas as pl
from jax.experimental.pallas import tpu as pltpu

EPS = 1e-5                  # nn.BatchNorm2d default eps
LANES = 128                 # vreg lane width -> folded-K / C_out padded to this
MXU_DTYPE = jnp.bfloat16    # matmul operand dtype (accumulation is always f32)


# ------------------------------- fused kernel ------------------------------- #
def make_fused_block_kernel(n, ho, wo, cin, cout, cp, mxu_dtype):
    """Whole residual block in one kernel; all intermediates stay in VMEM.

    Refs:
      x00..x11 : (n, ho+1, wo+1, cin) f32  stride-2 phases of the halo'd (pad=1) input
                                           at TRUE channel width (no HBM lane padding)
      w1, w2   : (cp, cp) mxu_dtype  folded im2col weights, rows = (kh*3+kw)*C + c
      wds      : (cp, cp) mxu_dtype  1x1 downsample weight embedded at the centre-tap rows
      bn1/2/ds : (2, cp) f32  rows = [BN gamma, BN beta]  (conv bias cancels in batch BN)
      alphas   : (3,) f32 SMEM  [PReLU1, PReLU2, final PReLU]
      o_ref    : (n*ho*wo, cp) f32  lane-dense output
      lhs_ref  : (n*ho*wo, cp) mxu_dtype  shared im2col LHS scratch (conv1/skip, then conv2)
    """
    m = n * ho * wo
    inv_m = 1.0 / float(m)

    def bn_train(y, bn_ref):
        # One-pass batch-statistic BatchNorm2d (training mode) over N*H*W, in f32.
        mean = jnp.sum(y, axis=0, keepdims=True) * inv_m
        mean_sq = jnp.sum(y * y, axis=0, keepdims=True) * inv_m
        var = mean_sq - mean * mean
        return (y - mean) * jax.lax.rsqrt(var + EPS) * bn_ref[0:1, :] + bn_ref[1:2, :]

    def prelu(y, alpha):
        return jnp.where(y >= 0, y, alpha * y)

    def kernel(x00_ref, x01_ref, x10_ref, x11_ref,
               w1_ref, bn1_ref, w2_ref, bn2_ref, wds_ref, bnds_ref,
               alpha_ref, o_ref, lhs_ref):
        phases = ((x00_ref, x01_ref), (x10_ref, x11_ref))

        # One full zero fill of the LHS scratch: rows of the folded weights past the
        # real K lanes are zero, so this only guards against NaNs in uninitialized VMEM.
        lhs_ref[...] = jnp.zeros((m, cp), mxu_dtype)

        # ---- pack conv1/skip im2col LHS: tap (kh,kw) -> lanes [(kh*3+kw)*cin, +cin) --
        #   x_pad[b, 2i+kh, 2j+kw, :] == phase[kh%2][kw%2][b, i+kh//2, j+kw//2, :]
        for kh in range(3):
            for kw in range(3):
                ph, dh = kh % 2, kh // 2
                pw, dw = kw % 2, kw // 2
                t = phases[ph][pw][:, dh:dh + ho, dw:dw + wo, :]   # (n, ho, wo, cin) f32
                off = (kh * 3 + kw) * cin
                lhs_ref[:, off:off + cin] = t.reshape(m, cin).astype(mxu_dtype)
        lhs1 = lhs_ref[...]

        # ---- conv1 (3x3 s2) and downsample (1x1 s2) share the same LHS: 2 matmuls ---
        y1 = jnp.dot(lhs1, w1_ref[...], preferred_element_type=jnp.float32)
        skip = jnp.dot(lhs1, wds_ref[...], preferred_element_type=jnp.float32)
        skip = bn_train(skip, bnds_ref)                             # BN only, no PReLU
        c1 = prelu(bn_train(y1, bn1_ref), alpha_ref[0])             # (m, cp) f32

        # ---- conv2 (3x3 s1 pad 1) on the VMEM-resident c1 --------------------------
        # Value-level zero halo (no scratch, no full zero-fill): concatenates are along
        # non-minor axes only.
        c1v = c1[:, :cout].reshape(n, ho, wo, cout)
        zrow = jnp.zeros((n, 1, wo, cout), jnp.float32)
        c1v = jnp.concatenate([zrow, c1v, zrow], axis=1)            # (n, ho+2, wo, cout)
        zcol = jnp.zeros((n, ho + 2, 1, cout), jnp.float32)
        c1p = jnp.concatenate([zcol, c1v, zcol], axis=2)            # (n, ho+2, wo+2, cout)

        for kh in range(3):
            for kw in range(3):
                t = c1p[:, kh:kh + ho, kw:kw + wo, :]               # (n, ho, wo, cout)
                off = (kh * 3 + kw) * cout
                lhs_ref[:, off:off + cout] = t.reshape(m, cout).astype(mxu_dtype)
        # lanes [9*cout, cp) are still zero from the initial fill.
        lhs2 = lhs_ref[...]

        y2 = jnp.dot(lhs2, w2_ref[...], preferred_element_type=jnp.float32)
        y2 = prelu(bn_train(y2, bn2_ref), alpha_ref[1])

        # ---- residual add + fresh PReLU (default alpha = 0.25) ---------------------
        o_ref[...] = prelu(y2 + skip, alpha_ref[2])

    return kernel


# ------------------------------ wrapper (glue) ------------------------------ #
def conv_res_block(x_nchw, p, *, mxu_dtype=MXU_DTYPE):
    """Forward pass of ConvResBlock. Input/output in PyTorch NCHW layout."""
    n, cin, h, w = x_nchw.shape
    cout = p["b1"].shape[0]
    assert h % 2 == 0 and w % 2 == 0, "stride-2 block expects even spatial dims"
    ho, wo = h // 2, w // 2
    m = n * ho * wo
    cp = LANES
    assert 9 * cin <= cp and 9 * cout <= cp and cout <= cp, "needs a K grid (see TODO)"

    # Layout plumbing in plain JAX: 1-pixel spatial halo + stride-2 phase split only.
    # Channels stay at TRUE width -> input HBM bytes ~1x the input (not 32x).
    x = jnp.transpose(x_nchw, (0, 2, 3, 1)).astype(jnp.float32)       # NHWC
    x = jnp.pad(x, ((0, 0), (1, 1), (1, 1), (0, 0)))                  # halo only
    hp2, wp2 = (h + 2) // 2, (w + 2) // 2
    # xph[ph, pw, b, i, j, c] = x_pad[b, 2i+ph, 2j+pw, c]
    xph = x.reshape(n, hp2, 2, wp2, 2, cin).transpose(2, 4, 0, 1, 3, 5)
    x00, x01, x10, x11 = xph[0, 0], xph[0, 1], xph[1, 0], xph[1, 1]

    def fold_w(wt):                      # HWIO -> (9*ci -> pad cp, co -> pad cp), bf16
        kh, kw, ci, co = wt.shape
        wf = wt.reshape(kh * kw * ci, co)
        return jnp.pad(wf, ((0, cp - kh * kw * ci), (0, cp - co))).astype(mxu_dtype)

    w1 = fold_w(p["w1"])
    w2 = fold_w(p["w2"])
    # 1x1 stride-2 downsample == centre tap (1,1) of the 3x3 stride-2 im2col ->
    # embed its weights at K rows [4*cin, 5*cin) so the skip branch reuses conv1's LHS.
    wds = jnp.zeros((cp, cp), jnp.float32)
    wds = wds.at[4 * cin:5 * cin, :cout].set(p["ds_w"][0, 0]).astype(mxu_dtype)

    def pack_bn(gamma, beta):            # conv bias dropped: cancels in batch-stat BN
        stacked = jnp.stack([gamma, beta]).astype(jnp.float32)
        return jnp.pad(stacked, ((0, 0), (0, cp - gamma.shape[0])))

    bn1 = pack_bn(p["g1"], p["bt1"])
    bn2 = pack_bn(p["g2"], p["bt2"])
    bnds = pack_bn(p["ds_g"], p["ds_bt"])
    alphas = jnp.concatenate([p["a1"], p["a2"], p["a3"]]).astype(jnp.float32)

    vmem = pl.BlockSpec(memory_space=pltpu.MemorySpace.VMEM)
    smem = pl.BlockSpec(memory_space=pltpu.MemorySpace.SMEM)
    itemsize = jnp.dtype(mxu_dtype).itemsize
    cost = pl.CostEstimate(
        flops=2 * m * cp * cp * 3,
        transcendentals=3 * cp,
        bytes_accessed=(4 * x00.size * 4
                        + 3 * cp * cp * itemsize
                        + 3 * 2 * cp * 4
                        + m * cp * 4))

    out = pl.pallas_call(
        make_fused_block_kernel(n, ho, wo, cin, cout, cp, mxu_dtype),
        out_shape=jax.ShapeDtypeStruct((m, cp), jnp.float32),
        in_specs=[vmem] * 10 + [smem],
        out_specs=vmem,
        scratch_shapes=[pltpu.VMEM((m, cp), mxu_dtype)],   # shared im2col LHS scratch
        compiler_params=pltpu.CompilerParams(vmem_limit_bytes=32 * 1024 * 1024),
        cost_estimate=cost,
    )(x00, x01, x10, x11, w1, bn1, w2, bn2, wds, bnds, alphas)

    out = out.reshape(n, ho, wo, cp)[:, :, :, :cout]
    return jnp.transpose(out, (0, 3, 1, 2))                           # NHWC -> NCHW


# ----------------------------- plain-JAX reference --------------------------- #
def _ref_conv(x, w, b, stride, pad):
    y = jax.lax.conv_general_dilated(
        x, w, (stride, stride), [(pad, pad), (pad, pad)],
        dimension_numbers=("NHWC", "HWIO", "NHWC"),
        precision=jax.lax.Precision.HIGHEST)
    return y + b


def _ref_bn(y, g, bt):
    mean = y.mean(axis=(0, 1, 2), keepdims=True)
    var = ((y - mean) ** 2).mean(axis=(0, 1, 2), keepdims=True)
    return (y - mean) * jax.lax.rsqrt(var + EPS) * g + bt


def _ref_prelu(y, a):
    return jnp.where(y >= 0, y, a * y)


def reference(x_nchw, p):
    x = jnp.transpose(x_nchw, (0, 2, 3, 1))
    skip = _ref_bn(_ref_conv(x, p["ds_w"], p["ds_b"], 2, 0), p["ds_g"], p["ds_bt"])
    c1 = _ref_prelu(_ref_bn(_ref_conv(x, p["w1"], p["b1"], 2, 1), p["g1"], p["bt1"]),
                    p["a1"][0])
    c2 = _ref_prelu(_ref_bn(_ref_conv(c1, p["w2"], p["b2"], 1, 1), p["g2"], p["bt2"]),
                    p["a2"][0])
    out = _ref_prelu(c2 + skip, p["a3"][0])
    return jnp.transpose(out, (0, 3, 1, 2))


# ------------------------------------ main ----------------------------------- #
if __name__ == "__main__":
    in_channels, out_channels = 4, 8
    N, H, W = 2, 16, 16

    key = jax.random.PRNGKey(0)
    ks = jax.random.split(key, 11)

    def norm(k, shape, scale=0.1):
        return scale * jax.random.normal(k, shape, jnp.float32)

    params = {
        # conv1: 3x3, stride 2, pad 1   (HWIO)
        "w1": norm(ks[0], (3, 3, in_channels, out_channels)),
        "b1": norm(ks[1], (out_channels,)),
        "g1": 1.0 + norm(ks[2], (out_channels,)),
        "bt1": norm(ks[3], (out_channels,)),
        "a1": jnp.array([0.25], jnp.float32),        # nn.PReLU default
        # conv2: 3x3, stride 1, pad 1
        "w2": norm(ks[4], (3, 3, out_channels, out_channels)),
        "b2": norm(ks[5], (out_channels,)),
        "g2": 1.0 + norm(ks[6], (out_channels,)),
        "bt2": norm(ks[7], (out_channels,)),
        "a2": jnp.array([0.25], jnp.float32),
        # downsample: 1x1, stride 2, pad 0
        "ds_w": norm(ks[8], (1, 1, in_channels, out_channels)),
        "ds_b": norm(ks[9], (out_channels,)),
        "ds_g": jnp.ones((out_channels,), jnp.float32),
        "ds_bt": jnp.zeros((out_channels,), jnp.float32),
        # final PReLU is freshly constructed each forward -> default 0.25
        "a3": jnp.array([0.25], jnp.float32),
    }

    x = jax.random.normal(ks[10], (N, in_channels, H, W), jnp.float32)

    out = jax.block_until_ready(jax.jit(conv_res_block)(x, params))
    assert out.shape == (N, out_channels, H // 2, W // 2), out.shape

    ref = reference(x, params)
    max_err = float(jnp.max(jnp.abs(out - ref)))
    # bf16 MXU operands (f32 accumulation / f32 BN math) vs an f32 HIGHEST reference.
    tol = 5e-3 if MXU_DTYPE == jnp.float32 else 3e-2
    assert max_err < tol, f"mismatch vs reference: {max_err}"

    print("KERNEL_OK")
</pallas_src>

<mosaic_0001>
module attributes {stable_mosaic.version = 11 : i64} {
  func.func @kernel(%arg0: memref<2x9x9x4xf32, #tpu.memory_space<vmem>>, %arg1: memref<2x9x9x4xf32, #tpu.memory_space<vmem>>, %arg2: memref<2x9x9x4xf32, #tpu.memory_space<vmem>>, %arg3: memref<2x9x9x4xf32, #tpu.memory_space<vmem>>, %arg4: memref<128x128xbf16, #tpu.memory_space<vmem>>, %arg5: memref<2x128xf32, #tpu.memory_space<vmem>>, %arg6: memref<128x128xbf16, #tpu.memory_space<vmem>>, %arg7: memref<2x128xf32, #tpu.memory_space<vmem>>, %arg8: memref<128x128xbf16, #tpu.memory_space<vmem>>, %arg9: memref<2x128xf32, #tpu.memory_space<vmem>>, %arg10: memref<3xf32, #tpu.memory_space<smem>>, %arg11: memref<128x128xf32, #tpu.memory_space<vmem>>, %arg12: memref<128x128xbf16, #tpu.memory_space<vmem>>) attributes {dimension_semantics = [], scalar_prefetch = 0 : i64, scratch_operands = 1 : i64, tpu.core_type = #tpu.core_type<tc>} {
    %cst = arith.constant 0.000000e+00 : bf16
    %0 = vector.broadcast %cst : bf16 to vector<128x128xbf16>
    %c0 = arith.constant 0 : index
    %c0_0 = arith.constant 0 : index
    %1 = vector.load %arg12[%c0, %c0_0] : memref<128x128xbf16, #tpu.memory_space<vmem>>, vector<128x128xbf16>
    tpu.vector_store %arg12[%c0, %c0_0], %0 {strides = array<i32>} : memref<128x128xbf16, #tpu.memory_space<vmem>>, vector<128x128xbf16>,
    %c0_1 = arith.constant 0 : index
    %c0_2 = arith.constant 0 : index
    %c0_3 = arith.constant 0 : index
    %c0_4 = arith.constant 0 : index
    %2 = vector.load %arg0[%c0_1, %c0_2, %c0_3, %c0_4] : memref<2x9x9x4xf32, #tpu.memory_space<vmem>>, vector<2x8x8x4xf32>
    %3 = vector.shape_cast %2 : vector<2x8x8x4xf32> to vector<128x4xf32>
    %4 = arith.truncf %3 : vector<128x4xf32> to vector<128x4xbf16>
    %c0_5 = arith.constant 0 : index
    %c0_6 = arith.constant 0 : index
    %5 = vector.load %arg12[%c0_5, %c0_6] : memref<128x128xbf16, #tpu.memory_space<vmem>>, vector<128x4xbf16>
    tpu.vector_store %arg12[%c0_5, %c0_6], %4 {strides = array<i32>} : memref<128x128xbf16, #tpu.memory_space<vmem>>, vector<128x4xbf16>,
    %c0_7 = arith.constant 0 : index
    %c0_8 = arith.constant 0 : index
    %c0_9 = arith.constant 0 : index
    %c0_10 = arith.constant 0 : index
    %6 = vector.load %arg1[%c0_7, %c0_8, %c0_9, %c0_10] : memref<2x9x9x4xf32, #tpu.memory_space<vmem>>, vector<2x8x8x4xf32>
    %7 = vector.shape_cast %6 : vector<2x8x8x4xf32> to vector<128x4xf32>
    %8 = arith.truncf %7 : vector<128x4xf32> to vector<128x4xbf16>
    %c0_11 = arith.constant 0 : index
    %c4 = arith.constant 4 : index
    %9 = vector.load %arg12[%c0_11, %c4] : memref<128x128xbf16, #tpu.memory_space<vmem>>, vector<128x4xbf16>
    tpu.vector_store %arg12[%c0_11, %c4], %8 {strides = array<i32>} : memref<128x128xbf16, #tpu.memory_space<vmem>>, vector<128x4xbf16>,
    %c0_12 = arith.constant 0 : index
    %c0_13 = arith.constant 0 : index
    %c1 = arith.constant 1 : index
    %c0_14 = arith.constant 0 : index
    %10 = vector.load %arg0[%c0_12, %c0_13, %c1, %c0_14] : memref<2x9x9x4xf32, #tpu.memory_space<vmem>>, vector<2x8x8x4xf32>
    %11 = vector.shape_cast %10 : vector<2x8x8x4xf32> to vector<128x4xf32>
    %12 = arith.truncf %11 : vector<128x4xf32> to vector<128x4xbf16>
    %c0_15 = arith.constant 0 : index
    %c8 = arith.constant 8 : index
    %13 = vector.load %arg12[%c0_15, %c8] : memref<128x128xbf16, #tpu.memory_space<vmem>>, vector<128x4xbf16>
    tpu.vector_store %arg12[%c0_15, %c8], %12 {strides = array<i32>} : memref<128x128xbf16, #tpu.memory_space<vmem>>, vector<128x4xbf16>,
    %c0_16 = arith.constant 0 : index
    %c0_17 = arith.constant 0 : index
    %c0_18 = arith.constant 0 : index
    %c0_19 = arith.constant 0 : index
    %14 = vector.load %arg2[%c0_16, %c0_17, %c0_18, %c0_19] : memref<2x9x9x4xf32, #tpu.memory_space<vmem>>, vector<2x8x8x4xf32>
    %15 = vector.shape_cast %14 : vector<2x8x8x4xf32> to vector<128x4xf32>
    %16 = arith.truncf %15 : vector<128x4xf32> to vector<128x4xbf16>
    %c0_20 = arith.constant 0 : index
    %c12 = arith.constant 12 : index
    %17 = vector.load %arg12[%c0_20, %c12] : memref<128x128xbf16, #tpu.memory_space<vmem>>, vector<128x4xbf16>
    tpu.vector_store %arg12[%c0_20, %c12], %16 {strides = array<i32>} : memref<128x128xbf16, #tpu.memory_space<vmem>>, vector<128x4xbf16>,
    %c0_21 = arith.constant 0 : index
    %c0_22 = arith.constant 0 : index
    %c0_23 = arith.constant 0 : index
    %c0_24 = arith.constant 0 : index
    %18 = vector.load %arg3[%c0_21, %c0_22, %c0_23, %c0_24] : memref<2x9x9x4xf32, #tpu.memory_space<vmem>>, vector<2x8x8x4xf32>
    %19 = vector.shape_cast %18 : vector<2x8x8x4xf32> to vector<128x4xf32>
    %20 = arith.truncf %19 : vector<128x4xf32> to vector<128x4xbf16>
    %c0_25 = arith.constant 0 : index
    %c16 = arith.constant 16 : index
    %21 = vector.load %arg12[%c0_25, %c16] : memref<128x128xbf16, #tpu.memory_space<vmem>>, vector<128x4xbf16>
    tpu.vector_store %arg12[%c0_25, %c16], %20 {strides = array<i32>} : memref<128x128xbf16, #tpu.memory_space<vmem>>, vector<128x4xbf16>,
    %c0_26 = arith.constant 0 : index
    %c0_27 = arith.constant 0 : index
    %c1_28 = arith.constant 1 : index
    %c0_29 = arith.constant 0 : index
    %22 = vector.load %arg2[%c0_26, %c0_27, %c1_28, %c0_29] : memref<2x9x9x4xf32, #tpu.memory_space<vmem>>, vector<2x8x8x4xf32>
    %23 = vector.shape_cast %22 : vector<2x8x8x4xf32> to vector<128x4xf32>
    %24 = arith.truncf %23 : vector<128x4xf32> to vector<128x4xbf16>
    %c0_30 = arith.constant 0 : index
    %c20 = arith.constant 20 : index
    %25 = vector.load %arg12[%c0_30, %c20] : memref<128x128xbf16, #tpu.memory_space<vmem>>, vector<128x4xbf16>
    tpu.vector_store %arg12[%c0_30, %c20], %24 {strides = array<i32>} : memref<128x128xbf16, #tpu.memory_space<vmem>>, vector<128x4xbf16>,
    %c0_31 = arith.constant 0 : index
    %c1_32 = arith.constant 1 : index
    %c0_33 = arith.constant 0 : index
    %c0_34 = arith.constant 0 : index
    %26 = vector.load %arg0[%c0_31, %c1_32, %c0_33, %c0_34] : memref<2x9x9x4xf32, #tpu.memory_space<vmem>>, vector<2x8x8x4xf32>
    %27 = vector.shape_cast %26 : vector<2x8x8x4xf32> to vector<128x4xf32>
    %28 = arith.truncf %27 : vector<128x4xf32> to vector<128x4xbf16>
    %c0_35 = arith.constant 0 : index
    %c24 = arith.constant 24 : index
    %29 = vector.load %arg12[%c0_35, %c24] : memref<128x128xbf16, #tpu.memory_space<vmem>>, vector<128x4xbf16>
    tpu.vector_store %arg12[%c0_35, %c24], %28 {strides = array<i32>} : memref<128x128xbf16, #tpu.memory_space<vmem>>, vector<128x4xbf16>,
    %c0_36 = arith.constant 0 : index
    %c1_37 = arith.constant 1 : index
    %c0_38 = arith.constant 0 : index
    %c0_39 = arith.constant 0 : index
    %30 = vector.load %arg1[%c0_36, %c1_37, %c0_38, %c0_39] : memref<2x9x9x4xf32, #tpu.memory_space<vmem>>, vector<2x8x8x4xf32>
    %31 = vector.shape_cast %30 : vector<2x8x8x4xf32> to vector<128x4xf32>
    %32 = arith.truncf %31 : vector<128x4xf32> to vector<128x4xbf16>
    %c0_40 = arith.constant 0 : index
    %c28 = arith.constant 28 : index
    %33 = vector.load %arg12[%c0_40, %c28] : memref<128x128xbf16, #tpu.memory_space<vmem>>, vector<128x4xbf16>
    tpu.vector_store %arg12[%c0_40, %c28], %32 {strides = array<i32>} : memref<128x128xbf16, #tpu.memory_space<vmem>>, vector<128x4xbf16>,
    %c0_41 = arith.constant 0 : index
    %c1_42 = arith.constant 1 : index
    %c1_43 = arith.constant 1 : index
    %c0_44 = arith.constant 0 : index
    %34 = vector.load %arg0[%c0_41, %c1_42, %c1_43, %c0_44] : memref<2x9x9x4xf32, #tpu.memory_space<vmem>>, vector<2x8x8x4xf32>
    %35 = vector.shape_cast %34 : vector<2x8x8x4xf32> to vector<128x4xf32>
    %36 = arith.truncf %35 : vector<128x4xf32> to vector<128x4xbf16>
    %c0_45 = arith.constant 0 : index
    %c32 = arith.constant 32 : index
    %37 = vector.load %arg12[%c0_45, %c32] : memref<128x128xbf16, #tpu.memory_space<vmem>>, vector<128x4xbf16>
    tpu.vector_store %arg12[%c0_45, %c32], %36 {strides = array<i32>} : memref<128x128xbf16, #tpu.memory_space<vmem>>, vector<128x4xbf16>,
    %c0_46 = arith.constant 0 : index
    %c0_47 = arith.constant 0 : index
    %38 = vector.load %arg12[%c0_46, %c0_47] : memref<128x128xbf16, #tpu.memory_space<vmem>>, vector<128x128xbf16>
    %c0_48 = arith.constant 0 : index
    %c0_49 = arith.constant 0 : index
    %39 = vector.load %arg4[%c0_48, %c0_49] : memref<128x128xbf16, #tpu.memory_space<vmem>>, vector<128x128xbf16>
    %cst_50 = arith.constant dense<0.000000e+00> : vector<128x128xf32>
    %40 = tpu.matmul %38, %39, %cst_50 {dimension_numbers = #tpu.dot_dimension_numbers<[1], [0], [0], [1], [0, 0, 1, 1], [], []>} : vector<128x128xbf16>, vector<128x128xbf16>, vector<128x128xf32> -> vector<128x128xf32>
    %c0_51 = arith.constant 0 : index
    %c0_52 = arith.constant 0 : index
    %41 = vector.load %arg8[%c0_51, %c0_52] : memref<128x128xbf16, #tpu.memory_space<vmem>>, vector<128x128xbf16>
    %cst_53 = arith.constant dense<0.000000e+00> : vector<128x128xf32>
    %42 = tpu.matmul %38, %41, %cst_53 {dimension_numbers = #tpu.dot_dimension_numbers<[1], [0], [0], [1], [0, 0, 1, 1], [], []>} : vector<128x128xbf16>, vector<128x128xbf16>, vector<128x128xf32> -> vector<128x128xf32>
    %cst_54 = arith.constant dense<0.000000e+00> : vector<128xf32>
    %43 = vector.multi_reduction <add>, %42, %cst_54 [0] : vector<128x128xf32> to vector<128xf32>
    %44 = vector.shape_cast %43 : vector<128xf32> to vector<1x128xf32>
    %cst_55 = arith.constant 7.812500e-03 : f32
    %45 = vector.broadcast %cst_55 : f32 to vector<1x128xf32>
    %46 = arith.mulf %44, %45 : vector<1x128xf32>
    %47 = arith.mulf %42, %42 : vector<128x128xf32>
    %cst_56 = arith.constant dense<0.000000e+00> : vector<128xf32>
    %48 = vector.multi_reduction <add>, %47, %cst_56 [0] : vector<128x128xf32> to vector<128xf32>
    %49 = vector.shape_cast %48 : vector<128xf32> to vector<1x128xf32>
    %cst_57 = arith.constant 7.812500e-03 : f32
    %50 = vector.broadcast %cst_57 : f32 to vector<1x128xf32>
    %51 = arith.mulf %49, %50 : vector<1x128xf32>
    %52 = arith.mulf %46, %46 : vector<1x128xf32>
    %53 = arith.subf %51, %52 : vector<1x128xf32>
    %54 = vector.broadcast %46 : vector<1x128xf32> to vector<128x128xf32>
    %55 = arith.subf %42, %54 : vector<128x128xf32>
    %cst_58 = arith.constant 9.99999974E-6 : f32
    %56 = vector.broadcast %cst_58 : f32 to vector<1x128xf32>
    %57 = arith.addf %53, %56 : vector<1x128xf32>
    %58 = math.rsqrt %57 : vector<1x128xf32>
    %59 = vector.broadcast %58 : vector<1x128xf32> to vector<128x128xf32>
    %60 = arith.mulf %55, %59 : vector<128x128xf32>
    %c0_59 = arith.constant 0 : index
    %c0_60 = arith.constant 0 : index
    %61 = vector.load %arg9[%c0_59, %c0_60] : memref<2x128xf32, #tpu.memory_space<vmem>>, vector<1x128xf32>
    %62 = vector.broadcast %61 : vector<1x128xf32> to vector<128x128xf32>
    %63 = arith.mulf %60, %62 : vector<128x128xf32>
    %c1_61 = arith.constant 1 : index
    %c0_62 = arith.constant 0 : index
    %64 = vector.load %arg9[%c1_61, %c0_62] : memref<2x128xf32, #tpu.memory_space<vmem>>, vector<1x128xf32>
    %65 = vector.broadcast %64 : vector<1x128xf32> to vector<128x128xf32>
    %66 = arith.addf %63, %65 : vector<128x128xf32>
    %cst_63 = arith.constant dense<0.000000e+00> : vector<128xf32>
    %67 = vector.multi_reduction <add>, %40, %cst_63 [0] : vector<128x128xf32> to vector<128xf32>
    %68 = vector.shape_cast %67 : vector<128xf32> to vector<1x128xf32>
    %cst_64 = arith.constant 7.812500e-03 : f32
    %69 = vector.broadcast %cst_64 : f32 to vector<1x128xf32>
    %70 = arith.mulf %68, %69 : vector<1x128xf32>
    %71 = arith.mulf %40, %40 : vector<128x128xf32>
    %cst_65 = arith.constant dense<0.000000e+00> : vector<128xf32>
    %72 = vector.multi_reduction <add>, %71, %cst_65 [0] : vector<128x128xf32> to vector<128xf32>
    %73 = vector.shape_cast %72 : vector<128xf32> to vector<1x128xf32>
    %cst_66 = arith.constant 7.812500e-03 : f32
    %74 = vector.broadcast %cst_66 : f32 to vector<1x128xf32>
    %75 = arith.mulf %73, %74 : vector<1x128xf32>
    %76 = arith.mulf %70, %70 : vector<1x128xf32>
    %77 = arith.subf %75, %76 : vector<1x128xf32>
    %78 = vector.broadcast %70 : vector<1x128xf32> to vector<128x128xf32>
    %79 = arith.subf %40, %78 : vector<128x128xf32>
    %cst_67 = arith.constant 9.99999974E-6 : f32
    %80 = vector.broadcast %cst_67 : f32 to vector<1x128xf32>
    %81 = arith.addf %77, %80 : vector<1x128xf32>
    %82 = math.rsqrt %81 : vector<1x128xf32>
    %83 = vector.broadcast %82 : vector<1x128xf32> to vector<128x128xf32>
    %84 = arith.mulf %79, %83 : vector<128x128xf32>
    %c0_68 = arith.constant 0 : index
    %c0_69 = arith.constant 0 : index
    %85 = vector.load %arg5[%c0_68, %c0_69] : memref<2x128xf32, #tpu.memory_space<vmem>>, vector<1x128xf32>
    %86 = vector.broadcast %85 : vector<1x128xf32> to vector<128x128xf32>
    %87 = arith.mulf %84, %86 : vector<128x128xf32>
    %c1_70 = arith.constant 1 : index
    %c0_71 = arith.constant 0 : index
    %88 = vector.load %arg5[%c1_70, %c0_71] : memref<2x128xf32, #tpu.memory_space<vmem>>, vector<1x128xf32>
    %89 = vector.broadcast %88 : vector<1x128xf32> to vector<128x128xf32>
    %90 = arith.addf %87, %89 : vector<128x128xf32>
    %c0_72 = arith.constant 0 : index
    %91 = memref.load %arg10[%c0_72] : memref<3xf32, #tpu.memory_space<smem>>
    %cst_73 = arith.constant 0.000000e+00 : f32
    %92 = vector.broadcast %cst_73 : f32 to vector<128x128xf32>
    %93 = arith.cmpf oge, %90, %92 : vector<128x128xf32>
    %94 = vector.broadcast %91 : f32 to vector<128x128xf32>
    %95 = arith.mulf %94, %90 : vector<128x128xf32>
    %96 = arith.select %93, %90, %95 : vector<128x128xi1>, vector<128x128xf32>
    %97 = vector.extract_strided_slice %96 {offsets = [0, 0], sizes = [128, 8], strides = [1, 1]} : vector<128x128xf32> to vector<128x8xf32>
    %98 = vector.shape_cast %97 : vector<128x8xf32> to vector<2x8x8x8xf32>
    %cst_74 = arith.constant 0.000000e+00 : f32
    %99 = vector.broadcast %cst_74 : f32 to vector<2x1x8x8xf32>
    %100 = tpu.concatenate %99, %98, %99 in 1 : vector<2x1x8x8xf32>, vector<2x8x8x8xf32>, vector<2x1x8x8xf32> -> vector<2x10x8x8xf32>
    %cst_75 = arith.constant 0.000000e+00 : f32
    %101 = vector.broadcast %cst_75 : f32 to vector<2x10x1x8xf32>
    %102 = tpu.concatenate %101, %100, %101 in 2 : vector<2x10x1x8xf32>, vector<2x10x8x8xf32>, vector<2x10x1x8xf32> -> vector<2x10x10x8xf32>
    %103 = vector.extract_strided_slice %102 {offsets = [0, 0, 0, 0], sizes = [2, 8, 8, 8], strides = [1, 1, 1, 1]} : vector<2x10x10x8xf32> to vector<2x8x8x8xf32>
    %104 = vector.shape_cast %103 : vector<2x8x8x8xf32> to vector<128x8xf32>
    %105 = arith.truncf %104 : vector<128x8xf32> to vector<128x8xbf16>
    %c0_76 = arith.constant 0 : index
    %c0_77 = arith.constant 0 : index
    %106 = vector.load %arg12[%c0_76, %c0_77] : memref<128x128xbf16, #tpu.memory_space<vmem>>, vector<128x8xbf16>
    tpu.vector_store %arg12[%c0_76, %c0_77], %105 {strides = array<i32>} : memref<128x128xbf16, #tpu.memory_space<vmem>>, vector<128x8xbf16>,
    %107 = vector.extract_strided_slice %102 {offsets = [0, 0, 1, 0], sizes = [2, 8, 8, 8], strides = [1, 1, 1, 1]} : vector<2x10x10x8xf32> to vector<2x8x8x8xf32>
    %108 = vector.shape_cast %107 : vector<2x8x8x8xf32> to vector<128x8xf32>
    %109 = arith.truncf %108 : vector<128x8xf32> to vector<128x8xbf16>
    %c0_78 = arith.constant 0 : index
    %c8_79 = arith.constant 8 : index
    %110 = vector.load %arg12[%c0_78, %c8_79] : memref<128x128xbf16, #tpu.memory_space<vmem>>, vector<128x8xbf16>
    tpu.vector_store %arg12[%c0_78, %c8_79], %109 {strides = array<i32>} : memref<128x128xbf16, #tpu.memory_space<vmem>>, vector<128x8xbf16>,
    %111 = vector.extract_strided_slice %102 {offsets = [0, 0, 2, 0], sizes = [2, 8, 8, 8], strides = [1, 1, 1, 1]} : vector<2x10x10x8xf32> to vector<2x8x8x8xf32>
    %112 = vector.shape_cast %111 : vector<2x8x8x8xf32> to vector<128x8xf32>
    %113 = arith.truncf %112 : vector<128x8xf32> to vector<128x8xbf16>
    %c0_80 = arith.constant 0 : index
    %c16_81 = arith.constant 16 : index
    %114 = vector.load %arg12[%c0_80, %c16_81] : memref<128x128xbf16, #tpu.memory_space<vmem>>, vector<128x8xbf16>
    tpu.vector_store %arg12[%c0_80, %c16_81], %113 {strides = array<i32>} : memref<128x128xbf16, #tpu.memory_space<vmem>>, vector<128x8xbf16>,
    %115 = vector.extract_strided_slice %102 {offsets = [0, 1, 0, 0], sizes = [2, 8, 8, 8], strides = [1, 1, 1, 1]} : vector<2x10x10x8xf32> to vector<2x8x8x8xf32>
    %116 = vector.shape_cast %115 : vector<2x8x8x8xf32> to vector<128x8xf32>
    %117 = arith.truncf %116 : vector<128x8xf32> to vector<128x8xbf16>
    %c0_82 = arith.constant 0 : index
    %c24_83 = arith.constant 24 : index
    %118 = vector.load %arg12[%c0_82, %c24_83] : memref<128x128xbf16, #tpu.memory_space<vmem>>, vector<128x8xbf16>
    tpu.vector_store %arg12[%c0_82, %c24_83], %117 {strides = array<i32>} : memref<128x128xbf16, #tpu.memory_space<vmem>>, vector<128x8xbf16>,
    %119 = vector.extract_strided_slice %102 {offsets = [0, 1, 1, 0], sizes = [2, 8, 8, 8], strides = [1, 1, 1, 1]} : vector<2x10x10x8xf32> to vector<2x8x8x8xf32>
    %120 = vector.shape_cast %119 : vector<2x8x8x8xf32> to vector<128x8xf32>
    %121 = arith.truncf %120 : vector<128x8xf32> to vector<128x8xbf16>
    %c0_84 = arith.constant 0 : index
    %c32_85 = arith.constant 32 : index
    %122 = vector.load %arg12[%c0_84, %c32_85] : memref<128x128xbf16, #tpu.memory_space<vmem>>, vector<128x8xbf16>
    tpu.vector_store %arg12[%c0_84, %c32_85], %121 {strides = array<i32>} : memref<128x128xbf16, #tpu.memory_space<vmem>>, vector<128x8xbf16>,
    %123 = vector.extract_strided_slice %102 {offsets = [0, 1, 2, 0], sizes = [2, 8, 8, 8], strides = [1, 1, 1, 1]} : vector<2x10x10x8xf32> to vector<2x8x8x8xf32>
    %124 = vector.shape_cast %123 : vector<2x8x8x8xf32> to vector<128x8xf32>
    %125 = arith.truncf %124 : vector<128x8xf32> to vector<128x8xbf16>
    %c0_86 = arith.constant 0 : index
    %c40 = arith.constant 40 : index
    %126 = vector.load %arg12[%c0_86, %c40] : memref<128x128xbf16, #tpu.memory_space<vmem>>, vector<128x8xbf16>
    tpu.vector_store %arg12[%c0_86, %c40], %125 {strides = array<i32>} : memref<128x128xbf16, #tpu.memory_space<vmem>>, vector<128x8xbf16>,
    %127 = vector.extract_strided_slice %102 {offsets = [0, 2, 0, 0], sizes = [2, 8, 8, 8], strides = [1, 1, 1, 1]} : vector<2x10x10x8xf32> to vector<2x8x8x8xf32>
    %128 = vector.shape_cast %127 : vector<2x8x8x8xf32> to vector<128x8xf32>
    %129 = arith.truncf %128 : vector<128x8xf32> to vector<128x8xbf16>
    %c0_87 = arith.constant 0 : index
    %c48 = arith.constant 48 : index
    %130 = vector.load %arg12[%c0_87, %c48] : memref<128x128xbf16, #tpu.memory_space<vmem>>, vector<128x8xbf16>
    tpu.vector_store %arg12[%c0_87, %c48], %129 {strides = array<i32>} : memref<128x128xbf16, #tpu.memory_space<vmem>>, vector<128x8xbf16>,
    %131 = vector.extract_strided_slice %102 {offsets = [0, 2, 1, 0], sizes = [2, 8, 8, 8], strides = [1, 1, 1, 1]} : vector<2x10x10x8xf32> to vector<2x8x8x8xf32>
    %132 = vector.shape_cast %131 : vector<2x8x8x8xf32> to vector<128x8xf32>
    %133 = arith.truncf %132 : vector<128x8xf32> to vector<128x8xbf16>
    %c0_88 = arith.constant 0 : index
    %c56 = arith.constant 56 : index
    %134 = vector.load %arg12[%c0_88, %c56] : memref<128x128xbf16, #tpu.memory_space<vmem>>, vector<128x8xbf16>
    tpu.vector_store %arg12[%c0_88, %c56], %133 {strides = array<i32>} : memref<128x128xbf16, #tpu.memory_space<vmem>>, vector<128x8xbf16>,
    %135 = vector.extract_strided_slice %102 {offsets = [0, 2, 2, 0], sizes = [2, 8, 8, 8], strides = [1, 1, 1, 1]} : vector<2x10x10x8xf32> to vector<2x8x8x8xf32>
    %136 = vector.shape_cast %135 : vector<2x8x8x8xf32> to vector<128x8xf32>
    %137 = arith.truncf %136 : vector<128x8xf32> to vector<128x8xbf16>
    %c0_89 = arith.constant 0 : index
    %c64 = arith.constant 64 : index
    %138 = vector.load %arg12[%c0_89, %c64] : memref<128x128xbf16, #tpu.memory_space<vmem>>, vector<128x8xbf16>
    tpu.vector_store %arg12[%c0_89, %c64], %137 {strides = array<i32>} : memref<128x128xbf16, #tpu.memory_space<vmem>>, vector<128x8xbf16>,
    %c0_90 = arith.constant 0 : index
    %c0_91 = arith.constant 0 : index
    %139 = vector.load %arg12[%c0_90, %c0_91] : memref<128x128xbf16, #tpu.memory_space<vmem>>, vector<128x128xbf16>
    %c0_92 = arith.constant 0 : index
    %c0_93 = arith.constant 0 : index
    %140 = vector.load %arg6[%c0_92, %c0_93] : memref<128x128xbf16, #tpu.memory_space<vmem>>, vector<128x128xbf16>
    %cst_94 = arith.constant dense<0.000000e+00> : vector<128x128xf32>
    %141 = tpu.matmul %139, %140, %cst_94 {dimension_numbers = #tpu.dot_dimension_numbers<[1], [0], [0], [1], [0, 0, 1, 1], [], []>} : vector<128x128xbf16>, vector<128x128xbf16>, vector<128x128xf32> -> vector<128x128xf32>
    %cst_95 = arith.constant dense<0.000000e+00> : vector<128xf32>
    %142 = vector.multi_reduction <add>, %141, %cst_95 [0] : vector<128x128xf32> to vector<128xf32>
    %143 = vector.shape_cast %142 : vector<128xf32> to vector<1x128xf32>
    %cst_96 = arith.constant 7.812500e-03 : f32
    %144 = vector.broadcast %cst_96 : f32 to vector<1x128xf32>
    %145 = arith.mulf %143, %144 : vector<1x128xf32>
    %146 = arith.mulf %141, %141 : vector<128x128xf32>
    %cst_97 = arith.constant dense<0.000000e+00> : vector<128xf32>
    %147 = vector.multi_reduction <add>, %146, %cst_97 [0] : vector<128x128xf32> to vector<128xf32>
    %148 = vector.shape_cast %147 : vector<128xf32> to vector<1x128xf32>
    %cst_98 = arith.constant 7.812500e-03 : f32
    %149 = vector.broadcast %cst_98 : f32 to vector<1x128xf32>
    %150 = arith.mulf %148, %149 : vector<1x128xf32>
    %151 = arith.mulf %145, %145 : vector<1x128xf32>
    %152 = arith.subf %150, %151 : vector<1x128xf32>
    %153 = vector.broadcast %145 : vector<1x128xf32> to vector<128x128xf32>
    %154 = arith.subf %141, %153 : vector<128x128xf32>
    %cst_99 = arith.constant 9.99999974E-6 : f32
    %155 = vector.broadcast %cst_99 : f32 to vector<1x128xf32>
    %156 = arith.addf %152, %155 : vector<1x128xf32>
    %157 = math.rsqrt %156 : vector<1x128xf32>
    %158 = vector.broadcast %157 : vector<1x128xf32> to vector<128x128xf32>
    %159 = arith.mulf %154, %158 : vector<128x128xf32>
    %c0_100 = arith.constant 0 : index
    %c0_101 = arith.constant 0 : index
    %160 = vector.load %arg7[%c0_100, %c0_101] : memref<2x128xf32, #tpu.memory_space<vmem>>, vector<1x128xf32>
    %161 = vector.broadcast %160 : vector<1x128xf32> to vector<128x128xf32>
    %162 = arith.mulf %159, %161 : vector<128x128xf32>
    %c1_102 = arith.constant 1 : index
    %c0_103 = arith.constant 0 : index
    %163 = vector.load %arg7[%c1_102, %c0_103] : memref<2x128xf32, #tpu.memory_space<vmem>>, vector<1x128xf32>
    %164 = vector.broadcast %163 : vector<1x128xf32> to vector<128x128xf32>
    %165 = arith.addf %162, %164 : vector<128x128xf32>
    %c1_104 = arith.constant 1 : index
    %166 = memref.load %arg10[%c1_104] : memref<3xf32, #tpu.memory_space<smem>>
    %cst_105 = arith.constant 0.000000e+00 : f32
    %167 = vector.broadcast %cst_105 : f32 to vector<128x128xf32>
    %168 = arith.cmpf oge, %165, %167 : vector<128x128xf32>
    %169 = vector.broadcast %166 : f32 to vector<128x128xf32>
    %170 = arith.mulf %169, %165 : vector<128x128xf32>
    %171 = arith.select %168, %165, %170 : vector<128x128xi1>, vector<128x128xf32>
    %172 = arith.addf %171, %66 : vector<128x128xf32>
    %c2 = arith.constant 2 : index
    %173 = memref.load %arg10[%c2] : memref<3xf32, #tpu.memory_space<smem>>
    %cst_106 = arith.constant 0.000000e+00 : f32
    %174 = vector.broadcast %cst_106 : f32 to vector<128x128xf32>
    %175 = arith.cmpf oge, %172, %174 : vector<128x128xf32>
    %176 = vector.broadcast %173 : f32 to vector<128x128xf32>
    %177 = arith.mulf %176, %172 : vector<128x128xf32>
    %178 = arith.select %175, %172, %177 : vector<128x128xi1>, vector<128x128xf32>
    %c0_107 = arith.constant 0 : index
    %c0_108 = arith.constant 0 : index
    %179 = vector.load %arg11[%c0_107, %c0_108] : memref<128x128xf32, #tpu.memory_space<vmem>>, vector<128x128xf32>
    tpu.vector_store %arg11[%c0_107, %c0_108], %178 {strides = array<i32>} : memref<128x128xf32, #tpu.memory_space<vmem>>, vector<128x128xf32>,
    return
  }
}

</mosaic_0001>

<bundles_post_ra>
// kernel: conv_res_block.1
= control target key start
LH: loop header
LB: loop body
LE: loop exit
PB: predicated region body
PF: predicated region fallthrough
CT: control target
= control target key end

     0   :  { %16 = vsyncpa [#allocation4], 0  ;;  %s3299_s20 = smov [#allocation3]   ;;  %s5536_s0 = inlined_call_operand.vmem [shape: f32[2,9,9,4], index: 0, kind: input, shape index: {}]   ;;  %s5537_s1 = inlined_call_operand.vmem [shape: f32[2,9,9,4], index: 1, kind: input, shape index: {}]   ;;  %s5538_s2 = inlined_call_operand.vmem [shape: f32[2,9,9,4], index: 2, kind: input, shape index: {}]   ;;  %s5539_s3 = inlined_call_operand.vmem [shape: f32[2,9,9,4], index: 3, kind: input, shape index: {}]   ;;  %s5540_s4 = inlined_call_operand.vmem [shape: bf16[128,128], index: 4, kind: input, shape index: {}]   ;;  %s5541_s5 = inlined_call_operand.vmem [shape: f32[2,128], index: 5, kind: input, shape index: {}]   ;;  %s5542_s6 = inlined_call_operand.vmem [shape: bf16[128,128], index: 6, kind: input, shape index: {}]   ;;  %s5543_s7 = inlined_call_operand.vmem [shape: f32[2,128], index: 7, kind: input, shape index: {}]   ;;  %s5544_s8 = inlined_call_operand.vmem [shape: bf16[128,128], index: 8, kind: input, shape index: {}]   ;;  %s5545_s9 = inlined_call_operand.vmem [shape: f32[2,128], index: 9, kind: input, shape index: {}]   ;;  %s5546_s10 = inlined_call_operand.vmem [shape: f32[3], index: 10, kind: input, shape index: {}]   ;;  %s5547_s11 = inlined_call_operand.vmem [shape: f32[128,128], index: 11, kind: output, shape index: {}]  }
   0x1   :  { %s42_s19 = sshll.u32 %s5546_s10, 4  ;;  %s43_s19 = int_to_ptr.vmem [resolvable:$true] %s42_s19 }
   0x2   :  { %45 = dma.vmem_to_smem %s43_s19, 16, %s3299_s20, [#allocation4]  }
   0x3   :  { %3297 = dma.done.wait [#allocation4], 16  }
   0x4   :  { %3298 = vsyncadd [#allocation4], 4294967280 }
   0x5   :  { %50 = sfence }
   0x6   :  { %v119_v0 = vld [vmem:[%s5537_s1 + $0x20] sm:$0xff]  ;;  %s3300_s10 = smov 4   ;;  %v120_v6 = vld [vmem:[%s5537_s1 + $0x30] sm:$0xff]  ;;  %s3301_s19 = smov 8   ;;  %vm100_vm0 = vcmask 27648   ;;  %vm213_vm1 = vcmask 60448  }
   0x7   :  { %v117_v1 = vld [vmem:[%s5537_s1] sm:$0xff]  ;;  %v3383_v2 = vpack.c.bf16 %v119_v0, %v119_v0  ;;  %v118_v7 = vld [vmem:[%s5537_s1 + $0x10] sm:$0xff]  ;;  %v3404_v9 = vpack.c.bf16 %v120_v6, %v120_v6  ;;  %s3302_s25 = smov 12   ;;  %s3303_s14 = smov 16   ;;  %vm326_vm2 = vcmask 93248   ;;  %vm439_vm3 = vcmask 126048  }
   0x8   :  { %v133_v3 = vpack.c.bf16 %v117_v1, %v117_v1  ;;  %v121_v4 = vld [vmem:[%s5537_s1 + $0x40] sm:$0xff]  ;;  %v122_v8 = vld [vmem:[%s5537_s1 + $0x50] sm:$0xff]  ;;  %v3406_v10 = vpack.c.bf16 %v118_v7, %v118_v7  ;;  %s3305_s20 = smov 20   ;;  %s3306_s21 = smov 24   ;;  %vm552_vm4 = vcmask 158848   ;;  %vm665_vm5 = vcmask 191648  }
   0x9   :  { %169 = vrot.lane.b32.xlu1 %v3383_v2, %s3300_s10  ;;  %v3391_v5 = vpack.c.bf16 %v121_v4, %v121_v4  ;;  %v3408_v11 = vpack.c.bf16 %v122_v8, %v122_v8  ;;  %v124_v12 = vld [vmem:[%s5537_s1 + $0x70] sm:$0xff]  ;;  %v123_v13 = vld [vmem:[%s5537_s1 + $0x60] sm:$0xff]  ;;  %v3304_v8 = vmov 0   ;;  %s3307_s26 = smov 28   ;;  %s3308_s15 = smov 32   ;;  %vm779_vm6 = vcmask 224448  }
   0xa   :  { %165 = vrot.lane.b32.xlu0 %v133_v3, %s3300_s10  ;;  %v125_v14 = vld [vmem:[%s5537_s1 + $0x90] sm:$0xff]  ;;  %v3425_v15 = vpack.c.bf16 %v124_v12, %v124_v12  ;;  %v3427_v16 = vpack.c.bf16 %v123_v13, %v123_v13  ;;  %v126_v19 = vld [vmem:[%s5537_s1 + $0xa0] sm:$0xff]  ;;  %54 = vst [vmem:[#allocation2 + $0x8] sm:$0xf] %v3304_v8  ;;  %vm893_vm7 = vcmask 257248   ;;  %vm1006_vm8 = vcmask 290048  }
   0xb   :  { %173 = vrot.lane.b32.xlu2 %v3391_v5, %s3300_s10  ;;  %v141_v17 = vpack.c.bf16 %v125_v14, %v125_v14  ;;  %v127_v18 = vld [vmem:[%s5537_s1 + $0xb0] sm:$0xff]  ;;  %v128_v20 = vld [vmem:[%s5537_s1 + $0xc0] sm:$0xff]  ;;  %v142_v22 = vpack.c.bf16 %v126_v19, %v126_v19  ;;  %52 = vst [vmem:[#allocation2] sm:$0xf] %v3304_v8  ;;  %vm1696_vm9 = vcmask 1040384   ;;  %vm1746_vm10 = vcmask 60416  }
   0xc   :  { %v143_v21 = vpack.c.bf16 %v127_v18, %v127_v18  ;;  %v144_v23 = vpack.c.bf16 %v128_v20, %v128_v20  ;;  %v130_v24 = vld [vmem:[%s5537_s1 + $0xe0] sm:$0xff]  ;;  %v129_v25 = vld [vmem:[%s5537_s1 + $0xd0] sm:$0xff]  ;;  %53 = vst [vmem:[#allocation2 + $0x4] sm:$0xf] %v3304_v8  ;;  %vm1793_vm11 = vcmask 1046528   ;;  %vm1946_vm12 = vcmask 1045504  }
   0xd   :  { %v131_v26 = vld [vmem:[%s5537_s1 + $0xf0] sm:$0xff]  ;;  %v146_v27 = vpack.c.bf16 %v130_v24, %v130_v24  ;;  %v145_v28 = vpack.c.bf16 %v129_v25, %v129_v25  ;;  %v230_v30 = vld [vmem:[%s5536_s0 + $0x1] sm:$0xff]  ;;  %55 = vst [vmem:[#allocation2 + $0xc] sm:$0xf] %v3304_v8  ;;  %s3310_s13 = smov 48   ;;  %s3312_s16 = smov 64  }
   0xe   :  { %v3455_v29 = vpack.c.bf16 %v131_v26, %v131_v26  ;;  %v132_v31 = vld [vmem:[%s5537_s1 + $0x100] sm:$0xff]  ;;  %v231_v32 = vld [vmem:[%s5536_s0 + $0x11] sm:$0xff]  ;;  %v246_v33 = vpack.c.bf16 %v230_v30, %v230_v30  ;;  %56 = vst [vmem:[#allocation2 + $0x10] sm:$0xf] %v3304_v8  ;;  %s3313_s17 = smov 56  }
   0xf   :  { %v148_v34 = vpack.c.bf16 %v132_v31, %v132_v31  ;;  %v3470_v35 = vpack.c.bf16 %v231_v32, %v231_v32  ;;  %v233_v36 = vld [vmem:[%s5536_s0 + $0x31] sm:$0xff]  ;;  %v232_v37 = vld [vmem:[%s5536_s0 + $0x21] sm:$0xff]  ;;  %57 = vst [vmem:[#allocation2 + $0x14] sm:$0xf] %v3304_v8 }
  0x10   :  { %v234_v38 = vld [vmem:[%s5536_s0 + $0x41] sm:$0xff]  ;;  %v3485_v39 = vpack.c.bf16 %v233_v36, %v233_v36  ;;  %v3487_v40 = vpack.c.bf16 %v232_v37, %v232_v37  ;;  %v235_v43 = vld [vmem:[%s5536_s0 + $0x51] sm:$0xff]  ;;  %58 = vst [vmem:[#allocation2 + $0x18] sm:$0xf] %v3304_v8 }
  0x11   :  { %171 = vrot.lane.b32.xlu1 %v3404_v9, %s3300_s10  ;;  %v3489_v41 = vpack.c.bf16 %v234_v38, %v234_v38  ;;  %v236_v42 = vld [vmem:[%s5536_s0 + $0x61] sm:$0xff]  ;;  %v237_v44 = vld [vmem:[%s5536_s0 + $0x71] sm:$0xff]  ;;  %v3508_v46 = vpack.c.bf16 %v235_v43, %v235_v43  ;;  %59 = vst [vmem:[#allocation2 + $0x1c] sm:$0xf] %v3304_v8 }
  0x12   :  { %167 = vrot.lane.b32.xlu0 %v3406_v10, %s3300_s10  ;;  %v3506_v45 = vpack.c.bf16 %v236_v42, %v236_v42  ;;  %v3510_v47 = vpack.c.bf16 %v237_v44, %v237_v44  ;;  %v239_v48 = vld [vmem:[%s5536_s0 + $0xa1] sm:$0xff]  ;;  %v238_v49 = vld [vmem:[%s5536_s0 + $0x91] sm:$0xff]  ;;  %60 = vst [vmem:[#allocation2 + $0x20] sm:$0xf] %v3304_v8 }
  0x13   :  { %175 = vrot.lane.b32.xlu2 %v3408_v11, %s3300_s10  ;;  %v240_v50 = vld [vmem:[%s5536_s0 + $0xb1] sm:$0xff]  ;;  %v3527_v51 = vpack.c.bf16 %v239_v48, %v239_v48  ;;  %v254_v52 = vpack.c.bf16 %v238_v49, %v238_v49  ;;  %v343_v54 = vld [vmem:[%s5538_s2] sm:$0xff]  ;;  %61 = vst [vmem:[#allocation2 + $0x24] sm:$0xf] %v3304_v8 }
  0x14   :  { %v3529_v53 = vpack.c.bf16 %v240_v50, %v240_v50  ;;  %v241_v55 = vld [vmem:[%s5536_s0 + $0xc1] sm:$0xff]  ;;  %v344_v56 = vld [vmem:[%s5538_s2 + $0x10] sm:$0xff]  ;;  %v359_v57 = vpack.c.bf16 %v343_v54, %v343_v54  ;;  %62 = vst [vmem:[#allocation2 + $0x28] sm:$0xf] %v3304_v8 }
  0x15   :  { %v257_v58 = vpack.c.bf16 %v241_v55, %v241_v55  ;;  %v360_v59 = vpack.c.bf16 %v344_v56, %v344_v56  ;;  %v457_v60 = vld [vmem:[%s5539_s3 + $0x10] sm:$0xff]  ;;  %v456_v61 = vld [vmem:[%s5539_s3] sm:$0xff]  ;;  %63 = vst [vmem:[#allocation2 + $0x2c] sm:$0xf] %v3304_v8 }
  0x16   :  { %v569_v62 = vld [vmem:[%s5538_s2 + $0x1] sm:$0xff]  ;;  %v473_v63 = vpack.c.bf16 %v457_v60, %v457_v60  ;;  %v472_v0 = vpack.c.bf16 %v456_v61, %v456_v61  ;;  %v2982_v6 = vld [vmem:[%s5536_s0 + $0x10] sm:$0xff]  ;;  %64 = vst [vmem:[#allocation2 + $0x30] sm:$0xf] %v3304_v8 }
  0x17   :  { %v585_v1 = vpack.c.bf16 %v569_v62, %v569_v62  ;;  %v2983_v3 = vld [vmem:[%s5536_s0 + $0x20] sm:$0xff]  ;;  %v570_v7 = vld [vmem:[%s5538_s2 + $0x11] sm:$0xff]  ;;  %v699_v12 = vpack.c.bf16 %v2982_v6, %v2982_v6  ;;  %65 = vst [vmem:[#allocation2 + $0x34] sm:$0xf] %v3304_v8 }
  0x18   :  { %v700_v4 = vpack.c.bf16 %v2983_v3, %v2983_v3  ;;  %v586_v13 = vpack.c.bf16 %v570_v7, %v570_v7  ;;  %v68_v14 = vld [vmem:[%s5536_s0] sm:$0xff]  ;;  %66 = vst [vmem:[#allocation2 + $0x38] sm:$0xf] %v3304_v8  ;;  %v346_v25 = vld [vmem:[%s5538_s2 + $0x30] sm:$0xff] }
  0x19   :  { %179 = vrot.lane.b32.xlu1 %v3425_v15, %s3300_s10  ;;  %v72_v18 = vld [vmem:[%s5536_s0 + $0x40] sm:$0xff]  ;;  %v84_v19 = vpack.c.bf16 %v68_v14, %v68_v14  ;;  %67 = vst [vmem:[#allocation2 + $0x3c] sm:$0xf] %v3304_v8  ;;  %v76_v30 = vld [vmem:[%s5536_s0 + $0x90] sm:$0xff]  ;;  %v362_v32 = vpack.c.bf16 %v346_v25, %v346_v25 }
  0x1a   :  { %177 = vrot.lane.b32.xlu0 %v3427_v16, %s3300_s10  ;;  %103 = vst.msk [vmem:[#allocation2 + $0x8] sm:$0xf] %vm100_vm0, %v700_v4  ;;  %v3579_v20 = vpack.c.bf16 %v72_v18, %v72_v18  ;;  %v74_v26 = vld [vmem:[%s5536_s0 + $0x60] sm:$0xff]  ;;  %v459_v37 = vld [vmem:[%s5539_s3 + $0x30] sm:$0xff] }
  0x1b   :  { %181 = vrot.lane.b32.xlu2 %v141_v17, %s3300_s10  ;;  %101 = vst.msk [vmem:[#allocation2] sm:$0xf] %vm100_vm0, %v84_v19  ;;  %v77_v36 = vld [vmem:[%s5536_s0 + $0xa0] sm:$0xff]  ;;  %v475_v44 = vpack.c.bf16 %v459_v37, %v459_v37  ;;  %v80_v56 = vld [vmem:[%s5536_s0 + $0xd0] sm:$0xff] }
  0x1c   :  { %105 = vst.msk [vmem:[#allocation2 + $0x10] sm:$0xf] %vm100_vm0, %v3579_v20  ;;  %v458_v38 = vld [vmem:[%s5539_s3 + $0x20] sm:$0xff]  ;;  %v3645_v42 = vpack.c.bf16 %v77_v36, %v77_v36  ;;  %v3678_v61 = vpack.c.bf16 %v80_v56, %v80_v56  ;;  %v574_v25 = vld [vmem:[%s5538_s2 + $0x51] sm:$0xff] }
  0x1d   :  { %102 = vst.msk [vmem:[#allocation2 + $0x4] sm:$0xf] %vm100_vm0, %v699_v12  ;;  %v571_v43 = vld [vmem:[%s5538_s2 + $0x21] sm:$0xff]  ;;  %v474_v48 = vpack.c.bf16 %v458_v38, %v458_v38  ;;  %v3207_v38 = vld [vmem:[%s5540_s4 + $0x38] sm:$0xff] }
  0x1e   :  { %v79_v50 = vld [vmem:[%s5536_s0 + $0xc0] sm:$0xff]  ;;  %v587_v54 = vpack.c.bf16 %v571_v43, %v571_v43  ;;  %110 = vst.msk [vmem:[#allocation2 + $0x24] sm:$0xf] %vm100_vm0, %v3645_v42  ;;  %1151 = vmatpush.bf16.msra.mxu0 %v3207_v38  ;;  %3232 = vmatpush.bf16.msra.mxu3 %v3207_v38 }
  0x1f   :  { %v81_v55 = vld [vmem:[%s5536_s0 + $0xe0] sm:$0xff]  ;;  %113 = vst.msk [vmem:[#allocation2 + $0x30] sm:$0xf] %vm100_vm0, %v3678_v61 }
  0x20   :  { %v3675_v60 = vpack.c.bf16 %v81_v55, %v81_v55  ;;  %v83_v3 = vld [vmem:[%s5536_s0 + $0x100] sm:$0xff] }
  0x21   :  { %185 = vrot.lane.b32.xlu1 %v143_v21, %s3300_s10  ;;  %v2984_v21 = vld [vmem:[%s5536_s0 + $0x30] sm:$0xff]  ;;  %v3700_v7 = vpack.c.bf16 %v83_v3, %v83_v3  ;;  %v460_v19 = vld [vmem:[%s5539_s3 + $0x40] sm:$0xff] }
  0x22   :  { %183 = vrot.lane.b32.xlu0 %v142_v22, %s3300_s10  ;;  %v73_v22 = vld [vmem:[%s5536_s0 + $0x50] sm:$0xff]  ;;  %114 = vst.msk [vmem:[#allocation2 + $0x34] sm:$0xf] %vm100_vm0, %v3675_v60  ;;  %v575_v55 = vld [vmem:[%s5538_s2 + $0x61] sm:$0xff] }
  0x23   :  { %187 = vrot.lane.b32.xlu2 %v144_v23, %s3300_s10  ;;  %v345_v23 = vld [vmem:[%s5538_s2 + $0x20] sm:$0xff]  ;;  %v3602_v24 = vpack.c.bf16 %v73_v22, %v73_v22  ;;  %116 = vst.msk [vmem:[#allocation2 + $0x3c] sm:$0xf] %vm100_vm0, %v3700_v7 }
  0x24   :  { %v573_v22 = vld [vmem:[%s5538_s2 + $0x41] sm:$0xff] }
  0x25   :  { %106 = vst.msk [vmem:[#allocation2 + $0x14] sm:$0xf] %vm100_vm0, %v3602_v24  ;;  %v3822_v3 = vld [vmem:[%s5544_s8 + $0x20] sm:$0xff] }
  0x29   :  { %191 = vrot.lane.b32.xlu1 %v146_v27, %s3300_s10  ;;  %v361_v27 = vpack.c.bf16 %v345_v23, %v345_v23  ;;  %v476_v23 = vpack.c.bf16 %v460_v19, %v460_v19  ;;  %v3857_v19 = vld [vmem:[%s5544_s8 + $0x10] sm:$0xff] }
  0x2a   :  { %189 = vrot.lane.b32.xlu0 %v145_v28, %s3300_s10 }
  0x2b   :  { %193 = vrot.lane.b32.xlu2 %v3455_v29, %s3300_s10 }
  0x31   :  { %278 = vrot.lane.b32.xlu1 %v246_v33, %s3301_s19  ;;  %v3618_v33 = vpack.c.bf16 %v74_v26, %v74_v26 }
  0x32   :  { %195 = vrot.lane.b32.xlu0 %v148_v34, %s3300_s10  ;;  %v92_v34 = vpack.c.bf16 %v76_v30, %v76_v30 }
  0x33   :  { %280 = vrot.lane.b32.xlu2 %v3470_v35, %s3301_s19  ;;  %107 = vst.msk [vmem:[#allocation2 + $0x18] sm:$0xf] %vm100_vm0, %v3618_v33 }
  0x34   :  { %109 = vst.msk [vmem:[#allocation2 + $0x20] sm:$0xf] %vm100_vm0, %v92_v34 }
  0x39   :  { %284 = vrot.lane.b32.xlu1 %v3485_v39, %s3301_s19 }
  0x3a   :  { %282 = vrot.lane.b32.xlu0 %v3487_v40, %s3301_s19 }
  0x3b   :  { %286 = vrot.lane.b32.xlu2 %v3489_v41, %s3301_s19 }
  0x41   :  { %290 = vrot.lane.b32.xlu1 %v3506_v45, %s3301_s19 }
  0x42   :  { %288 = vrot.lane.b32.xlu0 %v3508_v46, %s3301_s19 }
  0x43   :  { %292 = vrot.lane.b32.xlu2 %v3510_v47, %s3301_s19 }
  0x49   :  { %296 = vrot.lane.b32.xlu1 %v3527_v51, %s3301_s19 }
  0x4a   :  { %294 = vrot.lane.b32.xlu0 %v254_v52, %s3301_s19  ;;  %v3657_v52 = vpack.c.bf16 %v79_v50, %v79_v50  ;;  %v462_v50 = vld [vmem:[%s5539_s3 + $0x60] sm:$0xff] }
  0x4b   :  { %298 = vrot.lane.b32.xlu2 %v3529_v53, %s3301_s19 }
  0x4c   :  { %112 = vst.msk [vmem:[#allocation2 + $0x2c] sm:$0xf] %vm100_vm0, %v3657_v52 }
  0x51   :  { %391 = vrot.lane.b32.xlu1 %v359_v57, %s3302_s25  ;;  %v572_v57 = vld [vmem:[%s5538_s2 + $0x31] sm:$0xff] }
  0x52   :  { %300 = vrot.lane.b32.xlu0 %v257_v58, %s3301_s19  ;;  %v588_v62 = vpack.c.bf16 %v572_v57, %v572_v57  ;;  %v478_v57 = vpack.c.bf16 %v462_v50, %v462_v50  ;;  %v356_v50 = vld [vmem:[%s5538_s2 + $0xe0] sm:$0xff] }
  0x53   :  { %393 = vrot.lane.b32.xlu2 %v360_v59, %s3302_s25 }
  0x59   :  { %506 = vrot.lane.b32.xlu1 %v473_v63, %s3303_s14 }
  0x5a   :  { %504 = vrot.lane.b32.xlu0 %v472_v0, %s3303_s14  ;;  %v82_v0 = vld [vmem:[%s5536_s0 + $0xf0] sm:$0xff] }
  0x5b   :  { %617 = vrot.lane.b32.xlu2 %v585_v1, %s3305_s20  ;;  %v3685_v1 = vpack.c.bf16 %v82_v0, %v82_v0  ;;  %v3204_v0 = vld [vmem:[%s5540_s4 + $0x20] sm:$0xff] }
  0x5d   :  { %115 = vst.msk [vmem:[#allocation2 + $0x38] sm:$0xf] %vm100_vm0, %v3685_v1 }
  0x61   :  { %731 = vrot.lane.b32.xlu1 %v699_v12, %s3306_s21  ;;  %v347_v12 = vld [vmem:[%s5538_s2 + $0x40] sm:$0xff] }
  0x62   :  { %619 = vrot.lane.b32.xlu0 %v586_v13, %s3305_s20 }
  0x63   :  { %733 = vrot.lane.b32.xlu2 %v700_v4, %s3306_s21 }
  0x65   :  { %v174_v17 = vpop.permute.xlu2 %173 }
  0x66   :  { %218 = vst.msk [vmem:[#allocation2 + $0x10] sm:$0xf] %vm213_vm1, %v174_v17  ;;  %v348_v17 = vld [vmem:[%s5538_s2 + $0x50] sm:$0xff] }
  0x67   :  { %v364_v18 = vpack.c.bf16 %v348_v17, %v348_v17  ;;  %v3203_v17 = vld [vmem:[%s5540_s4 + $0x18] sm:$0xff] }
  0x69   :  { %847 = vrot.lane.b32.xlu1 %v3383_v2, %s3307_s26  ;;  %v75_v2 = vld [vmem:[%s5536_s0 + $0x70] sm:$0xff] }
  0x6a   :  { %845 = vrot.lane.b32.xlu0 %v3406_v10, %s3307_s26  ;;  %v701_v10 = vpack.c.bf16 %v2984_v21, %v2984_v21  ;;  %v3615_v31 = vpack.c.bf16 %v75_v2, %v75_v2 }
  0x6b   :  { %958 = vrot.lane.b32.xlu2 %v3470_v35, %s3308_s15  ;;  %v78_v35 = vld [vmem:[%s5536_s0 + $0xb0] sm:$0xff] }
  0x6c   :  { %104 = vst.msk [vmem:[#allocation2 + $0xc] sm:$0xf] %vm100_vm0, %v701_v10 }
  0x6d   :  { %v176_v28 = vpop.permute.xlu2 %175  ;;  %108 = vst.msk [vmem:[#allocation2 + $0x1c] sm:$0xf] %vm100_vm0, %v3615_v31 }
  0x6e   :  { %219 = vst.msk [vmem:[#allocation2 + $0x14] sm:$0xf] %vm213_vm1, %v176_v28  ;;  %v590_v28 = vpack.c.bf16 %v574_v25, %v574_v25  ;;  %v351_v25 = vld [vmem:[%s5538_s2 + $0x90] sm:$0xff] }
  0x71   :  { %395 = vrot.lane.b32.xlu1 %v361_v27, %s3302_s25 }
  0x72   :  { %960 = vrot.lane.b32.xlu0 %v3487_v40, %s3308_s15  ;;  %v3640_v40 = vpack.c.bf16 %v78_v35, %v78_v35 }
  0x73   :  { %397 = vrot.lane.b32.xlu2 %v362_v32, %s3302_s25 }
  0x74   :  { %111 = vst.msk [vmem:[#allocation2 + $0x28] sm:$0xf] %vm100_vm0, %v3640_v40 }
  0x75   :  { %v182_v49 = vpop.permute.xlu2 %181 }
  0x76   :  { %222 = vst.msk [vmem:[#allocation2 + $0x20] sm:$0xf] %vm213_vm1, %v182_v49  ;;  %v463_v49 = vld [vmem:[%s5539_s3 + $0x70] sm:$0xff] }
  0x77   :  { %v479_v56 = vpack.c.bf16 %v463_v49, %v463_v49 }
  0x79   :  { %510 = vrot.lane.b32.xlu1 %v475_v44, %s3303_s14  ;;  %v3206_v44 = vld [vmem:[%s5540_s4 + $0x30] sm:$0xff] }
  0x7a   :  { %508 = vrot.lane.b32.xlu0 %v474_v48, %s3303_s14  ;;  %v3788_v48 = vld [vmem:[%s5544_s8 + $0x30] sm:$0xff]  ;;  %1152 = vmatpush.bf16.msra.mxu0 %v3206_v44 }
  0x7b   :  { %v170_v58 = vpop.permute.xlu1 %169  ;;  %621 = vrot.lane.b32.xlu2 %v587_v54, %s3305_s20  ;;  %3233 = vmatpush.bf16.msra.mxu3 %v3206_v44  ;;  %v465_v44 = vld [vmem:[%s5539_s3 + $0xa0] sm:$0xff] }
  0x7c   :  { %v166_v59 = vpop.permute.xlu0 %165  ;;  %216 = vst.msk [vmem:[#allocation2 + $0x8] sm:$0xf] %vm213_vm1, %v170_v58 }
  0x7d   :  { %214 = vst.msk [vmem:[#allocation2] sm:$0xf] %vm213_vm1, %v166_v59  ;;  %v188_v63 = vpop.permute.xlu2 %187  ;;  %v3205_v59 = vld [vmem:[%s5540_s4 + $0x28] sm:$0xff] }
  0x7e   :  { %225 = vst.msk [vmem:[#allocation2 + $0x2c] sm:$0xf] %vm213_vm1, %v188_v63  ;;  %v591_v63 = vpack.c.bf16 %v575_v55, %v575_v55  ;;  %1153 = vmatpush.bf16.msra.mxu0 %v3205_v59 }
  0x7f   :  { %3234 = vmatpush.bf16.msra.mxu3 %v3205_v59 }
  0x81   :  { %735 = vrot.lane.b32.xlu1 %v701_v10, %s3306_s21  ;;  %v589_v10 = vpack.c.bf16 %v573_v22, %v573_v22 }
  0x82   :  { %623 = vrot.lane.b32.xlu0 %v588_v62, %s3305_s20  ;;  %v3811_v62 = vld [vmem:[%s5544_s8 + $0x28] sm:$0xff]  ;;  %1154 = vmatpush.bf16.msra.mxu0 %v3204_v0 }
  0x83   :  { %v172_v4 = vpop.permute.xlu1 %171  ;;  %737 = vrot.lane.b32.xlu2 %v3579_v20, %s3306_s21  ;;  %3235 = vmatpush.bf16.msra.mxu3 %v3204_v0  ;;  %v577_v0 = vld [vmem:[%s5538_s2 + $0x91] sm:$0xff] }
  0x84   :  { %v168_v6 = vpop.permute.xlu0 %167  ;;  %217 = vst.msk [vmem:[#allocation2 + $0xc] sm:$0xf] %vm213_vm1, %v172_v4  ;;  %v576_v4 = vld [vmem:[%s5538_s2 + $0x71] sm:$0xff] }
  0x85   :  { %215 = vst.msk [vmem:[#allocation2 + $0x4] sm:$0xf] %vm213_vm1, %v168_v6  ;;  %v194_v8 = vpop.permute.xlu2 %193 }
  0x86   :  { %228 = vst.msk [vmem:[#allocation2 + $0x38] sm:$0xf] %vm213_vm1, %v194_v8  ;;  %1155 = vmatpush.bf16.msra.mxu0 %v3203_v17 }
  0x87   :  { %3236 = vmatpush.bf16.msra.mxu3 %v3203_v17 }
  0x89   :  { %851 = vrot.lane.b32.xlu1 %v3391_v5, %s3307_s26  ;;  %v363_v5 = vpack.c.bf16 %v347_v12, %v347_v12  ;;  %v2989_v12 = vld [vmem:[%s5536_s0 + $0x80] sm:$0xff] }
  0x8a   :  { %849 = vrot.lane.b32.xlu0 %v3404_v9, %s3307_s26 }
  0x8b   :  { %v180_v13 = vpop.permute.xlu1 %179  ;;  %962 = vrot.lane.b32.xlu2 %v3485_v39, %s3308_s15  ;;  %v461_v39 = vld [vmem:[%s5539_s3 + $0x50] sm:$0xff] }
  0x8c   :  { %v178_v14 = vpop.permute.xlu0 %177  ;;  %221 = vst.msk [vmem:[#allocation2 + $0x1c] sm:$0xf] %vm213_vm1, %v180_v13  ;;  %v592_v13 = vpack.c.bf16 %v576_v4, %v576_v4 }
  0x8d   :  { %220 = vst.msk [vmem:[#allocation2 + $0x18] sm:$0xf] %vm213_vm1, %v178_v14  ;;  %v281_v9 = vpop.permute.xlu2 %280 }
  0x8e   :  { %328 = vst.msk [vmem:[#allocation2 + $0x4] sm:$0xf] %vm326_vm2, %v281_v9  ;;  %v706_v9 = vpack.c.bf16 %v2989_v12, %v2989_v12 }
  0x91   :  { %399 = vrot.lane.b32.xlu1 %v363_v5, %s3302_s25  ;;  %v3842_v5 = vld [vmem:[%s5544_s8 + $0x18] sm:$0xff] }
  0x92   :  { %964 = vrot.lane.b32.xlu0 %v3489_v41, %s3308_s15  ;;  %v477_v41 = vpack.c.bf16 %v461_v39, %v461_v39  ;;  %v3202_v39 = vld [vmem:[%s5540_s4 + $0x10] sm:$0xff] }
  0x93   :  { %v186_v20 = vpop.permute.xlu1 %185  ;;  %401 = vrot.lane.b32.xlu2 %v364_v18, %s3302_s25  ;;  %v3005_v18 = vld [vmem:[%s5537_s1 + $0x80] sm:$0xff]  ;;  %1156 = vmatpush.bf16.msra.mxu0 %v3202_v39 }
  0x94   :  { %v184_v21 = vpop.permute.xlu0 %183  ;;  %224 = vst.msk [vmem:[#allocation2 + $0x28] sm:$0xf] %vm213_vm1, %v186_v20  ;;  %3237 = vmatpush.bf16.msra.mxu3 %v3202_v39 }
  0x95   :  { %223 = vst.msk [vmem:[#allocation2 + $0x24] sm:$0xf] %vm213_vm1, %v184_v21  ;;  %v287_v2 = vpop.permute.xlu2 %286 }
  0x96   :  { %331 = vst.msk [vmem:[#allocation2 + $0x10] sm:$0xf] %vm326_vm2, %v287_v2  ;;  %v3200_v2 = vld [vmem:[%s5540_s4] sm:$0xff] }
  0x99   :  { %514 = vrot.lane.b32.xlu1 %v477_v41, %s3303_s14  ;;  %v3201_v41 = vld [vmem:[%s5540_s4 + $0x8] sm:$0xff] }
  0x9a   :  { %512 = vrot.lane.b32.xlu0 %v476_v23, %s3303_s14  ;;  %v3871_v23 = vld [vmem:[%s5544_s8 + $0x8] sm:$0xff]  ;;  %1157 = vmatpush.bf16.msra.mxu0 %v3201_v41 }
  0x9b   :  { %v192_v26 = vpop.permute.xlu1 %191  ;;  %625 = vrot.lane.b32.xlu2 %v589_v10, %s3305_s20  ;;  %v3883_v10 = vld [vmem:[%s5544_s8] sm:$0xff]  ;;  %3238 = vmatpush.bf16.msra.mxu3 %v3201_v41 }
  0x9c   :  { %v190_v27 = vpop.permute.xlu0 %189  ;;  %227 = vst.msk [vmem:[#allocation2 + $0x34] sm:$0xf] %vm213_vm1, %v192_v26  ;;  %v3021_v26 = vld [vmem:[%s5536_s0 + $0x81] sm:$0xff] }
  0x9d   :  { %226 = vst.msk [vmem:[#allocation2 + $0x30] sm:$0xf] %vm213_vm1, %v190_v27  ;;  %v293_v30 = vpop.permute.xlu2 %292 }
  0x9e   :  { %334 = vst.msk [vmem:[#allocation2 + $0x1c] sm:$0xf] %vm326_vm2, %v293_v30  ;;  %1158 = vmatpush.bf16.msra.mxu0 %v3200_v2  ;;  %v367_v30 = vpack.c.bf16 %v351_v25, %v351_v25 }
  0x9f   :  { %3239 = vmatpush.bf16.msra.mxu3 %v3200_v2 }
  0xa1   :  { %739 = vrot.lane.b32.xlu1 %v3602_v24, %s3306_s21  ;;  %v349_v24 = vld [vmem:[%s5538_s2 + $0x60] sm:$0xff] }
  0xa2   :  { %627 = vrot.lane.b32.xlu0 %v590_v28, %s3305_s20  ;;  %v352_v28 = vld [vmem:[%s5538_s2 + $0xa0] sm:$0xff] }
  0xa3   :  { %v279_v32 = vpop.permute.xlu1 %278  ;;  %741 = vrot.lane.b32.xlu2 %v3618_v33, %s3306_s21  ;;  %v350_v33 = vld [vmem:[%s5538_s2 + $0x70] sm:$0xff] }
  0xa4   :  { %v196_v34 = vpop.permute.xlu0 %195  ;;  %327 = vst.msk [vmem:[#allocation2] sm:$0xf] %vm326_vm2, %v279_v32  ;;  %v366_v43 = vpack.c.bf16 %v350_v33, %v350_v33  ;;  %v933_v32 = vpack.c.bf16 %v3021_v26, %v3021_v26  ;;  %v464_v33 = vld [vmem:[%s5539_s3 + $0x90] sm:$0xff] }
  0xa5   :  { %229 = vst.msk [vmem:[#allocation2 + $0x3c] sm:$0xf] %vm213_vm1, %v196_v34  ;;  %v299_v35 = vpop.permute.xlu2 %298 }
  0xa6   :  { %337 = vst.msk [vmem:[#allocation2 + $0x28] sm:$0xf] %vm326_vm2, %v299_v35  ;;  %v243_v35 = vld [vmem:[%s5536_s0 + $0xe1] sm:$0xff] }
  0xa9   :  { %855 = vrot.lane.b32.xlu1 %v3427_v16, %s3307_s26  ;;  %v365_v16 = vpack.c.bf16 %v349_v24, %v349_v24  ;;  %v242_v24 = vld [vmem:[%s5536_s0 + $0xd1] sm:$0xff] }
  0xaa   :  { %853 = vrot.lane.b32.xlu0 %v3408_v11, %s3307_s26 }
  0xab   :  { %v285_v36 = vpop.permute.xlu1 %284  ;;  %966 = vrot.lane.b32.xlu2 %v3508_v46, %s3308_s15  ;;  %v3776_v46 = vld [vmem:[%s5544_s8 + $0x38] sm:$0xff] }
  0xac   :  { %v283_v37 = vpop.permute.xlu0 %282  ;;  %330 = vst.msk [vmem:[#allocation2 + $0xc] sm:$0xf] %vm326_vm2, %v285_v36  ;;  %1264 = vmatpush.bf16.msra.mxu1 %v3776_v46  ;;  %3240 = vmatpush.bf16.msrb.mxu3 %v3776_v46  ;;  %v480_v46 = vpack.c.bf16 %v464_v33, %v464_v33 }
  0xad   :  { %329 = vst.msk [vmem:[#allocation2 + $0x8] sm:$0xf] %vm326_vm2, %v283_v37  ;;  %v394_v11 = vpop.permute.xlu2 %393 }
  0xae   :  { %441 = vst.msk [vmem:[#allocation2 + $0x4] sm:$0xf] %vm439_vm3, %v394_v11  ;;  %v3920_v11 = vpack.c.bf16 %v242_v24, %v242_v24 }
  0xb0   :  { %1265 = vmatpush.bf16.msra.mxu1 %v3788_v48  ;;  %3241 = vmatpush.bf16.msrb.mxu3 %v3788_v48 }
  0xb1   :  { %403 = vrot.lane.b32.xlu1 %v365_v16, %s3302_s25  ;;  %v3918_v16 = vpack.c.bf16 %v243_v35, %v243_v35 }
  0xb2   :  { %968 = vrot.lane.b32.xlu0 %v3506_v45, %s3308_s15 }
  0xb3   :  { %v291_v54 = vpop.permute.xlu1 %290  ;;  %405 = vrot.lane.b32.xlu2 %v366_v43, %s3302_s25  ;;  %v355_v43 = vld [vmem:[%s5538_s2 + $0xd0] sm:$0xff] }
  0xb4   :  { %v289_v45 = vpop.permute.xlu0 %288  ;;  %333 = vst.msk [vmem:[#allocation2 + $0x18] sm:$0xf] %vm326_vm2, %v291_v54  ;;  %1266 = vmatpush.bf16.msra.mxu1 %v3811_v62  ;;  %3242 = vmatpush.bf16.msrb.mxu3 %v3811_v62  ;;  %v3309_v54 = vmov 0.0   ;;  %v371_v55 = vpack.c.bf16 %v355_v43, %v355_v43 }
  0xb5   :  { %332 = vst.msk [vmem:[#allocation2 + $0x14] sm:$0xf] %vm326_vm2, %v289_v45  ;;  %v3803_v58 = vpop.permute.xlu2 %617  ;;  %v3942_v45 = vrot.slane %v3309_v54, 7 }
  0xb7   :  { %v3949_v59 = vsel %vm1696_vm9, 0.0, %v3942_v45 }
  0xb8   :  { %1267 = vmatpush.bf16.msra.mxu1 %v3822_v3  ;;  %3243 = vmatpush.bf16.msrb.mxu3 %v3822_v3  ;;  %v3955_v62 = vpack.c.bf16 %v3949_v59, %v3949_v59 }
  0xb9   :  { %518 = vrot.lane.b32.xlu1 %v479_v56, %s3303_s14  ;;  %v481_v56 = vpack.c.bf16 %v465_v44, %v465_v44 }
  0xba   :  { %516 = vrot.lane.b32.xlu0 %v478_v57, %s3303_s14 }
  0xbb   :  { %v297_v6 = vpop.permute.xlu1 %296  ;;  %629 = vrot.lane.b32.xlu2 %v591_v63, %s3305_s20  ;;  %v578_v63 = vld [vmem:[%s5538_s2 + $0xa1] sm:$0xff] }
  0xbc   :  { %v295_v8 = vpop.permute.xlu0 %294  ;;  %336 = vst.msk [vmem:[#allocation2 + $0x24] sm:$0xf] %vm326_vm2, %v297_v6  ;;  %1268 = vmatpush.bf16.msra.mxu1 %v3842_v5  ;;  %3244 = vmatpush.bf16.msrb.mxu3 %v3842_v5  ;;  %v468_v6 = vld [vmem:[%s5539_s3 + $0xd0] sm:$0xff]  ;;  %v594_v12 = vpack.c.bf16 %v578_v63, %v578_v63  ;;  %v469_v5 = vld [vmem:[%s5539_s3 + $0xe0] sm:$0xff] }
  0xbd   :  { %335 = vst.msk [vmem:[#allocation2 + $0x20] sm:$0xf] %vm326_vm2, %v295_v8  ;;  %v3834_v14 = vpop.permute.xlu2 %733  ;;  %v484_v17 = vpack.c.bf16 %v468_v6, %v468_v6 }
  0xc0   :  { %1269 = vmatpush.bf16.msra.mxu1 %v3857_v19  ;;  %3245 = vmatpush.bf16.msrb.mxu3 %v3857_v19 }
  0xc1   :  { %743 = vrot.lane.b32.xlu1 %v3615_v31, %s3306_s21  ;;  %v820_v31 = vpack.c.bf16 %v3005_v18, %v3005_v18 }
  0xc2   :  { %631 = vrot.lane.b32.xlu0 %v592_v13, %s3305_s20  ;;  %v593_v13 = vpack.c.bf16 %v577_v0, %v577_v0  ;;  %v358_v0 = vld [vmem:[%s5538_s2 + $0x100] sm:$0xff] }
  0xc3   :  { %v392_v20 = vpop.permute.xlu1 %391  ;;  %745 = vrot.lane.b32.xlu2 %v706_v9, %s3306_s21 }
  0xc4   :  { %v301_v21 = vpop.permute.xlu0 %300  ;;  %440 = vst.msk [vmem:[#allocation2] sm:$0xf] %vm439_vm3, %v392_v20  ;;  %1270 = vmatpush.bf16.msra.mxu1 %v3871_v23  ;;  %3246 = vmatpush.bf16.msrb.mxu3 %v3871_v23  ;;  %v485_v20 = vpack.c.bf16 %v469_v5, %v469_v5  ;;  %v470_v5 = vld [vmem:[%s5539_s3 + $0xf0] sm:$0xff] }
  0xc5   :  { %338 = vst.msk [vmem:[#allocation2 + $0x2c] sm:$0xf] %vm326_vm2, %v301_v21  ;;  %v3863_v22 = vpop.permute.xlu2 %958 }
  0xc8   :  { %1271 = vmatpush.bf16.msra.mxu1 %v3883_v10  ;;  %3247 = vmatpush.bf16.msrb.mxu3 %v3883_v10 }
  0xc9   :  { %859 = vrot.lane.b32.xlu1 %v820_v31, %s3307_s26  ;;  %v582_v31 = vld [vmem:[%s5538_s2 + $0xe1] sm:$0xff] }
  0xca   :  { %857 = vrot.lane.b32.xlu0 %v3425_v15, %s3307_s26  ;;  %v598_v2 = vpack.c.bf16 %v582_v31, %v582_v31 }
  0xcb   :  { %v507_v15 = vpop.permute.xlu1 %506  ;;  %970 = vrot.lane.b32.xlu2 %v3510_v47, %s3308_s15  ;;  %v368_v47 = vpack.c.bf16 %v352_v28, %v352_v28 }
  0xcc   :  { %v505_v27 = vpop.permute.xlu0 %504  ;;  %554 = vst.msk [vmem:[#allocation2 + $0x4] sm:$0xf] %vm552_vm4, %v507_v15 }
  0xcd   :  { %553 = vst.msk [vmem:[#allocation2] sm:$0xf] %vm552_vm4, %v505_v27  ;;  %v398_v34 = vpop.permute.xlu2 %397 }
  0xce   :  { %666 = vst.msk [vmem:[#allocation2] sm:$0xf] %vm665_vm5, %v3803_v58  ;;  %v372_v58 = vpack.c.bf16 %v356_v50, %v356_v50 }
  0xcf   :  { %443 = vst.msk [vmem:[#allocation2 + $0xc] sm:$0xf] %vm439_vm3, %v398_v34 }
  0xd1   :  { %407 = vrot.lane.b32.xlu1 %v367_v30, %s3302_s25 }
  0xd2   :  { %972 = vrot.lane.b32.xlu0 %v933_v32, %s3308_s15 }
  0xd3   :  { %v732_v36 = vpop.permute.xlu1 %731  ;;  %409 = vrot.lane.b32.xlu2 %v368_v47, %s3302_s25  ;;  %v3010_v47 = vld [vmem:[%s5537_s1 + $0xe0] sm:$0xff] }
  0xd4   :  { %v620_v37 = vpop.permute.xlu0 %619  ;;  %780 = vst.msk [vmem:[#allocation2] sm:$0xf] %vm779_vm6, %v732_v36  ;;  %v825_v24 = vpack.c.bf16 %v3010_v47, %v3010_v47 }
  0xd5   :  { %667 = vst.msk [vmem:[#allocation2 + $0x4] sm:$0xf] %vm665_vm5, %v620_v37  ;;  %v622_v38 = vpop.permute.xlu2 %621  ;;  %v3027_v37 = vld [vmem:[%s5536_s0 + $0xf1] sm:$0xff] }
  0xd6   :  { %781 = vst.msk [vmem:[#allocation2 + $0x4] sm:$0xf] %vm779_vm6, %v3834_v14 }
  0xd9   :  { %304 = vrot.lane.b32.xlu1 %v3918_v16, %s3301_s19 }
  0xda   :  { %302 = vrot.lane.b32.xlu0 %v3920_v11, %s3301_s19 }
  0xdb   :  { %v848_v48 = vpop.permute.xlu1 %847  ;;  %520 = vrot.lane.b32.xlu2 %v480_v46, %s3303_s14 }
  0xdc   :  { %v846_v49 = vpop.permute.xlu0 %845  ;;  %895 = vst.msk [vmem:[#allocation2 + $0x4] sm:$0xf] %vm893_vm7, %v848_v48 }
  0xdd   :  { %894 = vst.msk [vmem:[#allocation2] sm:$0xf] %vm893_vm7, %v846_v49  ;;  %v738_v57 = vpop.permute.xlu2 %737  ;;  %v245_v49 = vld [vmem:[%s5536_s0 + $0x101] sm:$0xff] }
  0xde   :  { %1007 = vst.msk [vmem:[#allocation2] sm:$0xf] %vm1006_vm8, %v3863_v22  ;;  %v581_v22 = vld [vmem:[%s5538_s2 + $0xd1] sm:$0xff] }
  0xdf   :  { %v597_v10 = vpack.c.bf16 %v581_v22, %v581_v22  ;;  %v471_v22 = vld [vmem:[%s5539_s3 + $0x100] sm:$0xff] }
  0xe1   :  { %415 = vrot.lane.b32.xlu1 %v371_v55, %s3302_s25 }
  0xe2   :  { %522 = vrot.lane.b32.xlu0 %v481_v56, %s3303_s14  ;;  %v4057_v56 = vpack.c.bf16 %v245_v49, %v245_v49 }
  0xe3   :  { %v396_v3 = vpop.permute.xlu1 %395  ;;  %417 = vrot.lane.b32.xlu2 %v372_v58, %s3302_s25  ;;  %v467_v58 = vld [vmem:[%s5539_s3 + $0xc0] sm:$0xff] }
  0xe4   :  { %v961_v4 = vpop.permute.xlu0 %960  ;;  %442 = vst.msk [vmem:[#allocation2 + $0x8] sm:$0xf] %vm439_vm3, %v396_v3  ;;  %v483_v63 = vpack.c.bf16 %v467_v58, %v467_v58  ;;  %v357_v3 = vld [vmem:[%s5538_s2 + $0xf0] sm:$0xff] }
  0xe5   :  { %v3032_v8 = vld [vmem:[#allocation2] sm:$0xf]  ;;  %1008 = vst.msk [vmem:[#allocation2 + $0x4] sm:$0xf] %vm1006_vm8, %v961_v4  ;;  %v963_v14 = vpop.permute.xlu2 %962 }
  0xe6   :  { %1747 = vst.msk [vmem:[#allocation2] sm:$0xf] %vm1746_vm10, %v3955_v62 }
  0xe9   :  { %635 = vrot.lane.b32.xlu1 %v594_v12, %s3305_s20  ;;  %v373_v12 = vpack.c.bf16 %v357_v3, %v357_v3 }
  0xea   :  { %633 = vrot.lane.b32.xlu0 %v593_v13, %s3305_s20 }
  0xeb   :  { %v511_v9 = vpop.permute.xlu1 %510  ;;  %528 = vrot.lane.b32.xlu2 %v484_v17, %s3303_s14 }
  0xec   :  { %v509_v18 = vpop.permute.xlu0 %508  ;;  %556 = vst.msk [vmem:[#allocation2 + $0xc] sm:$0xf] %vm552_vm4, %v511_v9  ;;  %v3192_v39 = vld [vmem:[#allocation2] sm:$0xf0] }
  0xed   :  { %555 = vst.msk [vmem:[#allocation2 + $0x8] sm:$0xf] %vm552_vm4, %v509_v18  ;;  %v3033_v19 = vor.u32 %v3192_v39, %v3032_v8  ;;  %v402_v21 = vpop.permute.xlu2 %401  ;;  %v374_v8 = vpack.c.bf16 %v358_v0, %v358_v0  ;;  %v580_v9 = vld [vmem:[%s5538_s2 + $0xc1] sm:$0xff] }
  0xee   :  { %668 = vst.msk [vmem:[#allocation2 + $0x8] sm:$0xf] %vm665_vm5, %v622_v38  ;;  %v353_v38 = vld [vmem:[%s5538_s2 + $0xb0] sm:$0xff] }
  0xef   :  { %1159 = vmatmul.bf16.vlgmr.msra.gmra.mxu0 %v3033_v19  ;;  %1272 = vmatmul.bf16.vlgmr.msra.gmra.mxu1 %v3033_v19  ;;  %445 = vst.msk [vmem:[#allocation2 + $0x14] sm:$0xf] %vm439_vm3, %v402_v21  ;;  %v369_v44 = vpack.c.bf16 %v353_v38, %v353_v38  ;;  %v596_v21 = vpack.c.bf16 %v580_v9, %v580_v9 }
  0xf1   :  { %747 = vrot.lane.b32.xlu1 %v3645_v42, %s3306_s21  ;;  %v3006_v42 = vld [vmem:[%s5537_s1 + $0xa0] sm:$0xff] }
  0xf2   :  { %530 = vrot.lane.b32.xlu0 %v485_v20, %s3303_s14  ;;  %v821_v26 = vpack.c.bf16 %v3006_v42, %v3006_v42  ;;  %v486_v20 = vpack.c.bf16 %v470_v5, %v470_v5 }
  0xf3   :  { %v736_v41 = vpop.permute.xlu1 %735  ;;  %749 = vrot.lane.b32.xlu2 %v3640_v40, %s3306_s21  ;;  %v3007_v40 = vld [vmem:[%s5537_s1 + $0xb0] sm:$0xff] }
  0xf4   :  { %v624_v23 = vpop.permute.xlu0 %623  ;;  %782 = vst.msk [vmem:[#allocation2 + $0x8] sm:$0xf] %vm779_vm6, %v736_v41  ;;  %v822_v28 = vpack.c.bf16 %v3007_v40, %v3007_v40  ;;  %v487_v41 = vpack.c.bf16 %v471_v22, %v471_v22  ;;  %v584_v40 = vld [vmem:[%s5538_s2 + $0x101] sm:$0xff] }
  0xf5   :  { %669 = vst.msk [vmem:[#allocation2 + $0xc] sm:$0xf] %vm665_vm5, %v624_v23  ;;  %v626_v25 = vpop.permute.xlu2 %625 }
  0xf6   :  { %783 = vst.msk [vmem:[#allocation2 + $0xc] sm:$0xf] %vm779_vm6, %v738_v57 }
  0xf9   :  { %643 = vrot.lane.b32.xlu1 %v598_v2, %s3305_s20 }
  0xfa   :  { %641 = vrot.lane.b32.xlu0 %v597_v10, %s3305_s20  ;;  %v583_v10 = vld [vmem:[%s5538_s2 + $0xf1] sm:$0xff] }
  0xfb   :  { %v852_v15 = vpop.permute.xlu1 %851  ;;  %861 = vrot.lane.b32.xlu2 %v821_v26, %s3307_s26  ;;  %v3008_v26 = vld [vmem:[%s5537_s1 + $0xc0] sm:$0xff] }
  0xfc   :  { %v850_v27 = vpop.permute.xlu0 %849  ;;  %897 = vst.msk [vmem:[#allocation2 + $0xc] sm:$0xf] %vm893_vm7, %v852_v15 }
  0xfd   :  { %896 = vst.msk [vmem:[#allocation2 + $0x8] sm:$0xf] %vm893_vm7, %v850_v27  ;;  %v742_v30 = vpop.permute.xlu2 %741 }
  0xfe   :  { %1009 = vst.msk [vmem:[#allocation2 + $0x8] sm:$0xf] %vm1006_vm8, %v963_v14  ;;  %v579_v14 = vld [vmem:[%s5538_s2 + $0xb1] sm:$0xff] }
  0xff   :  { %v595_v17 = vpack.c.bf16 %v579_v14, %v579_v14 }
 0x101   :  { %755 = vrot.lane.b32.xlu1 %v3675_v60, %s3306_s21 }
 0x102   :  { %863 = vrot.lane.b32.xlu0 %v822_v28, %s3307_s26  ;;  %v600_v28 = vpack.c.bf16 %v584_v40, %v584_v40 }
 0x103   :  { %v400_v32 = vpop.permute.xlu1 %399  ;;  %757 = vrot.lane.b32.xlu2 %v3685_v1, %s3306_s21 }
 0x104   :  { %v965_v34 = vpop.permute.xlu0 %964  ;;  %444 = vst.msk [vmem:[#allocation2 + $0x10] sm:$0xf] %vm439_vm3, %v400_v32 }
 0x105   :  { %1010 = vst.msk [vmem:[#allocation2 + $0xc] sm:$0xf] %vm1006_vm8, %v965_v34  ;;  %v967_v35 = vpop.permute.xlu2 %966  ;;  %v2997_v34 = vld [vmem:[%s5536_s0 + $0x110] sm:$0xff] }
 0x109   :  { %976 = vrot.lane.b32.xlu1 %v3529_v53, %s3308_s15  ;;  %v354_v53 = vld [vmem:[%s5538_s2 + $0xc0] sm:$0xff] }
 0x10a   :  { %974 = vrot.lane.b32.xlu0 %v3527_v51, %s3308_s15  ;;  %v939_v51 = vpack.c.bf16 %v3027_v37, %v3027_v37  ;;  %v3012_v37 = vld [vmem:[%s5537_s1 + $0x100] sm:$0xff] }
 0x10b   :  { %v515_v60 = vpop.permute.xlu1 %514  ;;  %869 = vrot.lane.b32.xlu2 %v825_v24, %s3307_s26  ;;  %v714_v24 = vpack.c.bf16 %v2997_v34, %v2997_v34  ;;  %v827_v38 = vpack.c.bf16 %v3012_v37, %v3012_v37 }
 0x10c   :  { %v513_v36 = vpop.permute.xlu0 %512  ;;  %558 = vst.msk [vmem:[#allocation2 + $0x14] sm:$0xf] %vm552_vm4, %v515_v60  ;;  %v3193_v1 = vld [vmem:[#allocation2 + $0x8] sm:$0xff] }
 0x10d   :  { %557 = vst.msk [vmem:[#allocation2 + $0x10] sm:$0xf] %vm552_vm4, %v513_v36  ;;  %v406_v33 = vpop.permute.xlu2 %405  ;;  %1164 = vmatmul.bf16.gmra.mxu0 %v3193_v1  ;;  %1277 = vmatmul.bf16.gmra.mxu1 %v3193_v1  ;;  %v3024_v36 = vld [vmem:[%s5536_s0 + $0xc1] sm:$0xff] }
 0x10e   :  { %670 = vst.msk [vmem:[#allocation2 + $0x10] sm:$0xf] %vm665_vm5, %v626_v25  ;;  %v599_v25 = vpack.c.bf16 %v583_v10, %v583_v10  ;;  %v936_v1 = vpack.c.bf16 %v3024_v36, %v3024_v36 }
 0x10f   :  { %447 = vst.msk [vmem:[#allocation2 + $0x1c] sm:$0xf] %vm439_vm3, %v406_v33 }
 0x111   :  { %982 = vrot.lane.b32.xlu1 %v3918_v16, %s3308_s15  ;;  %v370_v16 = vpack.c.bf16 %v354_v53, %v354_v53 }
 0x112   :  { %871 = vrot.lane.b32.xlu0 %v3455_v29, %s3307_s26  ;;  %v466_v29 = vld [vmem:[%s5539_s3 + $0xb0] sm:$0xff]  ;;  %s3311_s3 = smov 40  }
 0x113   :  { %v740_v46 = vpop.permute.xlu1 %739  ;;  %984 = vrot.lane.b32.xlu2 %v939_v51, %s3308_s15  ;;  %v482_v55 = vpack.c.bf16 %v466_v29, %v466_v29 }
 0x114   :  { %v628_v43 = vpop.permute.xlu0 %627  ;;  %784 = vst.msk [vmem:[#allocation2 + $0x10] sm:$0xf] %vm779_vm6, %v740_v46 }
 0x115   :  { %671 = vst.msk [vmem:[#allocation2 + $0x14] sm:$0xf] %vm665_vm5, %v628_v43  ;;  %v630_v48 = vpop.permute.xlu2 %629  ;;  %v3013_v43 = vld [vmem:[%s5537_s1 + $0x110] sm:$0xff] }
 0x116   :  { %785 = vst.msk [vmem:[#allocation2 + $0x14] sm:$0xf] %vm779_vm6, %v742_v30 }
 0x119   :  { %413 = vrot.lane.b32.xlu1 %v370_v16, %s3302_s25  ;;  %v3029_v16 = vld [vmem:[%s5536_s0 + $0x111] sm:$0xff] }
 0x11a   :  { %411 = vrot.lane.b32.xlu0 %v369_v44, %s3302_s25  ;;  %v941_v29 = vpack.c.bf16 %v3029_v16, %v3029_v16 }
 0x11b   :  { %v856_v50 = vpop.permute.xlu1 %855  ;;  %306 = vrot.lane.b32.xlu2 %v939_v51, %s3301_s19 }
 0x11c   :  { %v854_v54 = vpop.permute.xlu0 %853  ;;  %899 = vst.msk [vmem:[#allocation2 + $0x14] sm:$0xf] %vm893_vm7, %v856_v50 }
 0x11d   :  { %898 = vst.msk [vmem:[#allocation2 + $0x10] sm:$0xf] %vm893_vm7, %v854_v54  ;;  %v746_v57 = vpop.permute.xlu2 %745 }
 0x11e   :  { %1011 = vst.msk [vmem:[#allocation2 + $0x10] sm:$0xf] %vm1006_vm8, %v967_v35 }
 0x121   :  { %524 = vrot.lane.b32.xlu1 %v482_v55, %s3303_s14 }
 0x122   :  { %308 = vrot.lane.b32.xlu0 %v4057_v56, %s3301_s19 }
 0x123   :  { %v404_v4 = vpop.permute.xlu1 %403  ;;  %526 = vrot.lane.b32.xlu2 %v483_v63, %s3303_s14 }
 0x124   :  { %v969_v6 = vpop.permute.xlu0 %968  ;;  %446 = vst.msk [vmem:[#allocation2 + $0x18] sm:$0xf] %vm439_vm3, %v404_v4 }
 0x125   :  { %1012 = vst.msk [vmem:[#allocation2 + $0x14] sm:$0xf] %vm1006_vm8, %v969_v6  ;;  %v971_v13 = vpop.permute.xlu2 %970 }
 0x129   :  { %421 = vrot.lane.b32.xlu1 %v374_v8, %s3302_s25 }
 0x12a   :  { %419 = vrot.lane.b32.xlu0 %v373_v12, %s3302_s25 }
 0x12b   :  { %v519_v18 = vpop.permute.xlu1 %518  ;;  %637 = vrot.lane.b32.xlu2 %v595_v17, %s3305_s20 }
 0x12c   :  { %v517_v39 = vpop.permute.xlu0 %516  ;;  %560 = vst.msk [vmem:[#allocation2 + $0x1c] sm:$0xf] %vm552_vm4, %v519_v18  ;;  %v3194_v19 = vld [vmem:[#allocation2 + $0x10] sm:$0xff] }
 0x12d   :  { %559 = vst.msk [vmem:[#allocation2 + $0x18] sm:$0xf] %vm552_vm4, %v517_v39  ;;  %v410_v31 = vpop.permute.xlu2 %409  ;;  %1169 = vmatmul.bf16.gmra.mxu0 %v3194_v19  ;;  %1282 = vmatmul.bf16.gmra.mxu1 %v3194_v19 }
 0x12e   :  { %672 = vst.msk [vmem:[#allocation2 + $0x18] sm:$0xf] %vm665_vm5, %v630_v48 }
 0x12f   :  { %449 = vst.msk [vmem:[#allocation2 + $0x24] sm:$0xf] %vm439_vm3, %v410_v31 }
 0x131   :  { %532 = vrot.lane.b32.xlu1 %v486_v20, %s3303_s14 }
 0x132   :  { %639 = vrot.lane.b32.xlu0 %v596_v21, %s3305_s20 }
 0x133   :  { %v744_v23 = vpop.permute.xlu1 %743  ;;  %534 = vrot.lane.b32.xlu2 %v487_v41, %s3303_s14 }
 0x134   :  { %v632_v42 = vpop.permute.xlu0 %631  ;;  %786 = vst.msk [vmem:[#allocation2 + $0x18] sm:$0xf] %vm779_vm6, %v744_v23 }
 0x135   :  { %673 = vst.msk [vmem:[#allocation2 + $0x1c] sm:$0xf] %vm665_vm5, %v632_v42  ;;  %v521_v2 = vpop.permute.xlu2 %520 }
 0x136   :  { %787 = vst.msk [vmem:[#allocation2 + $0x1c] sm:$0xf] %vm779_vm6, %v746_v57 }
 0x139   :  { %753 = vrot.lane.b32.xlu1 %v3678_v61, %s3306_s21  ;;  %v823_v61 = vpack.c.bf16 %v3008_v26, %v3008_v26 }
 0x13a   :  { %751 = vrot.lane.b32.xlu0 %v3657_v52, %s3306_s21  ;;  %v3009_v52 = vld [vmem:[%s5537_s1 + $0xd0] sm:$0xff] }
 0x13b   :  { %v860_v15 = vpop.permute.xlu1 %859  ;;  %645 = vrot.lane.b32.xlu2 %v599_v25, %s3305_s20  ;;  %v824_v32 = vpack.c.bf16 %v3009_v52, %v3009_v52 }
 0x13c   :  { %v858_v27 = vpop.permute.xlu0 %857  ;;  %901 = vst.msk [vmem:[#allocation2 + $0x1c] sm:$0xf] %vm893_vm7, %v860_v15 }
 0x13d   :  { %900 = vst.msk [vmem:[#allocation2 + $0x18] sm:$0xf] %vm893_vm7, %v858_v27  ;;  %v418_v30 = vpop.permute.xlu2 %417 }
 0x13e   :  { %1013 = vst.msk [vmem:[#allocation2 + $0x18] sm:$0xf] %vm1006_vm8, %v971_v13 }
 0x141   :  { %865 = vrot.lane.b32.xlu1 %v823_v61, %s3307_s26 }
 0x142   :  { %647 = vrot.lane.b32.xlu0 %v600_v28, %s3305_s20 }
 0x143   :  { %v408_v47 = vpop.permute.xlu1 %407  ;;  %867 = vrot.lane.b32.xlu2 %v824_v32, %s3307_s26 }
 0x144   :  { %v973_v35 = vpop.permute.xlu0 %972  ;;  %448 = vst.msk [vmem:[#allocation2 + $0x20] sm:$0xf] %vm439_vm3, %v408_v47 }
 0x145   :  { %1014 = vst.msk [vmem:[#allocation2 + $0x1c] sm:$0xf] %vm1006_vm8, %v973_v35  ;;  %v529_v60 = vpop.permute.xlu2 %528 }
 0x146   :  { %561 = vst.msk [vmem:[#allocation2 + $0x20] sm:$0xf] %vm552_vm4, %v521_v2 }
 0x149   :  { %761 = vrot.lane.b32.xlu1 %v714_v24, %s3306_s21 }
 0x14a   :  { %759 = vrot.lane.b32.xlu0 %v3700_v7, %s3306_s21  ;;  %v828_v7 = vpack.c.bf16 %v3013_v43, %v3013_v43 }
 0x14b   :  { %v305_v33 = vpop.permute.xlu1 %304  ;;  %978 = vrot.lane.b32.xlu2 %v936_v1, %s3308_s15 }
 0x14c   :  { %v303_v51 = vpop.permute.xlu0 %302  ;;  %340 = vst.msk [vmem:[#allocation2 + $0x34] sm:$0xf] %vm326_vm2, %v305_v33  ;;  %v3195_v53 = vld [vmem:[#allocation2 + $0x18] sm:$0xff] }
 0x14d   :  { %339 = vst.msk [vmem:[#allocation2 + $0x30] sm:$0xf] %vm326_vm2, %v303_v51  ;;  %v750_v46 = vpop.permute.xlu2 %749  ;;  %1174 = vmatmul.bf16.gmra.mxu0 %v3195_v53  ;;  %1287 = vmatmul.bf16.gmra.mxu1 %v3195_v53 }
 0x14e   :  { %453 = vst.msk [vmem:[#allocation2 + $0x34] sm:$0xf] %vm439_vm3, %v418_v30 }
 0x151   :  { %873 = vrot.lane.b32.xlu1 %v827_v38, %s3307_s26 }
 0x152   :  { %980 = vrot.lane.b32.xlu0 %v3920_v11, %s3308_s15 }
 0x153   :  { %v416_v44 = vpop.permute.xlu1 %415  ;;  %875 = vrot.lane.b32.xlu2 %v828_v7, %s3307_s26  ;;  %s1595_s26 = sld [smem:[#allocation3]] }
 0x154   :  { %v523_v48 = vpop.permute.xlu0 %522  ;;  %452 = vst.msk [vmem:[#allocation2 + $0x30] sm:$0xf] %vm439_vm3, %v416_v44 }
 0x155   :  { %562 = vst.msk [vmem:[#allocation2 + $0x24] sm:$0xf] %vm552_vm4, %v523_v48  ;;  %v862_v49 = vpop.permute.xlu2 %861 }
 0x156   :  { %565 = vst.msk [vmem:[#allocation2 + $0x30] sm:$0xf] %vm552_vm4, %v529_v60 }
 0x159   :  { %988 = vrot.lane.b32.xlu1 %v941_v29, %s3308_s15 }
 0x15a   :  { %986 = vrot.lane.b32.xlu0 %v4057_v56, %s3308_s15 }
 0x15b   :  { %v636_v11 = vpop.permute.xlu1 %635 }
 0x15c   :  { %v634_v50 = vpop.permute.xlu0 %633  ;;  %675 = vst.msk [vmem:[#allocation2 + $0x24] sm:$0xf] %vm665_vm5, %v636_v11 }
 0x15d   :  { %674 = vst.msk [vmem:[#allocation2 + $0x20] sm:$0xf] %vm665_vm5, %v634_v50  ;;  %v758_v54 = vpop.permute.xlu2 %757 }
 0x15e   :  { %789 = vst.msk [vmem:[#allocation2 + $0x24] sm:$0xf] %vm779_vm6, %v750_v46 }
 0x163   :  { %v748_v55 = vpop.permute.xlu1 %747 }
 0x164   :  { %v531_v57 = vpop.permute.xlu0 %530  ;;  %788 = vst.msk [vmem:[#allocation2 + $0x20] sm:$0xf] %vm779_vm6, %v748_v55 }
 0x165   :  { %566 = vst.msk [vmem:[#allocation2 + $0x34] sm:$0xf] %vm552_vm4, %v531_v57  ;;  %v870_v58 = vpop.permute.xlu2 %869 }
 0x166   :  { %902 = vst.msk [vmem:[#allocation2 + $0x20] sm:$0xf] %vm893_vm7, %v862_v49 }
 0x16b   :  { %v644_v63 = vpop.permute.xlu1 %643 }
 0x16c   :  { %v642_v56 = vpop.permute.xlu0 %641  ;;  %679 = vst.msk [vmem:[#allocation2 + $0x34] sm:$0xf] %vm665_vm5, %v644_v63  ;;  %v4203_v1 = vpop.f32.mrf.mxu0 }
 0x16d   :  { %678 = vst.msk [vmem:[#allocation2 + $0x30] sm:$0xf] %vm665_vm5, %v642_v56  ;;  %v985_v0 = vpop.permute.xlu2 %984  ;;  %v1476_v44 = vmul.f32 %v4203_v1, %v4203_v1 }
 0x16e   :  { %793 = vst.msk [vmem:[#allocation2 + $0x34] sm:$0xf] %vm779_vm6, %v758_v54 }
 0x173   :  { %v756_v3 = vpop.permute.xlu1 %755 }
 0x174   :  { %v864_v4 = vpop.permute.xlu0 %863  ;;  %792 = vst.msk [vmem:[#allocation2 + $0x30] sm:$0xf] %vm779_vm6, %v756_v3  ;;  %v4205_v37 = vpop.f32.mrf.mxu0 }
 0x175   :  { %903 = vst.msk [vmem:[#allocation2 + $0x24] sm:$0xf] %vm893_vm7, %v864_v4  ;;  %v307_v6 = vpop.permute.xlu2 %306  ;;  %v1477_v16 = vmul.f32 %v4205_v37, %v4205_v37  ;;  %v1454_v48 = vadd.f32 %v4205_v37, %v4203_v1 }
 0x176   :  { %906 = vst.msk [vmem:[#allocation2 + $0x30] sm:$0xf] %vm893_vm7, %v870_v58 }
 0x177   :  { %341 = vst.msk [vmem:[#allocation2 + $0x38] sm:$0xf] %vm326_vm2, %v307_v6  ;;  %v1492_v49 = vadd.f32 %v1477_v16, %v1476_v44 }
 0x17b   :  { %v977_v8 = vpop.permute.xlu1 %976 }
 0x17c   :  { %v975_v12 = vpop.permute.xlu0 %974  ;;  %1016 = vst.msk [vmem:[#allocation2 + $0x24] sm:$0xf] %vm1006_vm8, %v977_v8 }
 0x17d   :  { %1015 = vst.msk [vmem:[#allocation2 + $0x20] sm:$0xf] %vm1006_vm8, %v975_v12  ;;  %v527_v13 = vpop.permute.xlu2 %526 }
 0x183   :  { %v983_v14 = vpop.permute.xlu1 %982  ;;  %v3196_v5 = vld [vmem:[#allocation2 + $0x20] sm:$0xf0] }
 0x184   :  { %v872_v17 = vpop.permute.xlu0 %871  ;;  %v3048_v9 = vld [vmem:[#allocation2 + $0x20] sm:$0xf]  ;;  %1019 = vst.msk [vmem:[#allocation2 + $0x30] sm:$0xf] %vm1006_vm8, %v983_v14 }
 0x185   :  { %1755 = vst.msk [vmem:[#allocation2 + $0x20] sm:$0xf] %vm1746_vm10, %v3955_v62  ;;  %v3049_v18 = vor.u32 %v3196_v5, %v3048_v9  ;;  %v638_v39 = vpop.permute.xlu2 %637 }
 0x186   :  { %907 = vst.msk [vmem:[#allocation2 + $0x34] sm:$0xf] %vm893_vm7, %v872_v17 }
 0x187   :  { %1020 = vst.msk [vmem:[#allocation2 + $0x34] sm:$0xf] %vm1006_vm8, %v985_v0  ;;  %1179 = vmatmul.bf16.gmra.mxu0 %v3049_v18  ;;  %1292 = vmatmul.bf16.gmra.mxu1 %v3049_v18 }
 0x18a   :  { %v4207_v33 = vpop.f32.mrf.mxu0 }
 0x18b   :  { %v414_v19 = vpop.permute.xlu1 %413  ;;  %v1478_v29 = vmul.f32 %v4207_v33, %v4207_v33  ;;  %v1455_v11 = vadd.f32 %v1454_v48, %v4207_v33 }
 0x18c   :  { %v412_v20 = vpop.permute.xlu0 %411  ;;  %451 = vst.msk [vmem:[#allocation2 + $0x2c] sm:$0xf] %vm439_vm3, %v414_v19 }
 0x18d   :  { %450 = vst.msk [vmem:[#allocation2 + $0x28] sm:$0xf] %vm439_vm3, %v412_v20  ;;  %v535_v31 = vpop.permute.xlu2 %534  ;;  %v1493_v55 = vadd.f32 %v1492_v49, %v1478_v29 }
 0x18e   :  { %v3198_v21 = vld [vmem:[#allocation2 + $0x30] sm:$0xff]  ;;  %564 = vst.msk [vmem:[#allocation2 + $0x2c] sm:$0xf] %vm552_vm4, %v527_v13 }
 0x18f   :  { %1189 = vmatmul.bf16.vlgmr.msra.gmra.mxu3 %v3198_v21 }
 0x192   :  { %v4209_v51 = vpop.f32.mrf.mxu0 }
 0x193   :  { %v525_v22 = vpop.permute.xlu1 %524  ;;  %v1479_v50 = vmul.f32 %v4209_v51, %v4209_v51  ;;  %v1456_v57 = vadd.f32 %v1455_v11, %v4209_v51 }
 0x194   :  { %v309_v41 = vpop.permute.xlu0 %308  ;;  %563 = vst.msk [vmem:[#allocation2 + $0x28] sm:$0xf] %vm552_vm4, %v525_v22 }
 0x195   :  { %342 = vst.msk [vmem:[#allocation2 + $0x3c] sm:$0xf] %vm326_vm2, %v309_v41  ;;  %v646_v2 = vpop.permute.xlu2 %645  ;;  %v1494_v63 = vadd.f32 %v1493_v55, %v1479_v50 }
 0x196   :  { %676 = vst.msk [vmem:[#allocation2 + $0x28] sm:$0xf] %vm665_vm5, %v638_v39 }
 0x19b   :  { %v422_v23 = vpop.permute.xlu1 %421 }
 0x19c   :  { %v420_v42 = vpop.permute.xlu0 %419  ;;  %455 = vst.msk [vmem:[#allocation2 + $0x3c] sm:$0xf] %vm439_vm3, %v422_v23 }
 0x19d   :  { %454 = vst.msk [vmem:[#allocation2 + $0x38] sm:$0xf] %vm439_vm3, %v420_v42  ;;  %v868_v26 = vpop.permute.xlu2 %867 }
 0x19e   :  { %568 = vst.msk [vmem:[#allocation2 + $0x3c] sm:$0xf] %vm552_vm4, %v535_v31 }
 0x1a3   :  { %v533_v10 = vpop.permute.xlu1 %532 }
 0x1a4   :  { %v640_v25 = vpop.permute.xlu0 %639  ;;  %567 = vst.msk [vmem:[#allocation2 + $0x38] sm:$0xf] %vm552_vm4, %v533_v10 }
 0x1a5   :  { %677 = vst.msk [vmem:[#allocation2 + $0x2c] sm:$0xf] %vm665_vm5, %v640_v25  ;;  %v979_v27 = vpop.permute.xlu2 %978 }
 0x1a6   :  { %680 = vst.msk [vmem:[#allocation2 + $0x38] sm:$0xf] %vm665_vm5, %v646_v2 }
 0x1aa   :  { %v4211_v53 = vpop.f32.mrf.mxu0 }
 0x1ab   :  { %v754_v40 = vpop.permute.xlu1 %753  ;;  %v1480_v58 = vmul.f32 %v4211_v53, %v4211_v53  ;;  %v1457_v56 = vadd.f32 %v1456_v57, %v4211_v53 }
 0x1ac   :  { %v752_v15 = vpop.permute.xlu0 %751  ;;  %791 = vst.msk [vmem:[#allocation2 + $0x2c] sm:$0xf] %vm779_vm6, %v754_v40 }
 0x1ad   :  { %790 = vst.msk [vmem:[#allocation2 + $0x28] sm:$0xf] %vm779_vm6, %v752_v15  ;;  %v876_v30 = vpop.permute.xlu2 %875  ;;  %v1495_v4 = vadd.f32 %v1494_v63, %v1480_v58 }
 0x1ae   :  { %905 = vst.msk [vmem:[#allocation2 + $0x2c] sm:$0xf] %vm893_vm7, %v868_v26 }
 0x1b2   :  { %v4213_v38 = vpop.f32.mrf.mxu0 }
 0x1b3   :  { %v866_v61 = vpop.permute.xlu1 %865  ;;  %v1481_v0 = vmul.f32 %v4213_v38, %v4213_v38  ;;  %v1458_v6 = vadd.f32 %v1457_v56, %v4213_v38 }
 0x1b4   :  { %v648_v28 = vpop.permute.xlu0 %647  ;;  %904 = vst.msk [vmem:[#allocation2 + $0x28] sm:$0xf] %vm893_vm7, %v866_v61 }
 0x1b5   :  { %681 = vst.msk [vmem:[#allocation2 + $0x3c] sm:$0xf] %vm665_vm5, %v648_v28  ;;  %v1496_v12 = vadd.f32 %v1495_v4, %v1481_v0 }
 0x1b6   :  { %1017 = vst.msk [vmem:[#allocation2 + $0x28] sm:$0xf] %vm1006_vm8, %v979_v27 }
 0x1bb   :  { %v762_v52 = vpop.permute.xlu1 %761 }
 0x1bc   :  { %v760_v32 = vpop.permute.xlu0 %759  ;;  %795 = vst.msk [vmem:[#allocation2 + $0x3c] sm:$0xf] %vm779_vm6, %v762_v52 }
 0x1bd   :  { %794 = vst.msk [vmem:[#allocation2 + $0x38] sm:$0xf] %vm779_vm6, %v760_v32 }
 0x1be   :  { %909 = vst.msk [vmem:[#allocation2 + $0x3c] sm:$0xf] %vm893_vm7, %v876_v30 }
 0x1c3   :  { %v874_v34 = vpop.permute.xlu1 %873 }
 0x1c4   :  { %v981_v47 = vpop.permute.xlu0 %980  ;;  %908 = vst.msk [vmem:[#allocation2 + $0x38] sm:$0xf] %vm893_vm7, %v874_v34 }
 0x1c5   :  { %1018 = vst.msk [vmem:[#allocation2 + $0x2c] sm:$0xf] %vm1006_vm8, %v981_v47 }
 0x1ca   :  { %v4215_v46 = vpop.f32.mrf.mxu0 }
 0x1cb   :  { %v989_v35 = vpop.permute.xlu1 %988  ;;  %v1482_v8 = vmul.f32 %v4215_v46, %v4215_v46  ;;  %v1459_v13 = vadd.f32 %v1458_v6, %v4215_v46 }
 0x1cc   :  { %v987_v24 = vpop.permute.xlu0 %986  ;;  %1022 = vst.msk [vmem:[#allocation2 + $0x3c] sm:$0xf] %vm1006_vm8, %v989_v35  ;;  %v3197_v60 = vld [vmem:[#allocation2 + $0x28] sm:$0xff] }
 0x1cd   :  { %1021 = vst.msk [vmem:[#allocation2 + $0x38] sm:$0xf] %vm1006_vm8, %v987_v24  ;;  %1184 = vmatmul.bf16.gmra.mxu0 %v3197_v60  ;;  %1297 = vmatmul.bf16.gmra.mxu1 %v3197_v60  ;;  %v1497_v5 = vadd.f32 %v1496_v12, %v1482_v8  ;;  %v1714_v12 = vsel %vm1696_vm9, %v3942_v45, 0.0 }
 0x1d2   :  { %v4217_v43 = vpop.f32.mrf.mxu0 }
 0x1d3   :  { %v1483_v14 = vmul.f32 %v4217_v43, %v4217_v43  ;;  %v1460_v9 = vadd.f32 %v1459_v13, %v4217_v43  ;;  %v1794_v13 = vrot.slane %v3949_v59, 1 }
 0x1d4   :  { %v3199_v36 = vld [vmem:[#allocation2 + $0x38] sm:$0xff] }
 0x1d5   :  { %1194 = vmatmul.bf16.gmra.mxu3 %v3199_v36  ;;  %v1498_v39 = vadd.f32 %v1497_v5, %v1483_v14  ;;  %v1947_v14 = vrot.slane %v3949_v59, 2 }
 0x1e5   :  { %1302 = vmatmul.bf16.vlgmr.msrb.gmra.mxu3 %v3198_v21 }
 0x1f5   :  { %1307 = vmatmul.bf16.gmra.mxu3 %v3199_v36 }
 0x204   :  { %v4219_v7 = vpop.f32.mrf.mxu0 }
 0x205   :  { %v1484_v18 = vmul.f32 %v4219_v7, %v4219_v7  ;;  %v1461_v19 = vadd.f32 %v1460_v9, %v4219_v7  ;;  %v1795_v9 = vrot.slane %v1714_v12, 1 }
 0x207   :  { %v1499_v21 = vadd.f32 %v1498_v39, %v1484_v18  ;;  %v1948_v18 = vrot.slane %v1714_v12, 2 }
 0x20c   :  { %v4232_v54 = vpop.f32.mrf.mxu0 }
 0x20d   :  { %v1485_v20 = vmul.f32 %v4232_v54, %v4232_v54  ;;  %v1462_v31 = vadd.f32 %v1461_v19, %v4232_v54  ;;  %v1796_v19 = vsel %vm1793_vm11, %v1794_v13, %v1795_v9 }
 0x20f   :  { %v1500_v23 = vadd.f32 %v1499_v21, %v1485_v20  ;;  %v4292_v20 = vpack.c.bf16 %v1796_v19, %v1796_v19  ;;  %v1949_v21 = vsel %vm1946_vm12, %v1947_v14, %v1948_v18 }
 0x211   :  { %1884 = vrot.lane.b32.xlu2 %v4292_v20, %s3301_s19 }
 0x212   :  { %v4240_v3 = vpop.f32.mrf.mxu3 }
 0x213   :  { %v1488_v15 = vmul.f32 %v4240_v3, %v4240_v3 }
 0x21a   :  { %v4259_v41 = vpop.f32.mrf.mxu3 }
 0x21b   :  { %v1489_v30 = vmul.f32 %v4259_v41, %v4259_v41 }
 0x24a   :  { %v4248_v17 = vpop.f32.mrf.mxu0 }
 0x24b   :  { %v1486_v22 = vmul.f32 %v4248_v17, %v4248_v17  ;;  %v1463_v42 = vadd.f32 %v1462_v31, %v4248_v17  ;;  %v4295_v31 = vpack.c.bf16 %v1949_v21, %v1949_v21 }
 0x24d   :  { %v1501_v10 = vadd.f32 %v1500_v23, %v1486_v22  ;;  %2037 = vrot.lane.b32.xlu1 %v4295_v31, %s3303_s14 }
 0x252   :  { %v4262_v2 = vpop.f32.mrf.mxu0 }
 0x253   :  { %v1464_v25 = vadd.f32 %v1463_v42, %v4262_v2  ;;  %v1487_v26 = vmul.f32 %v4262_v2, %v4262_v2 }
 0x255   :  { %v1502_v40 = vadd.f32 %v1501_v10, %v1487_v26  ;;  %v1465_v27 = vadd.f32 %v1464_v25, %v4240_v3  ;;  %v4304_v25 = vld [vmem:[%s5541_s5] ss:$0 sm:$0xff] }
 0x257   :  { %v1503_v28 = vadd.f32 %v1502_v40, %v1488_v15  ;;  %v1466_v52 = vadd.f32 %v1465_v27, %v4259_v41 }
 0x258   :  { %v4270_v61 = vpop.f32.mrf.mxu3 }
 0x259   :  { %v1490_v32 = vmul.f32 %v4270_v61, %v4270_v61  ;;  %v1504_v34 = vadd.f32 %v1503_v28, %v1489_v30  ;;  %v1467_v47 = vadd.f32 %v1466_v52, %v4270_v61  ;;  %v4318_v30 = vld [vmem:[%s5541_s5 + $0x1] ss:$0 sm:$0xff] }
 0x25b   :  { %v1505_v24 = vadd.f32 %v1504_v34, %v1490_v32 }
 0x260   :  { %v4278_v35 = vpop.f32.mrf.mxu3 }
 0x261   :  { %v1468_v60 = vadd.f32 %v1467_v47, %v4278_v35  ;;  %v1491_v36 = vmul.f32 %v4278_v35, %v4278_v35 }
 0x263   :  { %v1469_v16 = vrot.slane %v1468_v60, 4  ;;  %v1506_v44 = vadd.f32 %v1505_v24, %v1491_v36 }
 0x265   :  { %v1470_v48 = vadd.f32 %v1469_v16, %v1468_v60  ;;  %v1507_v29 = vrot.slane %v1506_v44, 4  ;;  %v4329_v60 = vstv %s1595_s26 }
 0x267   :  { %v1471_v49 = vrot.slane %v1470_v48, 2  ;;  %v1508_v11 = vadd.f32 %v1507_v29, %v1506_v44 }
 0x269   :  { %v1472_v50 = vadd.f32 %v1471_v49, %v1470_v48  ;;  %v1509_v55 = vrot.slane %v1508_v11, 2 }
 0x26b   :  { %v1473_v57 = vrot.slane %v1472_v50, 1  ;;  %v1510_v58 = vadd.f32 %v1509_v55, %v1508_v11 }
 0x26d   :  { %v1474_v63 = vadd.f32 %v1473_v57, %v1472_v50  ;;  %v1511_v56 = vrot.slane %v1510_v58, 1 }
 0x26f   :  { %v4283_v0 = vmul.f32 0.0078125, %v1474_v63  ;;  %v1512_v4 = vadd.f32 %v1511_v56, %v1510_v58 }
 0x271   :  { %v1513_v6 = vmul.f32 0.0078125, %v1512_v4  ;;  %v1514_v8 = vmul.f32 %v4283_v0, %v4283_v0  ;;  %v1518_v26 = vsub.f32 %v4207_v33, %v4283_v0  ;;  %v1517_v15 = vsub.f32 %v4205_v37, %v4283_v0 }
 0x272   :  { %v1516_v28 = vsub.f32 %v4203_v1, %v4283_v0  ;;  %v1521_v33 = vsub.f32 %v4213_v38, %v4283_v0  ;;  %v1525_v50 = vsub.f32 %v4232_v54, %v4283_v0 }
 0x273   :  { %v1515_v5 = vsub.f32 %v1513_v6, %v1514_v8 }
 0x275   :  { %v1532_v39 = vadd.f32 1e-05, %v1515_v5 }
 0x277   :  { %3277 = vrsqrt.f32 %v1532_v39  ;;  %vm1539_vm14 = vweird.f32 %v1532_v39 }
 0x27d   :  { %v3278_v45 = vpop.eup %3277 }
 0x27e   :  { %v1534_v59 = vmul.f32 %v3278_v45, %v1532_v39  ;;  %vm1540_vm13 = vweird.f32 %v3278_v45 }
 0x27f   :  { %vm1541_vm15 = vmor %vm1539_vm14, %vm1540_vm13 }
 0x280   :  { %v1535_v22 = vmul.f32 %v3278_v45, %v1534_v59 }
 0x282   :  { %v1536_v23 = vmul.f32 0.5, %v1535_v22 }
 0x284   :  { %v1537_v42 = vsub.f32 1.5, %v1536_v23 }
 0x286   :  { %v1538_v10 = vmul.f32 %v3278_v45, %v1537_v42 }
 0x288   :  { %v4308_v40 = vsel %vm1541_vm15, %v3278_v45, %v1538_v10 }
 0x289   :  { %v1545_v27 = vmul.f32 %v4308_v40, %v1518_v26  ;;  %v1544_v52 = vmul.f32 %v4308_v40, %v1517_v15  ;;  %v1543_v34 = vmul.f32 %v4308_v40, %v1516_v28  ;;  %v1548_v47 = vmul.f32 %v4308_v40, %v1521_v33 }
 0x28a   :  { %v1552_v56 = vmul.f32 %v4308_v40, %v1525_v50  ;;  %v1520_v28 = vsub.f32 %v4211_v53, %v4283_v0  ;;  %v1524_v50 = vsub.f32 %v4219_v7, %v4283_v0 }
 0x28b   :  { %v1563_v32 = vmul.f32 %v4304_v25, %v1545_v27  ;;  %v1562_v37 = vmul.f32 %v4304_v25, %v1544_v52  ;;  %v1561_v36 = vmul.f32 %v4304_v25, %v1543_v34  ;;  %v1566_v16 = vmul.f32 %v4304_v25, %v1548_v47 }
 0x28c   :  { %v1570_v39 = vmul.f32 %v4304_v25, %v1552_v56  ;;  %v1519_v52 = vsub.f32 %v4209_v51, %v4283_v0  ;;  %v1547_v53 = vmul.f32 %v4308_v40, %v1520_v28 }
 0x28d   :  { %v1581_v1 = vadd.f32 %v4318_v30, %v1563_v32  ;;  %v1580_v24 = vadd.f32 %v4318_v30, %v1562_v37  ;;  %v1579_v48 = vadd.f32 %v4318_v30, %v1561_v36  ;;  %v1584_v29 = vadd.f32 %v4318_v30, %v1566_v16 }
 0x28e   :  { %v1588_v42 = vadd.f32 %v4318_v30, %v1570_v39  ;;  %v1546_v51 = vmul.f32 %v4308_v40, %v1519_v52 }
 0x28f   :  { %v1615_v38 = vmul.f32 %v4329_v60, %v1581_v1  ;;  %v1614_v44 = vmul.f32 %v4329_v60, %v1580_v24  ;;  %vm1598_vm0 = vcmp.ge.f32.partialorder %v1581_v1, 0.0  ;;  %vm1597_vm1 = vcmp.ge.f32.partialorder %v1580_v24, 0.0 }
 0x290   :  { %vm1596_vm2 = vcmp.ge.f32.partialorder %v1579_v48, 0.0  ;;  %v1613_v58 = vmul.f32 %v4329_v60, %v1579_v48  ;;  %vm1601_vm3 = vcmp.ge.f32.partialorder %v1584_v29, 0.0  ;;  %v1618_v63 = vmul.f32 %v4329_v60, %v1584_v29 }
 0x291   :  { %v1631_v49 = vsel %vm1598_vm0, %v1581_v1, %v1615_v38  ;;  %v1630_v11 = vsel %vm1597_vm1, %v1580_v24, %v1614_v44  ;;  %v1622_v37 = vmul.f32 %v4329_v60, %v1588_v42  ;;  %vm1605_vm4 = vcmp.ge.f32.partialorder %v1588_v42, 0.0 }
 0x292   :  { %v1665_v55 = vrot.slane %v1631_v49, 7  ;;  %v1664_v57 = vrot.slane %v1630_v11, 7  ;;  %v1629_v8 = vsel %vm1596_vm2, %v1579_v48, %v1613_v58  ;;  %v1634_v18 = vsel %vm1601_vm3, %v1584_v29, %v1618_v63 }
 0x293   :  { %v1663_v5 = vrot.slane %v1629_v8, 7  ;;  %v1668_v21 = vrot.slane %v1634_v18, 7  ;;  %v1638_v16 = vsel %vm1605_vm4, %v1588_v42, %v1622_v37  ;;  %v1565_v44 = vmul.f32 %v4304_v25, %v1547_v53 }
 0x294   :  { %v4343_v4 = vsel %vm1696_vm9, 0.0, %v1665_v55  ;;  %v4346_v6 = vsel %vm1696_vm9, 0.0, %v1664_v57  ;;  %v4349_v12 = vsel %vm1696_vm9, %v1665_v55, 0.0  ;;  %v4378_v10 = vsel %vm1696_vm9, %v1664_v57, 0.0 }
 0x295   :  { %v1734_v54 = vpack.c.bf16 %v4343_v4, %v4343_v4  ;;  %v1733_v13 = vpack.c.bf16 %v4346_v6, %v4346_v6  ;;  %v1803_v14 = vrot.slane %v4343_v4, 1  ;;  %v1804_v9 = vrot.slane %v4349_v12, 1 }
 0x296   :  { %v4363_v19 = vsel %vm1696_vm9, 0.0, %v1663_v5  ;;  %v4371_v22 = vsel %vm1696_vm9, 0.0, %v1668_v21  ;;  %v4374_v23 = vsel %vm1696_vm9, %v1668_v21, 0.0  ;;  %v1800_v33 = vrot.slane %v4346_v6, 1 }
 0x297   :  { %2121 = vrot.lane.b32.xlu2 %v1734_v54, %s3306_s21  ;;  %1750 = vst.msk [vmem:[#allocation2 + $0xc] sm:$0xf] %vm1746_vm10, %v1734_v54  ;;  %2119 = vrot.lane.b32.xlu1 %v1733_v13, %s3306_s21  ;;  %v1732_v45 = vpack.c.bf16 %v4363_v19, %v4363_v19  ;;  %v1805_v59 = vsel %vm1793_vm11, %v1803_v14, %v1804_v9  ;;  %v1812_v15 = vrot.slane %v4371_v22, 1  ;;  %v1813_v27 = vrot.slane %v4374_v23, 1 }
 0x298   :  { %1749 = vst.msk [vmem:[#allocation2 + $0x8] sm:$0xf] %vm1746_vm10, %v1733_v13  ;;  %v4380_v26 = vpack.c.bf16 %v1805_v59, %v1805_v59  ;;  %v1801_v32 = vrot.slane %v4378_v10, 1  ;;  %v4394_v34 = vsel %vm1696_vm9, %v1663_v5, 0.0  ;;  %v1797_v47 = vrot.slane %v4363_v19, 1 }
 0x299   :  { %2117 = vrot.lane.b32.xlu0 %v1732_v45, %s3306_s21  ;;  %1748 = vst.msk [vmem:[#allocation2 + $0x4] sm:$0xf] %vm1746_vm10, %v1732_v45  ;;  %v1814_v1 = vsel %vm1793_vm11, %v1812_v15, %v1813_v27  ;;  %v1798_v24 = vrot.slane %v4394_v34, 1  ;;  %v1564_v48 = vmul.f32 %v4304_v25, %v1546_v51  ;;  %v1672_v11 = vrot.slane %v1638_v16, 7 }
 0x29a   :  { %v1802_v36 = vsel %vm1793_vm11, %v1800_v33, %v1801_v32  ;;  %v4404_v38 = vpack.c.bf16 %v1814_v1, %v1814_v1  ;;  %v1551_v55 = vmul.f32 %v4308_v40, %v1524_v50  ;;  %v1583_v58 = vadd.f32 %v4318_v30, %v1565_v44 }
 0x29b   :  { %v4408_v29 = vpack.c.bf16 %v1802_v36, %v1802_v36  ;;  %v1799_v49 = vsel %vm1793_vm11, %v1797_v47, %v1798_v24  ;;  %v1582_v63 = vadd.f32 %v4318_v30, %v1564_v48  ;;  %v4423_v56 = vsel %vm1696_vm9, 0.0, %v1672_v11 }
 0x29c   :  { %v4418_v57 = vpack.c.bf16 %v1799_v49, %v1799_v49  ;;  %v4426_v8 = vsel %vm1696_vm9, %v1672_v11, 0.0  ;;  %v1569_v7 = vmul.f32 %v4304_v25, %v1551_v55  ;;  %v1617_v5 = vmul.f32 %v4329_v60, %v1583_v58 }
 0x29d   :  { %v1822_v14 = vrot.slane %v4426_v8, 1  ;;  %v1616_v9 = vmul.f32 %v4329_v60, %v1582_v63  ;;  %vm1600_vm5 = vcmp.ge.f32.partialorder %v1583_v58, 0.0  ;;  %vm1599_vm6 = vcmp.ge.f32.partialorder %v1582_v63, 0.0 }
 0x29e   :  { %v1950_v39 = vrot.slane %v4363_v19, 2  ;;  %v1526_v21 = vsub.f32 %v4248_v17, %v4283_v0  ;;  %v1587_v42 = vadd.f32 %v4318_v30, %v1569_v7  ;;  %v1951_v52 = vrot.slane %v4394_v34, 2 }
 0x29f   :  { %1890 = vrot.lane.b32.xlu2 %v4380_v26, %s3301_s19  ;;  %2343 = vrot.lane.b32.xlu1 %v1734_v54, %s3310_s13  ;;  %v1522_v54 = vsub.f32 %v4215_v46, %v4283_v0  ;;  %v1633_v46 = vsel %vm1600_vm5, %v1583_v58, %v1617_v5  ;;  %v1632_v59 = vsel %vm1599_vm6, %v1582_v63, %v1616_v9  ;;  %vm1929_vm0 = vcmask 126016  }
 0x2a0   :  { %v1667_v27 = vrot.slane %v1633_v46, 7  ;;  %v1666_v28 = vrot.slane %v1632_v59, 7  ;;  %vm1604_vm7 = vcmp.ge.f32.partialorder %v1587_v42, 0.0  ;;  %v1621_v33 = vmul.f32 %v4329_v60, %v1587_v42 }
 0x2a1   :  { %2341 = vrot.lane.b32.xlu0 %v1733_v13, %s3310_s13  ;;  %v1821_v13 = vrot.slane %v4423_v56, 1  ;;  %v1549_v18 = vmul.f32 %v4308_v40, %v1522_v54  ;;  %v1553_v32 = vmul.f32 %v4308_v40, %v1526_v21  ;;  %v1952_v49 = vsel %vm1946_vm12, %v1950_v39, %v1951_v52 }
 0x2a2   :  { %v1702_v17 = vsel %vm1696_vm9, 0.0, %v1667_v27  ;;  %v1719_v37 = vsel %vm1696_vm9, %v1667_v27, 0.0  ;;  %v4454_v53 = vsel %vm1696_vm9, 0.0, %v1666_v28  ;;  %v4457_v51 = vsel %vm1696_vm9, %v1666_v28, 0.0 }
 0x2a3   :  { %v1823_v45 = vsel %vm1793_vm11, %v1821_v13, %v1822_v14  ;;  %v1567_v19 = vmul.f32 %v4304_v25, %v1549_v18  ;;  %v1809_v34 = vrot.slane %v1702_v17, 1  ;;  %v1810_v47 = vrot.slane %v1719_v37, 1 }
 0x2a4   :  { %v4443_v15 = vpack.c.bf16 %v1823_v45, %v1823_v45  ;;  %v1806_v1 = vrot.slane %v4454_v53, 1  ;;  %v1807_v24 = vrot.slane %v4457_v51, 1  ;;  %v1637_v36 = vsel %vm1604_vm7, %v1587_v42, %v1621_v33 }
 0x2a5   :  { %v1585_v16 = vadd.f32 %v4318_v30, %v1567_v19  ;;  %v1811_v44 = vsel %vm1793_vm11, %v1809_v34, %v1810_v47  ;;  %v1671_v48 = vrot.slane %v1637_v36, 7  ;;  %v1571_v11 = vmul.f32 %v4304_v25, %v1553_v32 }
 0x2a6   :  { %v4465_v50 = vpack.c.bf16 %v1811_v44, %v1811_v44  ;;  %v1808_v55 = vsel %vm1793_vm11, %v1806_v1, %v1807_v24  ;;  %v4482_v9 = vpack.c.bf16 %v1952_v49, %v1952_v49  ;;  %v4491_v45 = vpack.c.bf16 %v4454_v53, %v4454_v53 }
 0x2a7   :  { %1896 = vrot.lane.b32.xlu2 %v4404_v38, %s3301_s19  ;;  %1888 = vrot.lane.b32.xlu1 %v4408_v29, %s3301_s19  ;;  %vm1602_vm8 = vcmp.ge.f32.partialorder %v1585_v16, 0.0  ;;  %v1619_v58 = vmul.f32 %v4329_v60, %v1585_v16  ;;  %v4469_v63 = vpack.c.bf16 %v1808_v55, %v1808_v55  ;;  %v4472_v7 = vsel %vm1696_vm9, 0.0, %v1671_v48 }
 0x2a8   :  { %v4475_v54 = vsel %vm1696_vm9, %v1671_v48, 0.0  ;;  %v1589_v13 = vadd.f32 %v4318_v30, %v1571_v11  ;;  %v1818_v14 = vrot.slane %v4472_v7, 1  ;;  %v1963_v28 = vrot.slane %v1719_v37, 2  ;;  %1751 = vst.msk [vmem:[#allocation2 + $0x10] sm:$0xf] %vm1746_vm10, %v4491_v45 }
 0x2a9   :  { %1886 = vrot.lane.b32.xlu0 %v4418_v57, %s3301_s19  ;;  %v1819_v5 = vrot.slane %v4475_v54, 1  ;;  %v1635_v18 = vsel %vm1602_vm8, %v1585_v16, %v1619_v58  ;;  %v1953_v32 = vrot.slane %v4346_v6, 2  ;;  %v1966_v34 = vrot.slane %v4374_v23, 2 }
 0x2aa   :  { %v1669_v39 = vrot.slane %v1635_v18, 7  ;;  %vm1606_vm13 = vcmp.ge.f32.partialorder %v1589_v13, 0.0  ;;  %v1623_v21 = vmul.f32 %v4329_v60, %v1589_v13  ;;  %v1962_v47 = vrot.slane %v1702_v17, 2 }
 0x2ab   :  { %v1820_v46 = vsel %vm1793_vm11, %v1818_v14, %v1819_v5  ;;  %v4500_v1 = vpack.c.bf16 %v1702_v17, %v1702_v17  ;;  %v4518_v23 = vpack.c.bf16 %v4371_v22, %v4371_v22  ;;  %v4522_v17 = vpack.c.bf16 %v4423_v56, %v4423_v56 }
 0x2ac   :  { %v1704_v59 = vsel %vm1696_vm9, 0.0, %v1669_v39  ;;  %v1721_v42 = vsel %vm1696_vm9, %v1669_v39, 0.0  ;;  %v1639_v27 = vsel %vm1606_vm13, %v1589_v13, %v1623_v21  ;;  %v4502_v24 = vpack.c.bf16 %v1820_v46, %v1820_v46 }
 0x2ad   :  { %v1815_v52 = vrot.slane %v1704_v59, 1  ;;  %v1816_v33 = vrot.slane %v1721_v42, 1  ;;  %v1673_v19 = vrot.slane %v1639_v27, 7  ;;  %v1969_v48 = vrot.slane %v1721_v42, 2  ;;  %1752 = vst.msk [vmem:[#allocation2 + $0x14] sm:$0xf] %vm1746_vm10, %v4500_v1 }
 0x2ae   :  { %v4514_v6 = vsel %vm1946_vm12, %v1962_v47, %v1963_v28  ;;  %v4524_v55 = vpack.c.bf16 %v1704_v59, %v1704_v59  ;;  %v1954_v58 = vrot.slane %v4378_v10, 2  ;;  %v1975_v13 = vrot.slane %v4426_v8, 2  ;;  %1753 = vst.msk [vmem:[#allocation2 + $0x18] sm:$0xf] %vm1746_vm10, %v4518_v23 }
 0x2af   :  { %1902 = vrot.lane.b32.xlu2 %v4443_v15, %s3301_s19  ;;  %1894 = vrot.lane.b32.xlu1 %v4465_v50, %s3301_s19  ;;  %v1817_v36 = vsel %vm1793_vm11, %v1815_v52, %v1816_v33  ;;  %v1708_v16 = vsel %vm1696_vm9, 0.0, %v1673_v19  ;;  %v1725_v37 = vsel %vm1696_vm9, %v1673_v19, 0.0  ;;  %v1972_v14 = vrot.slane %v4475_v54, 2  ;;  %1757 = vst.msk [vmem:[#allocation2 + $0x28] sm:$0xf] %vm1746_vm10, %v4522_v17 }
 0x2b0   :  { %v4507_v44 = vpack.c.bf16 %v1817_v36, %v1817_v36  ;;  %v1824_v49 = vrot.slane %v1708_v16, 1  ;;  %v1825_v11 = vrot.slane %v1725_v37, 1  ;;  %v1965_v5 = vrot.slane %v4371_v22, 2  ;;  %1754 = vst.msk [vmem:[#allocation2 + $0x1c] sm:$0xf] %vm1746_vm10, %v4524_v55 }
 0x2b1   :  { %1892 = vrot.lane.b32.xlu0 %v4469_v63, %s3301_s19  ;;  %v1968_v18 = vrot.slane %v1704_v59, 2  ;;  %v4538_v39 = vpack.c.bf16 %v4472_v7, %v4472_v7  ;;  %v4540_v10 = vpack.c.bf16 %v1708_v16, %v1708_v16  ;;  %v1971_v22 = vrot.slane %v4472_v7, 2 }
 0x2b2   :  { %v4545_v8 = vsel %vm1946_vm12, %v1965_v5, %v1966_v34  ;;  %v1826_v54 = vsel %vm1793_vm11, %v1824_v49, %v1825_v11  ;;  %v1527_v46 = vsub.f32 %v4262_v2, %v4283_v0  ;;  %v1528_v59 = vsub.f32 %v4240_v3, %v4283_v0 }
 0x2b3   :  { %v4553_v21 = vsel %vm1946_vm12, %v1968_v18, %v1969_v48  ;;  %v1955_v42 = vsel %vm1946_vm12, %v1953_v32, %v1954_v58  ;;  %1756 = vst.msk [vmem:[#allocation2 + $0x24] sm:$0xf] %vm1746_vm10, %v4538_v39  ;;  %v1978_v27 = vrot.slane %v1725_v37, 2  ;;  %v4572_v3 = vpack.c.bf16 %v1826_v54, %v1826_v54 }
 0x2b4   :  { %1758 = vst.msk [vmem:[#allocation2 + $0x2c] sm:$0xf] %vm1746_vm10, %v4540_v10  ;;  %v1554_v2 = vmul.f32 %v4308_v40, %v1527_v46  ;;  %v1555_v28 = vmul.f32 %v4308_v40, %v1528_v59  ;;  %v1529_v52 = vsub.f32 %v4259_v41, %v4283_v0  ;;  %v1530_v33 = vsub.f32 %v4270_v61, %v4283_v0 }
 0x2b5   :  { %v4580_v19 = vpack.c.bf16 %v1955_v42, %v1955_v42  ;;  %v1977_v47 = vrot.slane %v1708_v16, 2  ;;  %v1956_v11 = vrot.slane %v4343_v4, 2  ;;  %v1957_v58 = vrot.slane %v4349_v12, 2  ;;  %v1885_v12 = vpop.permute.xlu2 %1884 }
 0x2b6   :  { %v1572_v32 = vmul.f32 %v4304_v25, %v1554_v2  ;;  %v1573_v34 = vmul.f32 %v4304_v25, %v1555_v28  ;;  %v1556_v36 = vmul.f32 %v4308_v40, %v1529_v52  ;;  %v1557_v41 = vmul.f32 %v4308_v40, %v1530_v33  ;;  %1930 = vst.msk [vmem:[#allocation2] sm:$0xf] %vm1929_vm0, %v1885_v12 }
 0x2b7   :  { %2039 = vrot.lane.b32.xlu2 %v4482_v9, %s3303_s14  ;;  %1900 = vrot.lane.b32.xlu1 %v4502_v24, %s3301_s19  ;;  %v4593_v37 = vsel %vm1946_vm12, %v1977_v47, %v1978_v27  ;;  %v1958_v4 = vsel %vm1946_vm12, %v1956_v11, %v1957_v58  ;;  %1938 = vst.msk [vmem:[#allocation2 + $0x20] sm:$0xf] %vm1929_vm0, %v1885_v12  ;;  %vm2082_vm3 = vcmask 191616   ;;  %vm2246_vm5 = vcmask 322816  }
 0x2b8   :  { %v1590_v61 = vadd.f32 %v4318_v30, %v1572_v32  ;;  %v1574_v48 = vmul.f32 %v4304_v25, %v1556_v36  ;;  %v1575_v16 = vmul.f32 %v4304_v25, %v1557_v41  ;;  %v2010_v47 = vpack.c.bf16 %v1958_v4, %v1958_v4 }
 0x2b9   :  { %1898 = vrot.lane.b32.xlu0 %v4507_v44, %s3301_s19  ;;  %vm2323_vm6 = vcmask 388416   ;;  %vm2386_vm7 = vcmask 454016   ;;  %vm2448_vm8 = vcmask 519616   ;;  %vm2510_vm13 = vcmask 585216  }
 0x2ba   :  { %vm1607_vm14 = vcmp.ge.f32.partialorder %v1590_v61, 0.0  ;;  %v1624_v49 = vmul.f32 %v4329_v60, %v1590_v61  ;;  %v1592_v18 = vadd.f32 %v4318_v30, %v1574_v48 }
 0x2bc   :  { %vm1609_vm1 = vcmp.ge.f32.partialorder %v1592_v18, 0.0  ;;  %v1626_v52 = vmul.f32 %v4329_v60, %v1592_v18 }
 0x2bf   :  { %2198 = vrot.lane.b32.xlu2 %v4418_v57, %s3308_s15  ;;  %v1974_v57 = vrot.slane %v4423_v56, 2  ;;  %v4563_v56 = vsel %vm1946_vm12, %v1971_v22, %v1972_v14  ;;  %2275 = vrot.lane.b32.xlu1 %v4482_v9, %s3311_s3  ;;  %v1591_v9 = vadd.f32 %v4318_v30, %v1573_v34  ;;  %v1593_v22 = vadd.f32 %v4318_v30, %v1575_v16 }
 0x2c1   :  { %v4566_v7 = vsel %vm1946_vm12, %v1974_v57, %v1975_v13  ;;  %1904 = vrot.lane.b32.xlu0 %v4572_v3, %s3301_s19  ;;  %v1640_v13 = vsel %vm1607_vm14, %v1590_v61, %v1624_v49  ;;  %vm1608_vm15 = vcmp.ge.f32.partialorder %v1591_v9, 0.0  ;;  %v1625_v14 = vmul.f32 %v4329_v60, %v1591_v9 }
 0x2c2   :  { %v1674_v5 = vrot.slane %v1640_v13, 7  ;;  %vm1610_vm2 = vcmp.ge.f32.partialorder %v1593_v22, 0.0  ;;  %v1627_v34 = vmul.f32 %v4329_v60, %v1593_v22  ;;  %v1642_v49 = vsel %vm1609_vm1, %v1592_v18, %v1626_v52 }
 0x2c3   :  { %v1641_v57 = vsel %vm1608_vm15, %v1591_v9, %v1625_v14  ;;  %v1676_v58 = vrot.slane %v1642_v49, 7 }
 0x2c4   :  { %v1709_v54 = vsel %vm1696_vm9, 0.0, %v1674_v5  ;;  %v1726_v46 = vsel %vm1696_vm9, %v1674_v5, 0.0  ;;  %v1675_v27 = vrot.slane %v1641_v57, 7  ;;  %v1643_v13 = vsel %vm1610_vm2, %v1593_v22, %v1627_v34 }
 0x2c5   :  { %v1827_v59 = vrot.slane %v1709_v54, 1  ;;  %v1828_v42 = vrot.slane %v1726_v46, 1  ;;  %v1980_v2 = vrot.slane %v1709_v54, 2  ;;  %v1981_v28 = vrot.slane %v1726_v46, 2 }
 0x2c6   :  { %v1710_v32 = vsel %vm1696_vm9, 0.0, %v1675_v27  ;;  %v1677_v5 = vrot.slane %v1643_v13, 7  ;;  %v4635_v57 = vpack.c.bf16 %v1709_v54, %v1709_v54  ;;  %v1711_v18 = vsel %vm1696_vm9, 0.0, %v1676_v58 }
 0x2c7   :  { %2277 = vrot.lane.b32.xlu2 %v4580_v19, %s3311_s3  ;;  %2465 = vrot.lane.b32.xlu1 %v4580_v19, %s3312_s16  ;;  %v4616_v33 = vsel %vm1793_vm11, %v1827_v59, %v1828_v42  ;;  %v1983_v36 = vrot.slane %v1710_v32, 2  ;;  %v1830_v61 = vrot.slane %v1710_v32, 1  ;;  %v4621_v48 = vpack.c.bf16 %v1710_v32, %v1710_v32 }
 0x2c8   :  { %v4624_v16 = vsel %vm1946_vm12, %v1980_v2, %v1981_v28  ;;  %v1728_v4 = vsel %vm1696_vm9, %v1676_v58, 0.0  ;;  %v1986_v22 = vrot.slane %v1711_v18, 2  ;;  %v1833_v46 = vrot.slane %v1711_v18, 1  ;;  %1759 = vst.msk [vmem:[#allocation2 + $0x30] sm:$0xf] %vm1746_vm10, %v4635_v57 }
 0x2c9   :  { %2200 = vrot.lane.b32.xlu0 %v4408_v29, %s3308_s15  ;;  %1760 = vst.msk [vmem:[#allocation2 + $0x34] sm:$0xf] %vm1746_vm10, %v4621_v48  ;;  %v1987_v12 = vrot.slane %v1728_v4, 2  ;;  %v1834_v59 = vrot.slane %v1728_v4, 1  ;;  %v4644_v42 = vpack.c.bf16 %v1711_v18, %v1711_v18  ;;  %v1712_v54 = vsel %vm1696_vm9, 0.0, %v1677_v5 }
 0x2ca   :  { %v1989_v52 = vrot.slane %v1712_v54, 2 }
 0x2cb   :  { %v4649_v2 = vsel %vm1946_vm12, %v1986_v22, %v1987_v12  ;;  %v4652_v28 = vsel %vm1793_vm11, %v1833_v46, %v1834_v59  ;;  %1761 = vst.msk [vmem:[#allocation2 + $0x38] sm:$0xf] %vm1746_vm10, %v4644_v42  ;;  %v3231_v46 = vld [vmem:[%s5542_s6 + $0x38] sm:$0xff] }
 0x2cc   :  { %2655 = vmatpush.bf16.msra.mxu2 %v3231_v46  ;;  %3248 = vmatpush.bf16.msra.mxu3 %v3231_v46  ;;  %v3224_v46 = vld [vmem:[%s5542_s6] sm:$0xff] }
 0x2cf   :  { %2403 = vrot.lane.b32.xlu2 %v4408_v29, %s3313_s17  ;;  %v1727_v29 = vsel %vm1696_vm9, %v1675_v27, 0.0  ;;  %2043 = vrot.lane.b32.xlu1 %v2010_v47, %s3303_s14  ;;  %v1729_v27 = vsel %vm1696_vm9, %v1677_v5, 0.0 }
 0x2d0   :  { %v1984_v41 = vrot.slane %v1727_v29, 2  ;;  %v1831_v9 = vrot.slane %v1727_v29, 1  ;;  %v1990_v32 = vrot.slane %v1729_v27, 2  ;;  %v1836_v29 = vrot.slane %v1712_v54, 1 }
 0x2d1   :  { %2405 = vrot.lane.b32.xlu0 %v4380_v26, %s3313_s17  ;;  %v1837_v34 = vrot.slane %v1729_v27, 1 }
 0x2d2   :  { %v4627_v11 = vsel %vm1946_vm12, %v1983_v36, %v1984_v41  ;;  %v4631_v14 = vsel %vm1793_vm11, %v1830_v61, %v1831_v9  ;;  %v4657_v36 = vsel %vm1946_vm12, %v1989_v52, %v1990_v32  ;;  %v4659_v41 = vpack.c.bf16 %v1712_v54, %v1712_v54  ;;  %v3229_v52 = vld [vmem:[%s5542_s6 + $0x28] sm:$0xff] }
 0x2d3   :  { %v1960_v61 = vrot.slane %v4457_v51, 2  ;;  %v1959_v9 = vrot.slane %v4454_v53, 2  ;;  %v4664_v49 = vsel %vm1793_vm11, %v1836_v29, %v1837_v34  ;;  %v2038_v53 = vpop.permute.xlu1 %2037  ;;  %v2014_v32 = vpack.c.bf16 %v4553_v21, %v4553_v21 }
 0x2d4   :  { %1762 = vst.msk [vmem:[#allocation2 + $0x3c] sm:$0xf] %vm1746_vm10, %v4659_v41  ;;  %vm2165_vm10 = vcmask 257216  }
 0x2d5   :  { %v1961_v58 = vsel %vm1946_vm12, %v1959_v9, %v1960_v61  ;;  %2083 = vst.msk [vmem:[#allocation2] sm:$0xf] %vm2082_vm3, %v2038_v53 }
 0x2d6   :  { %v2011_v51 = vpack.c.bf16 %v1961_v58, %v1961_v58  ;;  %2091 = vst.msk [vmem:[#allocation2 + $0x20] sm:$0xf] %vm2082_vm3, %v2038_v53  ;;  %v3228_v58 = vld [vmem:[%s5542_s6 + $0x20] sm:$0xff] }
 0x2d7   :  { %2467 = vrot.lane.b32.xlu2 %v2010_v47, %s3312_s16  ;;  %2202 = vrot.lane.b32.xlu1 %v4380_v26, %s3308_s15 }
 0x2d9   :  { %2041 = vrot.lane.b32.xlu0 %v4580_v19, %s3303_s14  ;;  %v2012_v19 = vpack.c.bf16 %v4514_v6, %v4514_v6  ;;  %v1523_v6 = vsub.f32 %v4217_v43, %v4283_v0 }
 0x2db   :  { %v1550_v5 = vmul.f32 %v4308_v40, %v1523_v6 }
 0x2dd   :  { %v1568_v4 = vmul.f32 %v4304_v25, %v1550_v5  ;;  %v2013_v25 = vpack.c.bf16 %v4545_v8, %v4545_v8  ;;  %v3230_v8 = vld [vmem:[%s5542_s6 + $0x30] sm:$0xff] }
 0x2de   :  { %2656 = vmatpush.bf16.msra.mxu2 %v3230_v8  ;;  %3249 = vmatpush.bf16.msra.mxu3 %v3230_v8 }
 0x2df   :  { %2204 = vrot.lane.b32.xlu2 %v4469_v63, %s3308_s15  ;;  %2281 = vrot.lane.b32.xlu1 %v2011_v51, %s3311_s3  ;;  %v1586_v12 = vadd.f32 %v4318_v30, %v1568_v4 }
 0x2e1   :  { %2123 = vrot.lane.b32.xlu0 %v4491_v45, %s3306_s21  ;;  %vm1603_vm4 = vcmp.ge.f32.partialorder %v1586_v12, 0.0 }
 0x2e2   :  { %2657 = vmatpush.bf16.msra.mxu2 %v3229_v52  ;;  %3250 = vmatpush.bf16.msra.mxu3 %v3229_v52 }
 0x2e6   :  { %2658 = vmatpush.bf16.msra.mxu2 %v3228_v58  ;;  %3251 = vmatpush.bf16.msra.mxu3 %v3228_v58 }
 0x2e7   :  { %2345 = vrot.lane.b32.xlu2 %v4491_v45, %s3310_s13  ;;  %2407 = vrot.lane.b32.xlu1 %v4469_v63, %s3313_s17 }
 0x2e9   :  { %2279 = vrot.lane.b32.xlu0 %v2010_v47, %s3311_s3 }
 0x2ef   :  { %2409 = vrot.lane.b32.xlu2 %v4465_v50, %s3313_s17  ;;  %2471 = vrot.lane.b32.xlu1 %v2012_v19, %s3312_s16 }
 0x2f1   :  { %v4682_v26 = vpop.permute.xlu2 %2121  ;;  %2347 = vrot.lane.b32.xlu0 %v4500_v1, %s3310_s13 }
 0x2f7   :  { %2045 = vrot.lane.b32.xlu2 %v2011_v51, %s3303_s14  ;;  %2125 = vrot.lane.b32.xlu1 %v4500_v1, %s3306_s21 }
 0x2f9   :  { %v1891_v13 = vpop.permute.xlu2 %1890  ;;  %2469 = vrot.lane.b32.xlu0 %v2011_v51, %s3312_s16 }
 0x2fa   :  { %1933 = vst.msk [vmem:[#allocation2 + $0xc] sm:$0xf] %vm1929_vm0, %v1891_v13 }
 0x2ff   :  { %2127 = vrot.lane.b32.xlu2 %v4518_v23, %s3306_s21  ;;  %2208 = vrot.lane.b32.xlu1 %v4404_v38, %s3308_s15 }
 0x301   :  { %v1897_v45 = vpop.permute.xlu2 %1896  ;;  %2047 = vrot.lane.b32.xlu0 %v2012_v19, %s3303_s14 }
 0x302   :  { %1936 = vst.msk [vmem:[#allocation2 + $0x18] sm:$0xf] %vm1929_vm0, %v1897_v45 }
 0x307   :  { %2283 = vrot.lane.b32.xlu2 %v2012_v19, %s3311_s3  ;;  %2349 = vrot.lane.b32.xlu1 %v4518_v23, %s3310_s13  ;;  %v1620_v23 = vmul.f32 %v4329_v60, %v1586_v12 }
 0x309   :  { %v2120_v63 = vpop.permute.xlu1 %2119  ;;  %v1903_v47 = vpop.permute.xlu2 %1902  ;;  %2206 = vrot.lane.b32.xlu0 %v4465_v50, %s3308_s15  ;;  %v1636_v54 = vsel %vm1603_vm4, %v1586_v12, %v1620_v23 }
 0x30a   :  { %1940 = vst.msk [vmem:[#allocation2 + $0x28] sm:$0xf] %vm1929_vm0, %v1903_v47  ;;  %v1670_v27 = vrot.slane %v1636_v54, 7 }
 0x30b   :  { %v2118_v1 = vpop.permute.xlu0 %2117 }
 0x30c   :  { %2166 = vst.msk [vmem:[#allocation2] sm:$0xf] %vm2165_vm10, %v2118_v1  ;;  %v1705_v29 = vsel %vm1696_vm9, 0.0, %v1670_v27  ;;  %v1722_v9 = vsel %vm1696_vm9, %v1670_v27, 0.0 }
 0x30d   :  { %v2099_v61 = vpack.c.bf16 %v1705_v29, %v1705_v29  ;;  %v2263_v21 = vrot.slane %v1705_v29, 2  ;;  %v2264_v51 = vrot.slane %v1722_v9, 2  ;;  %v2186_v6 = vrot.slane %v1705_v29, 1 }
 0x30e   :  { %v2187_v47 = vrot.slane %v1722_v9, 1 }
 0x30f   :  { %2351 = vrot.lane.b32.xlu2 %v4524_v55, %s3310_s13  ;;  %2413 = vrot.lane.b32.xlu1 %v4507_v44, %s3313_s17  ;;  %v2265_v45 = vsel %vm1946_vm12, %v2263_v21, %v2264_v51  ;;  %v4885_v21 = vpack.c.bf16 %v4652_v28, %v4652_v28  ;;  %v4896_v28 = vpack.c.bf16 %v4649_v2, %v4649_v2 }
 0x310   :  { %v2271_v1 = vpack.c.bf16 %v2265_v45, %v2265_v45  ;;  %v4912_v2 = vpack.c.bf16 %v4664_v49, %v4664_v49 }
 0x311   :  { %v4711_v18 = vpop.permute.xlu1 %2343  ;;  %v2040_v22 = vpop.permute.xlu2 %2039  ;;  %2285 = vrot.lane.b32.xlu0 %v2013_v25, %s3311_s3 }
 0x313   :  { %v4720_v43 = vpop.permute.xlu0 %2341 }
 0x317   :  { %2473 = vrot.lane.b32.xlu2 %v2013_v25, %s3312_s16  ;;  %2049 = vrot.lane.b32.xlu1 %v2013_v25, %s3303_s14 }
 0x319   :  { %v1889_v50 = vpop.permute.xlu1 %1888  ;;  %v2199_v59 = vpop.permute.xlu2 %2198  ;;  %2411 = vrot.lane.b32.xlu0 %v4404_v38, %s3313_s17  ;;  %v3227_v38 = vld [vmem:[%s5542_s6 + $0x18] sm:$0xff] }
 0x31a   :  { %1932 = vst.msk [vmem:[#allocation2 + $0x8] sm:$0xf] %vm1929_vm0, %v1889_v50  ;;  %2659 = vmatpush.bf16.msra.mxu2 %v3227_v38  ;;  %3252 = vmatpush.bf16.msra.mxu3 %v3227_v38 }
 0x31b   :  { %v1887_v30 = vpop.permute.xlu0 %1886  ;;  %2247 = vst.msk [vmem:[#allocation2] sm:$0xf] %vm2246_vm5, %v2199_v59 }
 0x31c   :  { %1931 = vst.msk [vmem:[#allocation2 + $0x4] sm:$0xf] %vm1929_vm0, %v1887_v30 }
 0x31d   :  { %2084 = vst.msk [vmem:[#allocation2 + $0x4] sm:$0xf] %vm2082_vm3, %v2040_v22  ;;  %v2188_v22 = vsel %vm1793_vm11, %v2186_v6, %v2187_v47  ;;  %v4923_v47 = vpack.c.bf16 %v4657_v36, %v4657_v36 }
 0x31e   :  { %2167 = vst.msk [vmem:[#allocation2 + $0x4] sm:$0xf] %vm2165_vm10, %v2120_v63  ;;  %v3226_v63 = vld [vmem:[%s5542_s6 + $0x10] sm:$0xff]  ;;  %v2194_v25 = vpack.c.bf16 %v2188_v22, %v2188_v22 }
 0x31f   :  { %2051 = vrot.lane.b32.xlu2 %v2014_v32, %s3303_s14  ;;  %2131 = vrot.lane.b32.xlu1 %v2099_v61, %s3306_s21 }
 0x320   :  { %2660 = vmatpush.bf16.msra.mxu2 %v3226_v63  ;;  %3253 = vmatpush.bf16.msra.mxu3 %v3226_v63 }
 0x321   :  { %v4751_v34 = vpop.permute.xlu2 %2277  ;;  %2475 = vrot.lane.b32.xlu0 %v2014_v32, %s3312_s16  ;;  %v1895_v53 = vpop.permute.xlu1 %1894 }
 0x322   :  { %1935 = vst.msk [vmem:[#allocation2 + $0x14] sm:$0xf] %vm1929_vm0, %v1895_v53 }
 0x323   :  { %v1893_v19 = vpop.permute.xlu0 %1892 }
 0x324   :  { %1934 = vst.msk [vmem:[#allocation2 + $0x10] sm:$0xf] %vm1929_vm0, %v1893_v19 }
 0x327   :  { %2210 = vrot.lane.b32.xlu2 %v4507_v44, %s3308_s15  ;;  %2287 = vrot.lane.b32.xlu1 %v2014_v32, %s3311_s3  ;;  %v3225_v44 = vld [vmem:[%s5542_s6 + $0x8] sm:$0xff] }
 0x328   :  { %2661 = vmatpush.bf16.msra.mxu2 %v3225_v44  ;;  %3254 = vmatpush.bf16.msra.mxu3 %v3225_v44 }
 0x329   :  { %v2404_v13 = vpop.permute.xlu2 %2403  ;;  %2129 = vrot.lane.b32.xlu0 %v4524_v55, %s3306_s21  ;;  %v1901_v5 = vpop.permute.xlu1 %1900 }
 0x32a   :  { %1939 = vst.msk [vmem:[#allocation2 + $0x24] sm:$0xf] %vm1929_vm0, %v1901_v5 }
 0x32b   :  { %v1899_v4 = vpop.permute.xlu0 %1898 }
 0x32c   :  { %1937 = vst.msk [vmem:[#allocation2 + $0x1c] sm:$0xf] %vm1929_vm0, %v1899_v4  ;;  %2662 = vmatpush.bf16.msra.mxu2 %v3224_v46  ;;  %3255 = vmatpush.bf16.msra.mxu3 %v3224_v46 }
 0x32f   :  { %2289 = vrot.lane.b32.xlu2 %v2271_v1, %s3311_s3  ;;  %2355 = vrot.lane.b32.xlu1 %v3955_v62, %s3310_s13 }
 0x331   :  { %v2468_v12 = vpop.permute.xlu2 %2467  ;;  %2212 = vrot.lane.b32.xlu0 %v2194_v25, %s3308_s15  ;;  %v2276_v55 = vpop.permute.xlu1 %2275 }
 0x332   :  { %2324 = vst.msk [vmem:[#allocation2] sm:$0xf] %vm2323_vm6, %v2276_v55  ;;  %v1531_v55 = vsub.f32 %v4278_v35, %v4283_v0  ;;  %v3283_v35 = vld [vmem:[%s5541_s5] ss:$0 sm:$0xff] }
 0x333   :  { %v1905_v50 = vpop.permute.xlu0 %1904  ;;  %2387 = vst.msk [vmem:[#allocation2] sm:$0xf] %vm2386_vm7, %v4720_v43 }
 0x334   :  { %1941 = vst.msk [vmem:[#allocation2 + $0x2c] sm:$0xf] %vm1929_vm0, %v1905_v50  ;;  %v1558_v50 = vmul.f32 %v4308_v40, %v1531_v55 }
 0x335   :  { %2449 = vst.msk [vmem:[#allocation2] sm:$0xf] %vm2448_vm8, %v2404_v13 }
 0x336   :  { %v1576_v0 = vmul.f32 %v3283_v35, %v1558_v50 }
 0x337   :  { %2415 = vrot.lane.b32.xlu2 %v2194_v25, %s3313_s17  ;;  %2477 = vrot.lane.b32.xlu1 %v2271_v1, %s3312_s16 }
 0x339   :  { %v2205_v23 = vpop.permute.xlu2 %2204  ;;  %2353 = vrot.lane.b32.xlu0 %v2099_v61, %s3310_s13  ;;  %v2466_v62 = vpop.permute.xlu1 %2465 }
 0x33a   :  { %2511 = vst.msk [vmem:[#allocation2] sm:$0xf] %vm2510_vm13, %v2466_v62 }
 0x33b   :  { %v2201_v30 = vpop.permute.xlu0 %2200 }
 0x33c   :  { %2248 = vst.msk [vmem:[#allocation2 + $0x4] sm:$0xf] %vm2246_vm5, %v2201_v30 }
 0x33d   :  { %2325 = vst.msk [vmem:[#allocation2 + $0x4] sm:$0xf] %vm2323_vm6, %v4751_v34  ;;  %v4852_v34 = vpack.c.bf16 %v4631_v14, %v4631_v14  ;;  %v4867_v14 = vpack.c.bf16 %v4593_v37, %v4593_v37  ;;  %v4879_v37 = vpack.c.bf16 %v4624_v16, %v4624_v16 }
 0x33e   :  { %2388 = vst.msk [vmem:[#allocation2 + $0x4] sm:$0xf] %vm2386_vm7, %v4711_v18  ;;  %v2015_v18 = vpack.c.bf16 %v4563_v56, %v4563_v56 }
 0x33f   :  { %2479 = vrot.lane.b32.xlu2 %v4295_v31, %s3312_s16  ;;  %2133 = vrot.lane.b32.xlu1 %v4538_v39, %s3306_s21 }
 0x341   :  { %v2346_v43 = vpop.permute.xlu2 %2345  ;;  %2417 = vrot.lane.b32.xlu0 %v4292_v20, %s3313_s17  ;;  %v2044_v59 = vpop.permute.xlu1 %2043 }
 0x342   :  { %2086 = vst.msk [vmem:[#allocation2 + $0xc] sm:$0xf] %vm2082_vm3, %v2044_v59 }
 0x343   :  { %v2406_v31 = vpop.permute.xlu0 %2405 }
 0x344   :  { %2450 = vst.msk [vmem:[#allocation2 + $0x4] sm:$0xf] %vm2448_vm8, %v2406_v31 }
 0x345   :  { %2512 = vst.msk [vmem:[#allocation2 + $0x4] sm:$0xf] %vm2510_vm13, %v2468_v12 }
 0x347   :  { %2135 = vrot.lane.b32.xlu2 %v4522_v17, %s3306_s21  ;;  %2216 = vrot.lane.b32.xlu1 %v4443_v15, %s3308_s15 }
 0x349   :  { %v2410_v54 = vpop.permute.xlu2 %2409  ;;  %2053 = vrot.lane.b32.xlu0 %v2015_v18, %s3303_s14  ;;  %v2203_v20 = vpop.permute.xlu1 %2202 }
 0x34b   :  { %v2042_v39 = vpop.permute.xlu0 %2041 }
 0x34c   :  { %2085 = vst.msk [vmem:[#allocation2 + $0x8] sm:$0xf] %vm2082_vm3, %v2042_v39  ;;  %v3216_v8 = vld [vmem:[#allocation2] sm:$0xff] }
 0x34d   :  { %2168 = vst.msk [vmem:[#allocation2 + $0x8] sm:$0xf] %vm2165_vm10, %v4682_v26  ;;  %2663 = vmatmul.bf16.vlgmr.msra.gmra.mxu2 %v3216_v8  ;;  %v4833_v26 = vpack.c.bf16 %v4566_v7, %v4566_v7  ;;  %v4846_v7 = vpack.c.bf16 %v4616_v33, %v4616_v33  ;;  %v4863_v33 = vpack.c.bf16 %v4627_v11, %v4627_v11 }
 0x34e   :  { %2249 = vst.msk [vmem:[#allocation2 + $0x8] sm:$0xf] %vm2246_vm5, %v2203_v20 }
 0x34f   :  { %2291 = vrot.lane.b32.xlu2 %v2015_v18, %s3311_s3  ;;  %2357 = vrot.lane.b32.xlu1 %v4522_v17, %s3310_s13 }
 0x351   :  { %v2046_v27 = vpop.permute.xlu2 %2045  ;;  %2214 = vrot.lane.b32.xlu0 %v4502_v24, %s3308_s15  ;;  %v2282_v56 = vpop.permute.xlu1 %2281 }
 0x352   :  { %2087 = vst.msk [vmem:[#allocation2 + $0x10] sm:$0xf] %vm2082_vm3, %v2046_v27 }
 0x353   :  { %v2124_v52 = vpop.permute.xlu0 %2123 }
 0x354   :  { %2169 = vst.msk [vmem:[#allocation2 + $0xc] sm:$0xf] %vm2165_vm10, %v2124_v52 }
 0x355   :  { %2250 = vst.msk [vmem:[#allocation2 + $0xc] sm:$0xf] %vm2246_vm5, %v2205_v23 }
 0x356   :  { %2327 = vst.msk [vmem:[#allocation2 + $0xc] sm:$0xf] %vm2323_vm6, %v2282_v56 }
 0x357   :  { %2359 = vrot.lane.b32.xlu2 %v4540_v10, %s3310_s13  ;;  %2421 = vrot.lane.b32.xlu1 %v4572_v3, %s3313_s17 }
 0x359   :  { %v2128_v32 = vpop.permute.xlu2 %2127  ;;  %2293 = vrot.lane.b32.xlu0 %v4833_v26, %s3311_s3  ;;  %v2408_v24 = vpop.permute.xlu1 %2407 }
 0x35b   :  { %v2280_v17 = vpop.permute.xlu0 %2279 }
 0x35c   :  { %2326 = vst.msk [vmem:[#allocation2 + $0x8] sm:$0xf] %vm2323_vm6, %v2280_v17 }
 0x35d   :  { %2389 = vst.msk [vmem:[#allocation2 + $0x8] sm:$0xf] %vm2386_vm7, %v2346_v43 }
 0x35e   :  { %2451 = vst.msk [vmem:[#allocation2 + $0x8] sm:$0xf] %vm2448_vm8, %v2408_v24 }
 0x35f   :  { %2481 = vrot.lane.b32.xlu2 %v4833_v26, %s3312_s16  ;;  %1906 = vrot.lane.b32.xlu1 %v4846_v7, %s3301_s19 }
 0x361   :  { %v2284_v29 = vpop.permute.xlu2 %2283  ;;  %2419 = vrot.lane.b32.xlu0 %v4443_v15, %s3313_s17  ;;  %v2472_v61 = vpop.permute.xlu1 %2471 }
 0x363   :  { %v2348_v9 = vpop.permute.xlu0 %2347 }
 0x364   :  { %2390 = vst.msk [vmem:[#allocation2 + $0xc] sm:$0xf] %vm2386_vm7, %v2348_v9 }
 0x365   :  { %2452 = vst.msk [vmem:[#allocation2 + $0xc] sm:$0xf] %vm2448_vm8, %v2410_v54 }
 0x366   :  { %2514 = vst.msk [vmem:[#allocation2 + $0xc] sm:$0xf] %vm2510_vm13, %v2472_v61 }
 0x367   :  { %1908 = vrot.lane.b32.xlu2 %v4852_v34, %s3301_s19  ;;  %2061 = vrot.lane.b32.xlu1 %v4863_v33, %s3303_s14 }
 0x369   :  { %v2352_v58 = vpop.permute.xlu2 %2351  ;;  %2483 = vrot.lane.b32.xlu0 %v4867_v14, %s3312_s16  ;;  %v2126_v15 = vpop.permute.xlu1 %2125 }
 0x36a   :  { %2170 = vst.msk [vmem:[#allocation2 + $0x10] sm:$0xf] %vm2165_vm10, %v2126_v15 }
 0x36b   :  { %v2470_v38 = vpop.permute.xlu0 %2469 }
 0x36c   :  { %2513 = vst.msk [vmem:[#allocation2 + $0x8] sm:$0xf] %vm2510_vm13, %v2470_v38 }
 0x36f   :  { %2141 = vrot.lane.b32.xlu2 %v4621_v48, %s3306_s21  ;;  %2222 = vrot.lane.b32.xlu1 %v4852_v34, %s3308_s15 }
 0x371   :  { %v2474_v11 = vpop.permute.xlu2 %2473  ;;  %2059 = vrot.lane.b32.xlu0 %v4879_v37, %s3303_s14  ;;  %v2209_v51 = vpop.permute.xlu1 %2208 }
 0x373   :  { %v2048_v53 = vpop.permute.xlu0 %2047  ;;  %v3217_v19 = vld [vmem:[#allocation2 + $0x8] sm:$0xff] }
 0x374   :  { %2088 = vst.msk [vmem:[#allocation2 + $0x14] sm:$0xf] %vm2082_vm3, %v2048_v53  ;;  %2668 = vmatmul.bf16.gmra.mxu2 %v3217_v19 }
 0x375   :  { %2171 = vst.msk [vmem:[#allocation2 + $0x14] sm:$0xf] %vm2165_vm10, %v2128_v32 }
 0x376   :  { %2252 = vst.msk [vmem:[#allocation2 + $0x14] sm:$0xf] %vm2246_vm5, %v2209_v51 }
 0x377   :  { %2224 = vrot.lane.b32.xlu2 %v4885_v21, %s3308_s15  ;;  %2301 = vrot.lane.b32.xlu1 %v4896_v28, %s3311_s3 }
 0x379   :  { %v2052_v16 = vpop.permute.xlu2 %2051  ;;  %2143 = vrot.lane.b32.xlu0 %v4644_v42, %s3306_s21  ;;  %v2350_v13 = vpop.permute.xlu1 %2349 }
 0x37a   :  { %2090 = vst.msk [vmem:[#allocation2 + $0x1c] sm:$0xf] %vm2082_vm3, %v2052_v16 }
 0x37b   :  { %v2207_v45 = vpop.permute.xlu0 %2206 }
 0x37c   :  { %2251 = vst.msk [vmem:[#allocation2 + $0x10] sm:$0xf] %vm2246_vm5, %v2207_v45 }
 0x37d   :  { %2328 = vst.msk [vmem:[#allocation2 + $0x10] sm:$0xf] %vm2323_vm6, %v2284_v29 }
 0x37e   :  { %2391 = vst.msk [vmem:[#allocation2 + $0x10] sm:$0xf] %vm2386_vm7, %v2350_v13 }
 0x37f   :  { %2365 = vrot.lane.b32.xlu2 %v4644_v42, %s3310_s13  ;;  %2427 = vrot.lane.b32.xlu1 %v4885_v21, %s3313_s17 }
 0x381   :  { %v2211_v63 = vpop.permute.xlu2 %2210  ;;  %2299 = vrot.lane.b32.xlu0 %v4863_v33, %s3311_s3  ;;  %v2414_v6 = vpop.permute.xlu1 %2413 }
 0x383   :  { %v2286_v42 = vpop.permute.xlu0 %2285 }
 0x384   :  { %2329 = vst.msk [vmem:[#allocation2 + $0x14] sm:$0xf] %vm2323_vm6, %v2286_v42 }
 0x385   :  { %2392 = vst.msk [vmem:[#allocation2 + $0x14] sm:$0xf] %vm2386_vm7, %v2352_v58 }
 0x386   :  { %2454 = vst.msk [vmem:[#allocation2 + $0x14] sm:$0xf] %vm2448_vm8, %v2414_v6 }
 0x387   :  { %2429 = vrot.lane.b32.xlu2 %v4912_v2, %s3313_s17  ;;  %2491 = vrot.lane.b32.xlu1 %v4923_v47, %s3312_s16 }
 0x389   :  { %v2290_v1 = vpop.permute.xlu2 %2289  ;;  %2367 = vrot.lane.b32.xlu0 %v4659_v41, %s3310_s13  ;;  %v2050_v49 = vpop.permute.xlu1 %2049 }
 0x38a   :  { %2089 = vst.msk [vmem:[#allocation2 + $0x18] sm:$0xf] %vm2082_vm3, %v2050_v49 }
 0x38b   :  { %v2412_v44 = vpop.permute.xlu0 %2411 }
 0x38c   :  { %2453 = vst.msk [vmem:[#allocation2 + $0x10] sm:$0xf] %vm2448_vm8, %v2412_v44 }
 0x38d   :  { %2515 = vst.msk [vmem:[#allocation2 + $0x10] sm:$0xf] %vm2510_vm13, %v2474_v11 }
 0x38f   :  { %2055 = vrot.lane.b32.xlu2 %v4833_v26, %s3303_s14  ;;  %2137 = vrot.lane.b32.xlu1 %v4540_v10, %s3306_s21 }
 0x391   :  { %v2416_v5 = vpop.permute.xlu2 %2415  ;;  %2489 = vrot.lane.b32.xlu0 %v4896_v28, %s3312_s16  ;;  %v2132_v36 = vpop.permute.xlu1 %2131 }
 0x392   :  { %2173 = vst.msk [vmem:[#allocation2 + $0x1c] sm:$0xf] %vm2165_vm10, %v2132_v36 }
 0x393   :  { %v2476_v4 = vpop.permute.xlu0 %2475 }
 0x394   :  { %2516 = vst.msk [vmem:[#allocation2 + $0x14] sm:$0xf] %vm2510_vm13, %v2476_v4 }
 0x397   :  { %2139 = vrot.lane.b32.xlu2 %v4635_v57, %s3306_s21  ;;  %2220 = vrot.lane.b32.xlu1 %v4846_v7, %s3308_s15 }
 0x399   :  { %v4942_v22 = vpop.permute.xlu2 %2479  ;;  %2057 = vrot.lane.b32.xlu0 %v4867_v14, %s3303_s14  ;;  %v2288_v10 = vpop.permute.xlu1 %2287 }
 0x39b   :  { %v2130_v12 = vpop.permute.xlu0 %2129  ;;  %v3218_v46 = vld [vmem:[#allocation2 + $0x10] sm:$0xff] }
 0x39c   :  { %2172 = vst.msk [vmem:[#allocation2 + $0x18] sm:$0xf] %vm2165_vm10, %v2130_v12  ;;  %2673 = vmatmul.bf16.gmra.mxu2 %v3218_v46 }
 0x39d   :  { %2253 = vst.msk [vmem:[#allocation2 + $0x18] sm:$0xf] %vm2246_vm5, %v2211_v63 }
 0x39e   :  { %2330 = vst.msk [vmem:[#allocation2 + $0x18] sm:$0xf] %vm2323_vm6, %v2288_v10 }
 0x39f   :  { %2295 = vrot.lane.b32.xlu2 %v4867_v14, %s3311_s3  ;;  %2361 = vrot.lane.b32.xlu1 %v4635_v57, %s3310_s13 }
 0x3a1   :  { %v2136_v25 = vpop.permute.xlu2 %2135  ;;  %2218 = vrot.lane.b32.xlu0 %v4572_v3, %s3308_s15  ;;  %v4960_v23 = vpop.permute.xlu1 %2355  ;;  %v3284_v3 = vld [vmem:[%s5541_s5 + $0x1] ss:$0 sm:$0xff] }
 0x3a2   :  { %v1594_v57 = vadd.f32 %v3284_v3, %v1576_v0 }
 0x3a3   :  { %v2213_v62 = vpop.permute.xlu0 %2212 }
 0x3a4   :  { %2254 = vst.msk [vmem:[#allocation2 + $0x1c] sm:$0xf] %vm2246_vm5, %v2213_v62  ;;  %v1628_v30 = vmul.f32 %v4329_v60, %v1594_v57  ;;  %vm1611_vm14 = vcmp.ge.f32.partialorder %v1594_v57, 0.0 }
 0x3a5   :  { %2331 = vst.msk [vmem:[#allocation2 + $0x1c] sm:$0xf] %vm2323_vm6, %v2290_v1 }
 0x3a6   :  { %2394 = vst.msk [vmem:[#allocation2 + $0x1c] sm:$0xf] %vm2386_vm7, %v4960_v23  ;;  %v1644_v31 = vsel %vm1611_vm14, %v1594_v57, %v1628_v30 }
 0x3a7   :  { %2363 = vrot.lane.b32.xlu2 %v4621_v48, %s3310_s13  ;;  %2425 = vrot.lane.b32.xlu1 %v4852_v34, %s3313_s17  ;;  %v1678_v54 = vrot.slane %v1644_v31, 7 }
 0x3a9   :  { %v2292_v40 = vpop.permute.xlu2 %2291  ;;  %2297 = vrot.lane.b32.xlu0 %v4879_v37, %s3311_s3  ;;  %v2478_v48 = vpop.permute.xlu1 %2477  ;;  %v1713_v39 = vsel %vm1696_vm9, 0.0, %v1678_v54  ;;  %v1730_v8 = vsel %vm1696_vm9, %v1678_v54, 0.0 }
 0x3aa   :  { %v2189_v27 = vrot.slane %v1713_v39, 1  ;;  %v2190_v56 = vrot.slane %v1730_v8, 1  ;;  %v2266_v29 = vrot.slane %v1713_v39, 2  ;;  %v2100_v14 = vpack.c.bf16 %v1713_v39, %v1713_v39 }
 0x3ab   :  { %v2354_v43 = vpop.permute.xlu0 %2353 }
 0x3ac   :  { %2393 = vst.msk [vmem:[#allocation2 + $0x18] sm:$0xf] %vm2386_vm7, %v2354_v43  ;;  %v2191_v17 = vsel %vm1793_vm11, %v2189_v27, %v2190_v56 }
 0x3ad   :  { %2455 = vst.msk [vmem:[#allocation2 + $0x18] sm:$0xf] %vm2448_vm8, %v2416_v5 }
 0x3ae   :  { %2517 = vst.msk [vmem:[#allocation2 + $0x18] sm:$0xf] %vm2510_vm13, %v2478_v48 }
 0x3af   :  { %2485 = vrot.lane.b32.xlu2 %v4879_v37, %s3312_s16  ;;  %1910 = vrot.lane.b32.xlu1 %v4885_v21, %s3301_s19 }
 0x3b1   :  { %v2360_v59 = vpop.permute.xlu2 %2359  ;;  %2423 = vrot.lane.b32.xlu0 %v4846_v7, %s3313_s17  ;;  %v2134_v18 = vpop.permute.xlu1 %2133  ;;  %v2267_v7 = vrot.slane %v1730_v8, 2 }
 0x3b2   :  { %2174 = vst.msk [vmem:[#allocation2 + $0x20] sm:$0xf] %vm2165_vm10, %v2134_v18  ;;  %v5076_v8 = vpop.f32.mrf.mxu1 }
 0x3b3   :  { %v4991_v60 = vpop.permute.xlu0 %2417  ;;  %v2268_v9 = vsel %vm1946_vm12, %v2266_v29, %v2267_v7 }
 0x3b4   :  { %2456 = vst.msk [vmem:[#allocation2 + $0x1c] sm:$0xf] %vm2448_vm8, %v4991_v60 }
 0x3b5   :  { %2518 = vst.msk [vmem:[#allocation2 + $0x1c] sm:$0xf] %vm2510_vm13, %v4942_v22 }
 0x3b7   :  { %1912 = vrot.lane.b32.xlu2 %v4912_v2, %s3301_s19  ;;  %2065 = vrot.lane.b32.xlu1 %v4923_v47, %s3303_s14 }
 0x3b9   :  { %v2482_v20 = vpop.permute.xlu2 %2481  ;;  %2487 = vrot.lane.b32.xlu0 %v4863_v33, %s3312_s16  ;;  %v2217_v52 = vpop.permute.xlu1 %2216  ;;  %v2272_v33 = vpack.c.bf16 %v2268_v9, %v2268_v9 }
 0x3bb   :  { %v2054_v32 = vpop.permute.xlu0 %2053 }
 0x3bc   :  { %2092 = vst.msk [vmem:[#allocation2 + $0x24] sm:$0xf] %vm2082_vm3, %v2054_v32  ;;  %v3219_v26 = vld [vmem:[#allocation2 + $0x18] sm:$0xff]  ;;  %v5080_v32 = vpop.f32.mrf.mxu1 }
 0x3bd   :  { %2175 = vst.msk [vmem:[#allocation2 + $0x24] sm:$0xf] %vm2165_vm10, %v2136_v25  ;;  %2678 = vmatmul.bf16.gmra.mxu2 %v3219_v26 }
 0x3be   :  { %2256 = vst.msk [vmem:[#allocation2 + $0x24] sm:$0xf] %vm2246_vm5, %v2217_v52 }
 0x3bf   :  { %2145 = vrot.lane.b32.xlu2 %v4659_v41, %s3306_s21  ;;  %2226 = vrot.lane.b32.xlu1 %v4912_v2, %s3308_s15  ;;  %v2195_v41 = vpack.c.bf16 %v2191_v17, %v2191_v17 }
 0x3c1   :  { %v1909_v24 = vpop.permute.xlu2 %1908  ;;  %2063 = vrot.lane.b32.xlu0 %v4896_v28, %s3303_s14  ;;  %v2358_v34 = vpop.permute.xlu1 %2357 }
 0x3c2   :  { %1943 = vst.msk [vmem:[#allocation2 + $0x34] sm:$0xf] %vm1929_vm0, %v1909_v24 }
 0x3c3   :  { %v2215_v61 = vpop.permute.xlu0 %2214 }
 0x3c4   :  { %2255 = vst.msk [vmem:[#allocation2 + $0x20] sm:$0xf] %vm2246_vm5, %v2215_v61 }
 0x3c5   :  { %2332 = vst.msk [vmem:[#allocation2 + $0x20] sm:$0xf] %vm2323_vm6, %v2292_v40 }
 0x3c6   :  { %2395 = vst.msk [vmem:[#allocation2 + $0x20] sm:$0xf] %vm2386_vm7, %v2358_v34 }
 0x3c7   :  { %2228 = vrot.lane.b32.xlu2 %v2195_v41, %s3308_s15  ;;  %2305 = vrot.lane.b32.xlu1 %v2272_v33, %s3311_s3  ;;  %s5315_s15 = sld [smem:[#allocation3 + $0x2]] }
 0x3c9   :  { %v2142_v58 = vpop.permute.xlu2 %2141  ;;  %2147 = vrot.lane.b32.xlu0 %v2100_v14, %s3306_s21  ;;  %v2422_v15 = vpop.permute.xlu1 %2421 }
 0x3cb   :  { %v2294_v38 = vpop.permute.xlu0 %2293 }
 0x3cc   :  { %2333 = vst.msk [vmem:[#allocation2 + $0x24] sm:$0xf] %vm2323_vm6, %v2294_v38  ;;  %v1313_v38 = vadd.f32 %v5080_v32, %v5076_v8 }
 0x3cd   :  { %2396 = vst.msk [vmem:[#allocation2 + $0x24] sm:$0xf] %vm2386_vm7, %v2360_v59 }
 0x3ce   :  { %2458 = vst.msk [vmem:[#allocation2 + $0x24] sm:$0xf] %vm2448_vm8, %v2422_v15 }
 0x3cf   :  { %2369 = vrot.lane.b32.xlu2 %v2100_v14, %s3310_s13  ;;  %2493 = vrot.lane.b32.xlu1 %v2272_v33, %s3312_s16  ;;  %v5106_v33 = vpop.f32.mrf.mxu3 }
 0x3d0   :  { %v5090_v17 = vpop.f32.mrf.mxu2 }
 0x3d1   :  { %v2225_v11 = vpop.permute.xlu2 %2224  ;;  %2303 = vrot.lane.b32.xlu0 %v4923_v47, %s3311_s3  ;;  %v1907_v37 = vpop.permute.xlu1 %1906 }
 0x3d2   :  { %1942 = vst.msk [vmem:[#allocation2 + $0x30] sm:$0xf] %vm1929_vm0, %v1907_v37  ;;  %v1335_v37 = vmul.f32 %v5076_v8, %v5076_v8 }
 0x3d3   :  { %v2420_v21 = vpop.permute.xlu0 %2419 }
 0x3d4   :  { %2457 = vst.msk [vmem:[#allocation2 + $0x20] sm:$0xf] %vm2448_vm8, %v2420_v21 }
 0x3d5   :  { %2519 = vst.msk [vmem:[#allocation2 + $0x20] sm:$0xf] %vm2510_vm13, %v2482_v20 }
 0x3d8   :  { %v5094_v7 = vpop.f32.mrf.mxu2 }
 0x3d9   :  { %v2366_v51 = vpop.permute.xlu2 %2365  ;;  %2431 = vrot.lane.b32.xlu0 %v2195_v41, %s3313_s17  ;;  %v2062_v53 = vpop.permute.xlu1 %2061 }
 0x3da   :  { %2096 = vst.msk [vmem:[#allocation2 + $0x34] sm:$0xf] %vm2082_vm3, %v2062_v53 }
 0x3db   :  { %v2484_v19 = vpop.permute.xlu0 %2483 }
 0x3dc   :  { %2520 = vst.msk [vmem:[#allocation2 + $0x24] sm:$0xf] %vm2510_vm13, %v2484_v19 }
 0x3e1   :  { %v2430_v16 = vpop.permute.xlu2 %2429  ;;  %v2223_v28 = vpop.permute.xlu1 %2222 }
 0x3e3   :  { %v2060_v13 = vpop.permute.xlu0 %2059  ;;  %v3220_v45 = vld [vmem:[#allocation2 + $0x20] sm:$0xff] }
 0x3e4   :  { %2095 = vst.msk [vmem:[#allocation2 + $0x30] sm:$0xf] %vm2082_vm3, %v2060_v13  ;;  %2683 = vmatmul.bf16.gmra.mxu2 %v3220_v45 }
 0x3e5   :  { %2178 = vst.msk [vmem:[#allocation2 + $0x30] sm:$0xf] %vm2165_vm10, %v2142_v58 }
 0x3e6   :  { %2259 = vst.msk [vmem:[#allocation2 + $0x30] sm:$0xf] %vm2246_vm5, %v2223_v28  ;;  %v5124_v28 = vpop.f32.mrf.mxu3 }
 0x3e9   :  { %v2056_v63 = vpop.permute.xlu2 %2055  ;;  %v2302_v2 = vpop.permute.xlu1 %2301 }
 0x3ea   :  { %2093 = vst.msk [vmem:[#allocation2 + $0x28] sm:$0xf] %vm2082_vm3, %v2056_v63 }
 0x3eb   :  { %v2144_v6 = vpop.permute.xlu0 %2143 }
 0x3ec   :  { %2179 = vst.msk [vmem:[#allocation2 + $0x34] sm:$0xf] %vm2165_vm10, %v2144_v6 }
 0x3ed   :  { %2260 = vst.msk [vmem:[#allocation2 + $0x34] sm:$0xf] %vm2246_vm5, %v2225_v11  ;;  %v1336_v11 = vmul.f32 %v5080_v32, %v5080_v32 }
 0x3ee   :  { %2337 = vst.msk [vmem:[#allocation2 + $0x34] sm:$0xf] %vm2323_vm6, %v2302_v2 }
 0x3ef   :  { %v1351_v53 = vadd.f32 %v1336_v11, %v1335_v37 }
 0x3f1   :  { %v2140_v42 = vpop.permute.xlu2 %2139  ;;  %v2428_v1 = vpop.permute.xlu1 %2427 }
 0x3f3   :  { %v2300_v47 = vpop.permute.xlu0 %2299 }
 0x3f4   :  { %2336 = vst.msk [vmem:[#allocation2 + $0x30] sm:$0xf] %vm2323_vm6, %v2300_v47 }
 0x3f5   :  { %2399 = vst.msk [vmem:[#allocation2 + $0x30] sm:$0xf] %vm2386_vm7, %v2366_v51 }
 0x3f6   :  { %2461 = vst.msk [vmem:[#allocation2 + $0x30] sm:$0xf] %vm2448_vm8, %v2428_v1 }
 0x3f7   :  { %v5098_v34 = vpop.f32.mrf.mxu2 }
 0x3f9   :  { %v2296_v49 = vpop.permute.xlu2 %2295  ;;  %v2492_v44 = vpop.permute.xlu1 %2491 }
 0x3fb   :  { %v2368_v5 = vpop.permute.xlu0 %2367 }
 0x3fc   :  { %2400 = vst.msk [vmem:[#allocation2 + $0x34] sm:$0xf] %vm2386_vm7, %v2368_v5 }
 0x3fd   :  { %2462 = vst.msk [vmem:[#allocation2 + $0x34] sm:$0xf] %vm2448_vm8, %v2430_v16 }
 0x3fe   :  { %2524 = vst.msk [vmem:[#allocation2 + $0x34] sm:$0xf] %vm2510_vm13, %v2492_v44 }
 0x3ff   :  { %v5102_v9 = vpop.f32.mrf.mxu2 }
 0x401   :  { %v2364_v36 = vpop.permute.xlu2 %2363  ;;  %v2138_v4 = vpop.permute.xlu1 %2137 }
 0x402   :  { %2176 = vst.msk [vmem:[#allocation2 + $0x28] sm:$0xf] %vm2165_vm10, %v2138_v4 }
 0x403   :  { %v2490_v10 = vpop.permute.xlu0 %2489 }
 0x404   :  { %2523 = vst.msk [vmem:[#allocation2 + $0x30] sm:$0xf] %vm2510_vm13, %v2490_v10 }
 0x409   :  { %v2486_v12 = vpop.permute.xlu2 %2485  ;;  %v2221_v46 = vpop.permute.xlu1 %2220 }
 0x40b   :  { %v2058_v25 = vpop.permute.xlu0 %2057  ;;  %v3222_v55 = vld [vmem:[#allocation2 + $0x30] sm:$0xff] }
 0x40c   :  { %2094 = vst.msk [vmem:[#allocation2 + $0x2c] sm:$0xf] %vm2082_vm3, %v2058_v25  ;;  %2693 = vmatmul.bf16.vlgmr.msra.gmra.mxu3 %v3222_v55 }
 0x40d   :  { %2177 = vst.msk [vmem:[#allocation2 + $0x2c] sm:$0xf] %vm2165_vm10, %v2140_v42 }
 0x40e   :  { %2258 = vst.msk [vmem:[#allocation2 + $0x2c] sm:$0xf] %vm2246_vm5, %v2221_v46 }
 0x411   :  { %v1913_v50 = vpop.permute.xlu2 %1912  ;;  %v2362_v35 = vpop.permute.xlu1 %2361 }
 0x412   :  { %1945 = vst.msk [vmem:[#allocation2 + $0x3c] sm:$0xf] %vm1929_vm0, %v1913_v50  ;;  %v5147_v50 = vpop.f32.mrf.mxu3 }
 0x413   :  { %v2219_v0 = vpop.permute.xlu0 %2218 }
 0x414   :  { %2257 = vst.msk [vmem:[#allocation2 + $0x28] sm:$0xf] %vm2246_vm5, %v2219_v0 }
 0x415   :  { %2334 = vst.msk [vmem:[#allocation2 + $0x28] sm:$0xf] %vm2323_vm6, %v2296_v49 }
 0x416   :  { %2397 = vst.msk [vmem:[#allocation2 + $0x28] sm:$0xf] %vm2386_vm7, %v2362_v35 }
 0x419   :  { %v2426_v62 = vpop.permute.xlu1 %2425  ;;  %v2146_v43 = vpop.permute.xlu2 %2145 }
 0x41b   :  { %v2298_v40 = vpop.permute.xlu0 %2297 }
 0x41c   :  { %2335 = vst.msk [vmem:[#allocation2 + $0x2c] sm:$0xf] %vm2323_vm6, %v2298_v40 }
 0x41d   :  { %2398 = vst.msk [vmem:[#allocation2 + $0x2c] sm:$0xf] %vm2386_vm7, %v2364_v36 }
 0x41e   :  { %2460 = vst.msk [vmem:[#allocation2 + $0x2c] sm:$0xf] %vm2448_vm8, %v2426_v62 }
 0x41f   :  { %v5108_v14 = vpop.f32.mrf.mxu2 }
 0x421   :  { %v1911_v3 = vpop.permute.xlu1 %1910  ;;  %v2229_v18 = vpop.permute.xlu2 %2228 }
 0x422   :  { %1944 = vst.msk [vmem:[#allocation2 + $0x38] sm:$0xf] %vm1929_vm0, %v1911_v3 }
 0x423   :  { %v2424_v57 = vpop.permute.xlu0 %2423 }
 0x424   :  { %2459 = vst.msk [vmem:[#allocation2 + $0x28] sm:$0xf] %vm2448_vm8, %v2424_v57 }
 0x425   :  { %2521 = vst.msk [vmem:[#allocation2 + $0x28] sm:$0xf] %vm2510_vm13, %v2486_v12 }
 0x427   :  { %v5129_v2 = vpop.f32.mrf.mxu2 }
 0x429   :  { %v2066_v48 = vpop.permute.xlu1 %2065  ;;  %v2370_v56 = vpop.permute.xlu2 %2369 }
 0x42a   :  { %2098 = vst.msk [vmem:[#allocation2 + $0x3c] sm:$0xf] %vm2082_vm3, %v2066_v48 }
 0x42b   :  { %v2488_v30 = vpop.permute.xlu0 %2487 }
 0x42c   :  { %2522 = vst.msk [vmem:[#allocation2 + $0x2c] sm:$0xf] %vm2510_vm13, %v2488_v30 }
 0x431   :  { %v2227_v59 = vpop.permute.xlu1 %2226 }
 0x433   :  { %v2064_v31 = vpop.permute.xlu0 %2063  ;;  %v3221_v54 = vld [vmem:[#allocation2 + $0x28] sm:$0xff] }
 0x434   :  { %2097 = vst.msk [vmem:[#allocation2 + $0x38] sm:$0xf] %vm2082_vm3, %v2064_v31  ;;  %2688 = vmatmul.bf16.gmra.mxu2 %v3221_v54 }
 0x435   :  { %2180 = vst.msk [vmem:[#allocation2 + $0x38] sm:$0xf] %vm2165_vm10, %v2146_v43 }
 0x436   :  { %2261 = vst.msk [vmem:[#allocation2 + $0x38] sm:$0xf] %vm2246_vm5, %v2227_v59 }
 0x439   :  { %v2306_v39 = vpop.permute.xlu1 %2305 }
 0x43b   :  { %v2148_v20 = vpop.permute.xlu0 %2147 }
 0x43c   :  { %2181 = vst.msk [vmem:[#allocation2 + $0x3c] sm:$0xf] %vm2165_vm10, %v2148_v20 }
 0x43d   :  { %2262 = vst.msk [vmem:[#allocation2 + $0x3c] sm:$0xf] %vm2246_vm5, %v2229_v18  ;;  %v1347_v18 = vmul.f32 %v5106_v33, %v5106_v33 }
 0x43e   :  { %2339 = vst.msk [vmem:[#allocation2 + $0x3c] sm:$0xf] %vm2323_vm6, %v2306_v39 }
 0x43f   :  { %2402 = vst.msk [vmem:[#allocation2 + $0x3c] sm:$0xf] %vm2386_vm7, %v4960_v23  ;;  %v5084_v23 = vpop.f32.mrf.mxu1 }
 0x440   :  { %2464 = vst.msk [vmem:[#allocation2 + $0x3c] sm:$0xf] %vm2448_vm8, %v4991_v60  ;;  %v1314_v21 = vadd.f32 %v1313_v38, %v5084_v23  ;;  %v1337_v51 = vmul.f32 %v5084_v23, %v5084_v23  ;;  %v5145_v55 = vpop.f32.mrf.mxu2  ;;  %v1349_v38 = vmul.f32 %v5147_v50, %v5147_v50 }
 0x441   :  { %2526 = vst.msk [vmem:[#allocation2 + $0x3c] sm:$0xf] %vm2510_vm13, %v4942_v22  ;;  %v2494_v26 = vpop.permute.xlu1 %2493 }
 0x442   :  { %v1352_v13 = vadd.f32 %v1351_v53, %v1337_v51 }
 0x443   :  { %v2304_v27 = vpop.permute.xlu0 %2303 }
 0x444   :  { %2338 = vst.msk [vmem:[#allocation2 + $0x38] sm:$0xf] %vm2323_vm6, %v2304_v27  ;;  %v1348_v27 = vmul.f32 %v5124_v28, %v5124_v28 }
 0x445   :  { %2401 = vst.msk [vmem:[#allocation2 + $0x38] sm:$0xf] %vm2386_vm7, %v2370_v56 }
 0x447   :  { %v5086_v22 = vpop.f32.mrf.mxu1 }
 0x448   :  { %v1315_v19 = vadd.f32 %v1314_v21, %v5086_v22  ;;  %v1338_v16 = vmul.f32 %v5086_v22, %v5086_v22  ;;  %v5166_v56 = vpop.f32.mrf.mxu2 }
 0x44a   :  { %v1353_v42 = vadd.f32 %v1352_v13, %v1338_v16 }
 0x44b   :  { %v2432_v52 = vpop.permute.xlu0 %2431 }
 0x44c   :  { %2463 = vst.msk [vmem:[#allocation2 + $0x38] sm:$0xf] %vm2448_vm8, %v2432_v52  ;;  %v5168_v52 = vpop.f32.mrf.mxu3 }
 0x44d   :  { %2525 = vst.msk [vmem:[#allocation2 + $0x38] sm:$0xf] %vm2510_vm13, %v2494_v26  ;;  %v1350_v21 = vmul.f32 %v5168_v52, %v5168_v52 }
 0x44f   :  { %v5088_v24 = vpop.f32.mrf.mxu1 }
 0x450   :  { %v1316_v45 = vadd.f32 %v1315_v19, %v5088_v24  ;;  %v1339_v63 = vmul.f32 %v5088_v24, %v5088_v24 }
 0x452   :  { %v1354_v49 = vadd.f32 %v1353_v42, %v1339_v63 }
 0x454   :  { %v3223_v60 = vld [vmem:[#allocation2 + $0x38] sm:$0xff] }
 0x455   :  { %2698 = vmatmul.bf16.gmra.mxu3 %v3223_v60 }
 0x457   :  { %v5092_v29 = vpop.f32.mrf.mxu1 }
 0x458   :  { %v1317_v1 = vadd.f32 %v1316_v45, %v5092_v29  ;;  %v1340_v47 = vmul.f32 %v5092_v29, %v5092_v29 }
 0x45a   :  { %v1355_v36 = vadd.f32 %v1354_v49, %v1340_v47  ;;  %v2727_v47 = vmul.f32 %v5094_v7, %v5094_v7 }
 0x45f   :  { %v5096_v41 = vpop.f32.mrf.mxu1 }
 0x460   :  { %v1318_v44 = vadd.f32 %v1317_v1, %v5096_v41  ;;  %v1341_v5 = vmul.f32 %v5096_v41, %v5096_v41 }
 0x462   :  { %v1356_v12 = vadd.f32 %v1355_v36, %v1341_v5  ;;  %v2726_v5 = vmul.f32 %v5090_v17, %v5090_v17  ;;  %v2704_v36 = vadd.f32 %v5094_v7, %v5090_v17 }
 0x467   :  { %v5100_v61 = vpop.f32.mrf.mxu1  ;;  %v5176_v16 = vpop.f32.mrf.mxu2 }
 0x468   :  { %v1319_v4 = vadd.f32 %v1318_v44, %v5100_v61  ;;  %v1342_v10 = vmul.f32 %v5100_v61, %v5100_v61 }
 0x46a   :  { %v1357_v35 = vadd.f32 %v1356_v12, %v1342_v10  ;;  %v2742_v10 = vadd.f32 %v2727_v47, %v2726_v5  ;;  %v2705_v12 = vadd.f32 %v2704_v36, %v5098_v34 }
 0x46f   :  { %v5104_v58 = vpop.f32.mrf.mxu1  ;;  %v5178_v1 = vpop.f32.mrf.mxu2 }
 0x470   :  { %v1320_v46 = vadd.f32 %v1319_v4, %v5104_v58  ;;  %v1343_v25 = vmul.f32 %v5104_v58, %v5104_v58  ;;  %v2728_v4 = vmul.f32 %v5098_v34, %v5098_v34 }
 0x472   :  { %v1358_v3 = vadd.f32 %v1357_v35, %v1343_v25 }
 0x477   :  { %v5110_v15 = vpop.f32.mrf.mxu1 }
 0x478   :  { %v1321_v0 = vadd.f32 %v1320_v46, %v5110_v15  ;;  %v1344_v62 = vmul.f32 %v5110_v15, %v5110_v15  ;;  %v2729_v46 = vmul.f32 %v5102_v9, %v5102_v9 }
 0x47a   :  { %v1359_v30 = vadd.f32 %v1358_v3, %v1344_v62  ;;  %v2706_v62 = vadd.f32 %v2705_v12, %v5102_v9  ;;  %v2730_v3 = vmul.f32 %v5108_v14, %v5108_v14 }
 0x47f   :  { %v5131_v6 = vpop.f32.mrf.mxu1 }
 0x480   :  { %v1322_v57 = vadd.f32 %v1321_v0, %v5131_v6  ;;  %v1345_v48 = vmul.f32 %v5131_v6, %v5131_v6  ;;  %v2743_v0 = vadd.f32 %v2742_v10, %v2728_v4 }
 0x482   :  { %v1360_v31 = vadd.f32 %v1359_v30, %v1345_v48  ;;  %v2744_v30 = vadd.f32 %v2743_v0, %v2729_v46 }
 0x487   :  { %v5152_v40 = vpop.f32.mrf.mxu1 }
 0x488   :  { %v1323_v43 = vadd.f32 %v1322_v57, %v5152_v40  ;;  %v1346_v59 = vmul.f32 %v5152_v40, %v5152_v40 }
 0x48a   :  { %v1324_v54 = vadd.f32 %v1323_v43, %v5106_v33  ;;  %v1361_v20 = vadd.f32 %v1360_v31, %v1346_v59  ;;  %v2707_v43 = vadd.f32 %v2706_v62, %v5108_v14  ;;  %v2731_v59 = vmul.f32 %v5129_v2, %v5129_v2 }
 0x48c   :  { %v1325_v39 = vadd.f32 %v1324_v54, %v5124_v28  ;;  %v1362_v26 = vadd.f32 %v1361_v20, %v1347_v18  ;;  %v2745_v18 = vadd.f32 %v2744_v30, %v2730_v3  ;;  %v2708_v20 = vadd.f32 %v2707_v43, %v5129_v2 }
 0x48e   :  { %v1326_v60 = vadd.f32 %v1325_v39, %v5147_v50  ;;  %v1363_v11 = vadd.f32 %v1362_v26, %v1348_v27  ;;  %v2732_v39 = vmul.f32 %v5145_v55, %v5145_v55  ;;  %v2746_v27 = vadd.f32 %v2745_v18, %v2731_v59 }
 0x48f   :  { %v5194_v57 = vpop.f32.mrf.mxu3  ;;  %v2709_v26 = vadd.f32 %v2708_v20, %v5145_v55 }
 0x490   :  { %v1327_v37 = vadd.f32 %v1326_v60, %v5168_v52  ;;  %v1364_v51 = vadd.f32 %v1363_v11, %v1349_v38  ;;  %v2733_v60 = vmul.f32 %v5166_v56, %v5166_v56  ;;  %v2738_v3 = vmul.f32 %v5194_v57, %v5194_v57 }
 0x492   :  { %v1328_v53 = vrot.slane %v1327_v37, 4  ;;  %v1365_v19 = vadd.f32 %v1364_v51, %v1350_v21  ;;  %v2710_v21 = vadd.f32 %v2709_v26, %v5166_v56  ;;  %v2734_v51 = vmul.f32 %v5176_v16, %v5176_v16 }
 0x494   :  { %v1329_v13 = vadd.f32 %v1328_v53, %v1327_v37  ;;  %v1366_v45 = vrot.slane %v1365_v19, 4  ;;  %v2747_v37 = vadd.f32 %v2746_v27, %v2732_v39 }
 0x496   :  { %v1330_v63 = vrot.slane %v1329_v13, 2  ;;  %v1367_v42 = vadd.f32 %v1366_v45, %v1365_v19  ;;  %v2748_v53 = vadd.f32 %v2747_v37, %v2733_v60  ;;  %v2711_v19 = vadd.f32 %v2710_v21, %v5176_v16 }
 0x498   :  { %v1331_v49 = vadd.f32 %v1330_v63, %v1329_v13  ;;  %v1368_v44 = vrot.slane %v1367_v42, 2  ;;  %v2735_v13 = vmul.f32 %v5178_v1, %v5178_v1 }
 0x49a   :  { %v1332_v25 = vrot.slane %v1331_v49, 1  ;;  %v1369_v35 = vadd.f32 %v1368_v44, %v1367_v42  ;;  %v5217_v42 = vpop.f32.mrf.mxu3  ;;  %v2712_v44 = vadd.f32 %v2711_v19, %v5178_v1 }
 0x49b   :  { %v2739_v59 = vmul.f32 %v5217_v42, %v5217_v42 }
 0x49c   :  { %v1333_v31 = vadd.f32 %v1332_v25, %v1331_v49  ;;  %v1370_v54 = vrot.slane %v1369_v35, 1  ;;  %v2749_v49 = vadd.f32 %v2748_v53, %v2734_v51 }
 0x49e   :  { %v5207_v38 = vmul.f32 0.0078125, %v1333_v31  ;;  %v1371_v11 = vadd.f32 %v1370_v54, %v1369_v35  ;;  %v2750_v36 = vadd.f32 %v2749_v49, %v2735_v13 }
 0x4a0   :  { %v1372_v45 = vmul.f32 0.0078125, %v1371_v11  ;;  %v1373_v63 = vmul.f32 %v5207_v38, %v5207_v38 }
 0x4a2   :  { %v1374_v12 = vsub.f32 %v1372_v45, %v1373_v63 }
 0x4a4   :  { %v1391_v0 = vadd.f32 1e-05, %v1374_v12 }
 0x4a6   :  { %3279 = vrsqrt.f32 %v1391_v0  ;;  %vm1398_vm11 = vweird.f32 %v1391_v0 }
 0x4ac   :  { %v3280_v11 = vpop.eup %3279 }
 0x4ad   :  { %v1393_v51 = vmul.f32 %v3280_v11, %v1391_v0  ;;  %vm1399_vm9 = vweird.f32 %v3280_v11  ;;  %v1380_v0 = vsub.f32 %v5092_v29, %v5207_v38  ;;  %v1387_v29 = vsub.f32 %v5106_v33, %v5207_v38  ;;  %v3273_v33 = vld [vmem:[%s5545_s9] ss:$0 sm:$0xff] }
 0x4ae   :  { %vm1400_vm12 = vmor %vm1398_vm11, %vm1399_vm9 }
 0x4af   :  { %v1394_v63 = vmul.f32 %v3280_v11, %v1393_v51 }
 0x4b7   :  { %v5196_v48 = vpop.f32.mrf.mxu2 }
 0x4b8   :  { %v2736_v5 = vmul.f32 %v5196_v48, %v5196_v48  ;;  %v2713_v4 = vadd.f32 %v2712_v44, %v5196_v48 }
 0x4ba   :  { %v2751_v46 = vadd.f32 %v2750_v36, %v2736_v5 }
 0x4bf   :  { %v5219_v47 = vpop.f32.mrf.mxu2 }
 0x4c0   :  { %v2737_v10 = vmul.f32 %v5219_v47, %v5219_v47  ;;  %v2714_v25 = vadd.f32 %v2713_v4, %v5219_v47  ;;  %v1395_v4 = vmul.f32 0.5, %v1394_v63 }
 0x4c2   :  { %v2752_v35 = vadd.f32 %v2751_v46, %v2737_v10  ;;  %v2715_v30 = vadd.f32 %v2714_v25, %v5194_v57 }
 0x4c4   :  { %v2753_v43 = vadd.f32 %v2752_v35, %v2738_v3  ;;  %v2716_v31 = vadd.f32 %v2715_v30, %v5217_v42  ;;  %v1396_v35 = vsub.f32 1.5, %v1395_v4 }
 0x4c6   :  { %v2754_v20 = vadd.f32 %v2753_v43, %v2739_v59  ;;  %v1397_v59 = vmul.f32 %v3280_v11, %v1396_v35 }
 0x4d8   :  { %v5228_v62 = vpop.f32.mrf.mxu3 }
 0x4d9   :  { %v2740_v54 = vmul.f32 %v5228_v62, %v5228_v62  ;;  %v2717_v18 = vadd.f32 %v2716_v31, %v5228_v62 }
 0x4db   :  { %v2755_v27 = vadd.f32 %v2754_v20, %v2740_v54  ;;  %v1375_v54 = vsub.f32 %v5076_v8, %v5207_v38  ;;  %v1377_v20 = vsub.f32 %v5084_v23, %v5207_v38  ;;  %v1381_v8 = vsub.f32 %v5096_v41, %v5207_v38 }
 0x4dc   :  { %v1384_v23 = vsub.f32 %v5110_v15, %v5207_v38  ;;  %v1388_v41 = vsub.f32 %v5124_v28, %v5207_v38 }
 0x4e0   :  { %v5239_v39 = vpop.f32.mrf.mxu3 }
 0x4e1   :  { %v2718_v26 = vadd.f32 %v2717_v18, %v5239_v39  ;;  %v2741_v60 = vmul.f32 %v5239_v39, %v5239_v39  ;;  %v1376_v18 = vsub.f32 %v5080_v32, %v5207_v38  ;;  %v1382_v32 = vsub.f32 %v5100_v61, %v5207_v38 }
 0x4e2   :  { %v1389_v61 = vsub.f32 %v5147_v50, %v5207_v38 }
 0x4e3   :  { %v2719_v37 = vrot.slane %v2718_v26, 4  ;;  %v2756_v21 = vadd.f32 %v2755_v27, %v2741_v60  ;;  %v1378_v27 = vsub.f32 %v5086_v22, %v5207_v38  ;;  %v1401_v60 = vsel %vm1400_vm12, %v3280_v11, %v1397_v59 }
 0x4e4   :  { %v1385_v22 = vsub.f32 %v5131_v6, %v5207_v38  ;;  %v1402_v11 = vmul.f32 %v1401_v60, %v1375_v54  ;;  %v1404_v6 = vmul.f32 %v1401_v60, %v1377_v20  ;;  %v1409_v28 = vmul.f32 %v1401_v60, %v1382_v32 }
 0x4e5   :  { %v2720_v53 = vadd.f32 %v2719_v37, %v2718_v26  ;;  %v2757_v19 = vrot.slane %v2756_v21, 4  ;;  %v1379_v26 = vsub.f32 %v5088_v24, %v5207_v38  ;;  %v1383_v37 = vsub.f32 %v5104_v58, %v5207_v38 }
 0x4e6   :  { %v1386_v24 = vsub.f32 %v5152_v40, %v5207_v38  ;;  %v1390_v58 = vsub.f32 %v5168_v52, %v5207_v38  ;;  %v1405_v51 = vmul.f32 %v1401_v60, %v1378_v27  ;;  %v1407_v40 = vmul.f32 %v1401_v60, %v1380_v0 }
 0x4e7   :  { %v2721_v13 = vrot.slane %v2720_v53, 2  ;;  %v2758_v45 = vadd.f32 %v2757_v19, %v2756_v21  ;;  %v1403_v21 = vmul.f32 %v1401_v60, %v1376_v18  ;;  %v1408_v19 = vmul.f32 %v1401_v60, %v1381_v8 }
 0x4e8   :  { %v1412_v52 = vmul.f32 %v1401_v60, %v1385_v22  ;;  %v1413_v38 = vmul.f32 %v1401_v60, %v1386_v24  ;;  %v1414_v63 = vmul.f32 %v1401_v60, %v1387_v29  ;;  %v1420_v4 = vmul.f32 %v3273_v33, %v1402_v11 }
 0x4e9   :  { %v2722_v49 = vadd.f32 %v2721_v13, %v2720_v53  ;;  %v2759_v44 = vrot.slane %v2758_v45, 2  ;;  %v1406_v53 = vmul.f32 %v1401_v60, %v1379_v26  ;;  %v1410_v13 = vmul.f32 %v1401_v60, %v1383_v37 }
 0x4ea   :  { %v1423_v35 = vmul.f32 %v3273_v33, %v1405_v51  ;;  %v1426_v59 = vmul.f32 %v3273_v33, %v1408_v19  ;;  %v1427_v54 = vmul.f32 %v3273_v33, %v1409_v28  ;;  %v1430_v27 = vmul.f32 %v3273_v33, %v1412_v52 }
 0x4eb   :  { %v2723_v5 = vrot.slane %v2722_v49, 1  ;;  %v2760_v36 = vadd.f32 %v2759_v44, %v2758_v45  ;;  %v1411_v45 = vmul.f32 %v1401_v60, %v1384_v23  ;;  %v1416_v44 = vmul.f32 %v1401_v60, %v1389_v61 }
 0x4ec   :  { %v1428_v18 = vmul.f32 %v3273_v33, %v1410_v13  ;;  %v1431_v26 = vmul.f32 %v3273_v33, %v1413_v38  ;;  %v1432_v0 = vmul.f32 %v3273_v33, %v1414_v63 }
 0x4ed   :  { %v2724_v10 = vadd.f32 %v2723_v5, %v2722_v49  ;;  %v2761_v12 = vrot.slane %v2760_v36, 1  ;;  %v1415_v49 = vmul.f32 %v1401_v60, %v1388_v41  ;;  %v1429_v20 = vmul.f32 %v3273_v33, %v1411_v45 }
 0x4ee   :  { %v1434_v32 = vmul.f32 %v3273_v33, %v1416_v44 }
 0x4ef   :  { %v5244_v46 = vmul.f32 0.0078125, %v2724_v10  ;;  %v2762_v25 = vadd.f32 %v2761_v12, %v2760_v36  ;;  %v1417_v36 = vmul.f32 %v1401_v60, %v1390_v58  ;;  %v1421_v10 = vmul.f32 %v3273_v33, %v1403_v21 }
 0x4f0   :  { %v1422_v12 = vmul.f32 %v3273_v33, %v1404_v6  ;;  %v1433_v8 = vmul.f32 %v3273_v33, %v1415_v49 }
 0x4f1   :  { %v2763_v3 = vmul.f32 0.0078125, %v2762_v25  ;;  %v2764_v30 = vmul.f32 %v5244_v46, %v5244_v46  ;;  %v5294_v25 = vld [vmem:[%s5545_s9 + $0x1] ss:$0 sm:$0xff]  ;;  %v5296_v37 = vmul.f32 %v3273_v33, %v1417_v36  ;;  %s5301_s9 = sld [smem:[#allocation3 + $0x1]]  ;;  %v2767_v13 = vsub.f32 %v5094_v7, %v5244_v46 }
 0x4f2   :  { %v5299_v23 = vadd.f32 %v5294_v25, %v1420_v4  ;;  %v5304_v22 = vadd.f32 %v5294_v25, %v1421_v10  ;;  %v5307_v24 = vadd.f32 %v5294_v25, %v1422_v12  ;;  %v5310_v29 = vadd.f32 %v5294_v25, %v1423_v35 }
 0x4f3   :  { %v2765_v43 = vsub.f32 %v2763_v3, %v2764_v30  ;;  %v1424_v3 = vmul.f32 %v3273_v33, %v1406_v53  ;;  %v1425_v30 = vmul.f32 %v3273_v33, %v1407_v40  ;;  %v5321_v58 = vadd.f32 %v5294_v25, %v1426_v59 }
 0x4f4   :  { %v5324_v11 = vadd.f32 %v5294_v25, %v1427_v54  ;;  %v5327_v21 = vadd.f32 %v5294_v25, %v1428_v18  ;;  %v5330_v6 = vadd.f32 %v5294_v25, %v1429_v20  ;;  %v5333_v51 = vadd.f32 %v5294_v25, %v1430_v27  ;;  %v3276_v27 = vld [vmem:[%s5543_s7 + $0x1] ss:$0 sm:$0xff] }
 0x4f5   :  { %v5248_v31 = vadd.f32 1e-05, %v2765_v43  ;;  %v5313_v41 = vadd.f32 %v5294_v25, %v1424_v3  ;;  %v5318_v61 = vadd.f32 %v5294_v25, %v1425_v30  ;;  %v5338_v33 = vadd.f32 %v5294_v25, %v1431_v26 }
 0x4f6   :  { %v5341_v40 = vadd.f32 %v5294_v25, %v1432_v0  ;;  %v5344_v19 = vadd.f32 %v5294_v25, %v1433_v8  ;;  %v5347_v28 = vadd.f32 %v5294_v25, %v1434_v32  ;;  %v2768_v45 = vsub.f32 %v5098_v34, %v5244_v46 }
 0x4f7   :  { %3281 = vrsqrt.f32 %v5248_v31  ;;  %vm2789_vm0 = vweird.f32 %v5248_v31  ;;  %v2769_v52 = vsub.f32 %v5102_v9, %v5244_v46  ;;  %v2770_v38 = vsub.f32 %v5108_v14, %v5244_v46 }
 0x4f8   :  { %v2771_v63 = vsub.f32 %v5129_v2, %v5244_v46  ;;  %v2773_v7 = vsub.f32 %v5166_v56, %v5244_v46  ;;  %v2774_v34 = vsub.f32 %v5176_v16, %v5244_v46  ;;  %v2775_v9 = vsub.f32 %v5178_v1, %v5244_v46 }
 0x4f9   :  { %v2776_v14 = vsub.f32 %v5196_v48, %v5244_v46  ;;  %v2777_v2 = vsub.f32 %v5219_v47, %v5244_v46  ;;  %v2779_v56 = vsub.f32 %v5217_v42, %v5244_v46  ;;  %v2780_v16 = vsub.f32 %v5228_v62, %v5244_v46 }
 0x4fa   :  { %v2781_v1 = vsub.f32 %v5239_v39, %v5244_v46  ;;  %v5384_v49 = vstv %s5301_s9 }
 0x4fd   :  { %v5283_v15 = vpop.eup %3281 }
 0x4fe   :  { %v2784_v50 = vmul.f32 %v5283_v15, %v5248_v31  ;;  %vm2790_vm15 = vweird.f32 %v5283_v15 }
 0x4ff   :  { %vm2791_vm1 = vmor %vm2789_vm0, %vm2790_vm15 }
 0x500   :  { %v2785_v5 = vmul.f32 %v5283_v15, %v2784_v50  ;;  %v2766_v50 = vsub.f32 %v5090_v17, %v5244_v46  ;;  %v2772_v17 = vsub.f32 %v5145_v55, %v5244_v46  ;;  %v2778_v55 = vsub.f32 %v5194_v57, %v5244_v46  ;;  %v3275_v57 = vld [vmem:[%s5543_s7] ss:$0 sm:$0xff] }
 0x502   :  { %v2786_v43 = vmul.f32 0.5, %v2785_v5 }
 0x504   :  { %v2787_v60 = vsub.f32 1.5, %v2786_v43 }
 0x506   :  { %v2788_v53 = vmul.f32 %v5283_v15, %v2787_v60 }
 0x508   :  { %v2792_v31 = vsel %vm2791_vm1, %v5283_v15, %v2788_v53  ;;  %v5387_v15 = vstv %s5315_s15 }
 0x509   :  { %v2793_v48 = vmul.f32 %v2792_v31, %v2766_v50  ;;  %v2794_v44 = vmul.f32 %v2792_v31, %v2767_v13  ;;  %v2795_v5 = vmul.f32 %v2792_v31, %v2768_v45  ;;  %v2796_v47 = vmul.f32 %v2792_v31, %v2769_v52 }
 0x50a   :  { %v2797_v36 = vmul.f32 %v2792_v31, %v2770_v38  ;;  %v2798_v42 = vmul.f32 %v2792_v31, %v2771_v63  ;;  %v2802_v4 = vmul.f32 %v2792_v31, %v2775_v9  ;;  %v2803_v10 = vmul.f32 %v2792_v31, %v2776_v14 }
 0x50b   :  { %v2799_v62 = vmul.f32 %v2792_v31, %v2772_v17  ;;  %v2800_v12 = vmul.f32 %v2792_v31, %v2773_v7  ;;  %v2801_v35 = vmul.f32 %v2792_v31, %v2774_v34  ;;  %v2806_v39 = vmul.f32 %v2792_v31, %v2779_v56 }
 0x50c   :  { %v2804_v46 = vmul.f32 %v2792_v31, %v2777_v2  ;;  %v2805_v3 = vmul.f32 %v2792_v31, %v2778_v55  ;;  %v2807_v30 = vmul.f32 %v2792_v31, %v2780_v16  ;;  %v2808_v43 = vmul.f32 %v2792_v31, %v2781_v1 }
 0x50d   :  { %v2811_v59 = vmul.f32 %v3275_v57, %v2793_v48  ;;  %v2812_v54 = vmul.f32 %v3275_v57, %v2794_v44  ;;  %v2813_v18 = vmul.f32 %v3275_v57, %v2795_v5  ;;  %v2814_v20 = vmul.f32 %v3275_v57, %v2796_v47 }
 0x50e   :  { %v2815_v26 = vmul.f32 %v3275_v57, %v2797_v36  ;;  %v2816_v0 = vmul.f32 %v3275_v57, %v2798_v42  ;;  %v2820_v60 = vmul.f32 %v3275_v57, %v2802_v4  ;;  %v2821_v8 = vmul.f32 %v3275_v57, %v2803_v10 }
 0x50f   :  { %v2817_v32 = vmul.f32 %v3275_v57, %v2799_v62  ;;  %v2818_v53 = vmul.f32 %v3275_v57, %v2800_v12  ;;  %v2819_v50 = vmul.f32 %v3275_v57, %v2801_v35  ;;  %v2824_v13 = vmul.f32 %v3275_v57, %v2806_v39 }
 0x510   :  { %v2822_v45 = vmul.f32 %v3275_v57, %v2804_v46  ;;  %v2823_v52 = vmul.f32 %v3275_v57, %v2805_v3  ;;  %v2825_v38 = vmul.f32 %v3275_v57, %v2807_v30  ;;  %v2826_v63 = vmul.f32 %v3275_v57, %v2808_v43 }
 0x511   :  { %v2829_v17 = vadd.f32 %v3276_v27, %v2811_v59  ;;  %v2830_v7 = vadd.f32 %v3276_v27, %v2812_v54  ;;  %v2831_v34 = vadd.f32 %v3276_v27, %v2813_v18  ;;  %v2832_v9 = vadd.f32 %v3276_v27, %v2814_v20 }
 0x512   :  { %v2833_v31 = vadd.f32 %v3276_v27, %v2815_v26  ;;  %v2834_v14 = vadd.f32 %v3276_v27, %v2816_v0  ;;  %v2838_v2 = vadd.f32 %v3276_v27, %v2820_v60  ;;  %v2839_v55 = vadd.f32 %v3276_v27, %v2821_v8 }
 0x513   :  { %v2835_v56 = vadd.f32 %v3276_v27, %v2817_v32  ;;  %v2836_v16 = vadd.f32 %v3276_v27, %v2818_v53  ;;  %v2837_v1 = vadd.f32 %v3276_v27, %v2819_v50  ;;  %v2842_v48 = vadd.f32 %v3276_v27, %v2824_v13 }
 0x514   :  { %v2840_v44 = vadd.f32 %v3276_v27, %v2822_v45  ;;  %v2841_v5 = vadd.f32 %v3276_v27, %v2823_v52  ;;  %v5395_v47 = vadd.f32 %v3276_v27, %v2825_v38  ;;  %v5397_v36 = vadd.f32 %v3276_v27, %v2826_v63 }
 0x515   :  { %vm2846_vm2 = vcmp.ge.f32.partialorder %v2829_v17, 0.0  ;;  %vm2847_vm3 = vcmp.ge.f32.partialorder %v2830_v7, 0.0  ;;  %vm2848_vm10 = vcmp.ge.f32.partialorder %v2831_v34, 0.0  ;;  %vm2849_vm4 = vcmp.ge.f32.partialorder %v2832_v9, 0.0 }
 0x516   :  { %vm2850_vm5 = vcmp.ge.f32.partialorder %v2833_v31, 0.0  ;;  %vm2851_vm6 = vcmp.ge.f32.partialorder %v2834_v14, 0.0  ;;  %v2872_v57 = vmul.f32 %v5384_v49, %v2838_v2  ;;  %v2873_v42 = vmul.f32 %v5384_v49, %v2839_v55 }
 0x517   :  { %vm2852_vm7 = vcmp.ge.f32.partialorder %v2835_v56, 0.0  ;;  %vm2855_vm8 = vcmp.ge.f32.partialorder %v2838_v2, 0.0  ;;  %vm2856_vm13 = vcmp.ge.f32.partialorder %v2839_v55, 0.0  ;;  %v2876_v4 = vmul.f32 %v5384_v49, %v2842_v48 }
 0x518   :  { %vm2859_vm14 = vcmp.ge.f32.partialorder %v2842_v48, 0.0  ;;  %v2863_v10 = vmul.f32 %v5384_v49, %v2829_v17  ;;  %v2864_v62 = vmul.f32 %v5384_v49, %v2830_v7  ;;  %v2865_v12 = vmul.f32 %v5384_v49, %v2831_v34 }
 0x519   :  { %vm2853_vm9 = vcmp.ge.f32.partialorder %v2836_v16, 0.0  ;;  %vm2854_vm11 = vcmp.ge.f32.partialorder %v2837_v1, 0.0  ;;  %vm2857_vm12 = vcmp.ge.f32.partialorder %v2840_v44, 0.0  ;;  %v2866_v35 = vmul.f32 %v5384_v49, %v2832_v9 }
 0x51a   :  { %v2867_v39 = vmul.f32 %v5384_v49, %v2833_v31  ;;  %v2868_v46 = vmul.f32 %v5384_v49, %v2834_v14  ;;  %v2888_v3 = vsel %vm2855_vm8, %v2838_v2, %v2872_v57  ;;  %v2889_v30 = vsel %vm2856_vm13, %v2839_v55, %v2873_v42 }
 0x51b   :  { %vm2858_vm15 = vcmp.ge.f32.partialorder %v2841_v5, 0.0  ;;  %v2869_v43 = vmul.f32 %v5384_v49, %v2835_v56  ;;  %v2870_v59 = vmul.f32 %v5384_v49, %v2836_v16  ;;  %v2892_v54 = vsel %vm2859_vm14, %v2842_v48, %v2876_v4 }
 0x51c   :  { %v2871_v18 = vmul.f32 %v5384_v49, %v2837_v1  ;;  %v2879_v20 = vsel %vm2846_vm2, %v2829_v17, %v2863_v10  ;;  %v2880_v27 = vsel %vm2847_vm3, %v2830_v7, %v2864_v62  ;;  %v2881_v26 = vsel %vm2848_vm10, %v2831_v34, %v2865_v12 }
 0x51d   :  { %v2874_v0 = vmul.f32 %v5384_v49, %v2840_v44  ;;  %v2882_v60 = vsel %vm2849_vm4, %v2832_v9, %v2866_v35  ;;  %v5417_v8 = vadd.f32 %v2888_v3, %v5330_v6  ;;  %v5420_v32 = vadd.f32 %v2889_v30, %v5333_v51 }
 0x51e   :  { %v2875_v53 = vmul.f32 %v5384_v49, %v2841_v5  ;;  %v2883_v50 = vsel %vm2850_vm5, %v2833_v31, %v2867_v39  ;;  %v2884_v13 = vsel %vm2851_vm6, %v2834_v14, %v2868_v46  ;;  %v5426_v45 = vadd.f32 %v2892_v54, %v5344_v19 }
 0x51f   :  { %v2885_v52 = vsel %vm2852_vm7, %v2835_v56, %v2869_v43  ;;  %v2895_v38 = vadd.f32 %v2879_v20, %v5299_v23  ;;  %v2896_v63 = vadd.f32 %v2880_v27, %v5304_v22  ;;  %v2897_v6 = vadd.f32 %v2881_v26, %v5307_v24 }
 0x520   :  { %vm2860_vm0 = vcmp.ge.f32.partialorder %v5395_v47, 0.0  ;;  %vm2861_vm1 = vcmp.ge.f32.partialorder %v5397_v36, 0.0  ;;  %v2886_v51 = vsel %vm2853_vm9, %v2836_v16, %v2870_v59  ;;  %v2898_v17 = vadd.f32 %v2882_v60, %v5310_v29 }
 0x521   :  { %v2877_v19 = vmul.f32 %v5384_v49, %v5395_v47  ;;  %v2878_v7 = vmul.f32 %v5384_v49, %v5397_v36  ;;  %v2887_v23 = vsel %vm2854_vm11, %v2837_v1, %v2871_v18  ;;  %v2899_v22 = vadd.f32 %v2883_v50, %v5313_v41 }
 0x522   :  { %v2890_v24 = vsel %vm2857_vm12, %v2840_v44, %v2874_v0  ;;  %v2891_v34 = vsel %vm2858_vm15, %v2841_v5, %v2875_v53  ;;  %v2900_v9 = vadd.f32 %v2884_v13, %v5318_v61  ;;  %v2901_v31 = vadd.f32 %v2885_v52, %v5321_v58 }
 0x523   :  { %v2902_v29 = vadd.f32 %v2886_v51, %v5324_v11  ;;  %v2929_v14 = vmul.f32 %v5387_v15, %v2895_v38  ;;  %v2930_v2 = vmul.f32 %v5387_v15, %v2896_v63  ;;  %v2931_v49 = vmul.f32 %v5387_v15, %v2897_v6 }
 0x524   :  { %vm2912_vm2 = vcmp.ge.f32.partialorder %v2895_v38, 0.0  ;;  %vm2913_vm3 = vcmp.ge.f32.partialorder %v2896_v63, 0.0  ;;  %vm2914_vm10 = vcmp.ge.f32.partialorder %v2897_v6, 0.0  ;;  %v2932_v41 = vmul.f32 %v5387_v15, %v2898_v17 }
 0x525   :  { %v2893_v55 = vsel %vm2860_vm0, %v5395_v47, %v2877_v19  ;;  %v2903_v61 = vadd.f32 %v2887_v23, %v5327_v21  ;;  %vm2915_vm4 = vcmp.ge.f32.partialorder %v2898_v17, 0.0  ;;  %v2933_v58 = vmul.f32 %v5387_v15, %v2899_v22 }
 0x526   :  { %v2894_v11 = vsel %vm2861_vm1, %v5397_v36, %v2878_v7  ;;  %vm2916_vm5 = vcmp.ge.f32.partialorder %v2899_v22, 0.0  ;;  %vm2917_vm6 = vcmp.ge.f32.partialorder %v2900_v9, 0.0  ;;  %v2934_v56 = vmul.f32 %v5387_v15, %v2900_v9 }
 0x527   :  { %v2935_v16 = vmul.f32 %v5387_v15, %v2901_v31  ;;  %v2945_v1 = vsel %vm2912_vm2, %v2895_v38, %v2929_v14  ;;  %v2946_v48 = vsel %vm2913_vm3, %v2896_v63, %v2930_v2  ;;  %v2947_v44 = vsel %vm2914_vm10, %v2897_v6, %v2931_v49 }
 0x528   :  { %v2906_v5 = vadd.f32 %v2890_v24, %v5338_v33  ;;  %vm2918_vm7 = vcmp.ge.f32.partialorder %v2901_v31, 0.0  ;;  %v2936_v21 = vmul.f32 %v5387_v15, %v2902_v29  ;;  %v2948_v47 = vsel %vm2915_vm4, %v2898_v17, %v2932_v41  ;;  %2961 = vst [vmem:[%s5547_s11] sm:$0xff] %v2945_v1 }
 0x529   :  { %v2907_v36 = vadd.f32 %v2891_v34, %v5341_v40  ;;  %vm2919_vm8 = vcmp.ge.f32.partialorder %v2902_v29, 0.0  ;;  %v2937_v57 = vmul.f32 %v5387_v15, %v2903_v61  ;;  %v2949_v42 = vsel %vm2916_vm5, %v2899_v22, %v2933_v58  ;;  %2962 = vst [vmem:[%s5547_s11 + $0x8] sm:$0xff] %v2946_v48 }
 0x52a   :  { %v1453_v33 = vadd.f32 %v5294_v25, %v5296_v37  ;;  %vm2920_vm13 = vcmp.ge.f32.partialorder %v2903_v61, 0.0  ;;  %v2938_v4 = vmul.f32 %v5387_v15, %v5417_v8  ;;  %v2950_v10 = vsel %vm2917_vm6, %v2900_v9, %v2934_v56  ;;  %2963 = vst [vmem:[%s5547_s11 + $0x10] sm:$0xff] %v2947_v44 }
 0x52b   :  { %v2909_v40 = vadd.f32 %v2893_v55, %v5347_v28  ;;  %vm2921_vm14 = vcmp.ge.f32.partialorder %v5417_v8, 0.0  ;;  %v2939_v62 = vmul.f32 %v5387_v15, %v5420_v32  ;;  %v2951_v12 = vsel %vm2918_vm7, %v2901_v31, %v2935_v16  ;;  %2964 = vst [vmem:[%s5547_s11 + $0x18] sm:$0xff] %v2948_v47 }
 0x52c   :  { %v2910_v25 = vadd.f32 %v2894_v11, %v1453_v33  ;;  %vm2922_vm9 = vcmp.ge.f32.partialorder %v5420_v32, 0.0  ;;  %v2940_v37 = vmul.f32 %v5387_v15, %v2906_v5  ;;  %v2952_v35 = vsel %vm2919_vm8, %v2902_v29, %v2936_v21  ;;  %2965 = vst [vmem:[%s5547_s11 + $0x20] sm:$0xff] %v2949_v42 }
 0x52d   :  { %vm2923_vm11 = vcmp.ge.f32.partialorder %v2906_v5, 0.0  ;;  %v2941_v28 = vmul.f32 %v5387_v15, %v2907_v36  ;;  %v2953_v39 = vsel %vm2920_vm13, %v2903_v61, %v2937_v57  ;;  %2966 = vst [vmem:[%s5547_s11 + $0x28] sm:$0xff] %v2950_v10  ;;  %vm2924_vm12 = vcmp.ge.f32.partialorder %v2907_v36, 0.0 }
 0x52e   :  { %v2942_v46 = vmul.f32 %v5387_v15, %v5426_v45  ;;  %v2954_v3 = vsel %vm2921_vm14, %v5417_v8, %v2938_v4  ;;  %2967 = vst [vmem:[%s5547_s11 + $0x30] sm:$0xff] %v2951_v12  ;;  %vm2925_vm15 = vcmp.ge.f32.partialorder %v5426_v45, 0.0  ;;  %v2943_v30 = vmul.f32 %v5387_v15, %v2909_v40 }
 0x52f   :  { %v2955_v43 = vsel %vm2922_vm9, %v5420_v32, %v2939_v62  ;;  %2968 = vst [vmem:[%s5547_s11 + $0x38] sm:$0xff] %v2952_v35  ;;  %vm2926_vm0 = vcmp.ge.f32.partialorder %v2909_v40, 0.0  ;;  %v2944_v59 = vmul.f32 %v5387_v15, %v2910_v25  ;;  %v2956_v54 = vsel %vm2923_vm11, %v2906_v5, %v2940_v37 }
 0x530   :  { %2969 = vst [vmem:[%s5547_s11 + $0x40] sm:$0xff] %v2953_v39  ;;  %vm2927_vm1 = vcmp.ge.f32.partialorder %v2910_v25, 0.0  ;;  %v2957_v18 = vsel %vm2924_vm12, %v2907_v36, %v2941_v28  ;;  %v2958_v20 = vsel %vm2925_vm15, %v5426_v45, %v2942_v46  ;;  %v2959_v27 = vsel %vm2926_vm0, %v2909_v40, %v2943_v30 }
 0x531   :  { %2970 = vst [vmem:[%s5547_s11 + $0x48] sm:$0xff] %v2954_v3  ;;  %v2960_v15 = vsel %vm2927_vm1, %v2910_v25, %v2944_v59 }
 0x532   :  { %2971 = vst [vmem:[%s5547_s11 + $0x50] sm:$0xff] %v2955_v43 }
 0x533   :  { %2972 = vst [vmem:[%s5547_s11 + $0x58] sm:$0xff] %v2956_v54 }
 0x534   :  { %2973 = vst [vmem:[%s5547_s11 + $0x60] sm:$0xff] %v2957_v18 }
 0x535   :  { %2974 = vst [vmem:[%s5547_s11 + $0x68] sm:$0xff] %v2958_v20 }
 0x536   :  { %2975 = vst [vmem:[%s5547_s11 + $0x70] sm:$0xff] %v2959_v27 }
 0x537   :  { %2976 = vst [vmem:[%s5547_s11 + $0x78] sm:$0xff] %v2960_v15 }
 0x538   :  { %2981 = vsyncpa [#allocation4], 1 }

</bundles_post_ra>
